<compile_context>
chip_gen: v6e
topology: v6e:2x2x1
jax: 0.10.0
libtpu: 0.0.40
codegen_flags: <defaults>
</compile_context>

<pallas_src>
import functools

import numpy as np
import jax
import jax.numpy as jnp
from jax.experimental import pallas as pl
from jax.experimental.pallas import tpu as pltpu


# ---------------------------------------------------------------------------
# Static mask helpers (identical semantics to the torch MaskedConv2d mask).
# ---------------------------------------------------------------------------
def _conv_mask_np(K, mask_type):
    U = V = K // 2
    col_start = V + (1 if mask_type == 'B' else 0)
    m = np.zeros((K, K), np.float32)
    m[:U, :] = 1.0
    m[U, :col_start] = 1.0
    return m


def _init_masked_weight(key, K, cin, cout, mask_type):
    bound = 1.0 / np.sqrt(cin * K * K)
    w = jax.random.uniform(key, (K, K, cin, cout), jnp.float32, -bound, bound)
    return w * jnp.asarray(_conv_mask_np(K, mask_type))[:, :, None, None]


def init_pixelcnn_params(key, in_channels, num_filters, num_color_values,
                         num_blocks):
    final_out = in_channels * num_color_values
    keys = jax.random.split(key, 3 + 3 * num_blocks)
    ki = iter(keys)
    params = {
        'layer1': _init_masked_weight(next(ki), 7, in_channels, num_filters,
                                      'A'),
        'blocks': [],
    }
    for _ in range(num_blocks):
        params['blocks'].append((
            _init_masked_weight(next(ki), 1, num_filters, num_filters, 'B'),
            _init_masked_weight(next(ki), 3, num_filters, num_filters, 'B'),
            _init_masked_weight(next(ki), 1, num_filters, num_filters, 'B'),
        ))
    params['logit1'] = _init_masked_weight(next(ki), 1, num_filters,
                                           num_filters, 'B')
    params['logit2'] = _init_masked_weight(next(ki), 1, num_filters,
                                           final_out, 'B')
    return params


# ---------------------------------------------------------------------------
# Pure-JAX f32 reference (mirrors the PyTorch module) for the self-check.
# ---------------------------------------------------------------------------
def pixelcnn_reference(params, x_nchw):
    def conv(h, w):
        K = w.shape[0]
        return jax.lax.conv_general_dilated(
            h, w, window_strides=(1, 1), padding=[(K // 2, K // 2)] * 2,
            dimension_numbers=('NCHW', 'HWIO', 'NCHW'))

    h = jax.nn.relu(conv(x_nchw, params['layer1']))          # layer1 (mask A)
    for (wa, wb, wc) in params['blocks']:                    # residual blocks
        t = jax.nn.relu(conv(h, wa))
        t = jax.nn.relu(conv(t, wb))
        h = conv(t, wc) + h
    g = jax.nn.relu(h)                                       # logit head
    g = jax.nn.relu(conv(g, params['logit1']))
    return conv(g, params['logit2'])


# ---------------------------------------------------------------------------
# Weight preparation: masked HWIO conv weights -> banded / block-diag GEMM
# weights over the row layout (N*H, W*C).  Done once, outside the kernel.
# ---------------------------------------------------------------------------
def _banded_row_weights(w_hwio, mask_type, W):
    """For each non-zero mask row kh, build B_kh of shape (W*Cin, W*Cout) so
    that out_row[y] += in_row[y - s] @ B_kh with s = K//2 - kh (rows out of
    range contribute zero == zero padding).  Horizontal taps and the
    horizontal zero padding are folded into the band structure.
    Returns a list of (s, B_kh) in kh order."""
    K, _, Cin, Cout = w_hwio.shape
    P = K // 2
    mask = _conv_mask_np(K, mask_type)
    out = []
    for kh in range(K):
        if not mask[kh].any():
            continue
        B = jnp.zeros((W * Cin, W * Cout), jnp.float32)
        for kw in range(K):
            if mask[kh, kw] == 0.0:
                continue
            band = np.eye(W, k=P - kw, dtype=np.float32)  # x_src = x + kw - P
            B = B + jnp.kron(jnp.asarray(band), w_hwio[kh, kw])
        out.append((P - kh, B))
    return out


def prepare_pixelcnn(params, W):
    assert len(params['blocks']) >= 1
    bf16 = jnp.bfloat16

    # 7x7 mask-A layer1: stacked banded weight over the 4 non-zero mask rows,
    # contraction zero-padded up to a multiple of 128 lanes (192 -> 256).
    l1 = _banded_row_weights(params['layer1'], 'A', W)
    w1 = jnp.concatenate([B for _, B in l1], axis=0)
    k_stack = int(w1.shape[0])
    k_pad = max(128, ((k_stack + 127) // 128) * 128)
    w1 = jnp.pad(w1, ((0, k_pad - k_stack), (0, 0))).astype(bf16)

    w_in, w_mid, w_out = [], [], []
    for (w_a, w_b, w_c) in params['blocks']:
        (_, B_in), = _banded_row_weights(w_a, 'B', W)        # 1x1 (full)
        mid = dict(_banded_row_weights(w_b, 'B', W))         # {1: row above, 0: current}
        # Fused 3x3 weight: rows [0:WF] multiply the row-above operand,
        # rows [WF:2WF] the current-row operand (matches kernel concat order).
        w_mid.append(jnp.concatenate([mid[1], mid[0]], axis=0))
        (_, B_out), = _banded_row_weights(w_c, 'B', W)       # 1x1 (full)
        w_in.append(B_in)
        w_out.append(B_out)

    (_, L1), = _banded_row_weights(params['logit1'], 'B', W)
    (_, L2), = _banded_row_weights(params['logit2'], 'B', W)

    return {
        'layer1_shifts': tuple(int(s) for s, _ in l1),   # static shift plan
        'k_stack': k_stack,
        'k_pad': int(k_pad),
        'w1': w1,                                        # (k_pad, W*F)   bf16
        'w_in': jnp.stack(w_in).astype(bf16),            # (NB, W*F, W*F) bf16
        'w_mid': jnp.stack(w_mid).astype(bf16),          # (NB, 2W*F, W*F) bf16
        'w_out': jnp.stack(w_out).astype(bf16),          # (NB, W*F, W*F) bf16
        'logit1': L1.astype(bf16),                       # (W*F, W*F)     bf16
        'logit2': L2.astype(bf16),                       # (W*F, W*Cout)  bf16
    }


# ---------------------------------------------------------------------------
# The fused Pallas kernel: grid axis = residual block index (weights stream).
# ---------------------------------------------------------------------------
def _pixelcnn_kernel(x_ref, w1_ref, win_ref, wmid_ref, wout_ref, l1_ref,
                     l2_ref, out_ref, h_ref, *, H):
    """x_ref:    (M, k_pad)        bf16  pre-stacked shifted input rows (layer1)
       w1_ref:   (k_pad, W*F)      bf16  banded 7x7 mask-A weight
       win_ref:  (W*F, W*F)        bf16  this block's 1x1-in weight   (streamed)
       wmid_ref: (2*W*F, W*F)      bf16  this block's fused 3x3 weight(streamed)
       wout_ref: (W*F, W*F)        bf16  this block's 1x1-out weight  (streamed)
       l1_ref:   (W*F, W*F)        bf16  logit-head 1x1 #1
       l2_ref:   (W*F, W*Cout)     bf16  logit-head 1x1 #2
       out_ref:  (M, W*Cout)       f32   logits (written on last step only)
       h_ref:    (M, W*F)          f32   residual stream (persistent scratch)"""
    f32, bf16 = jnp.float32, jnp.bfloat16
    b = pl.program_id(0)

    # layer1: 7x7 mask-A conv as one deep GEMM + ReLU, only on the first step.
    @pl.when(b == 0)
    def _():
        h_ref[...] = jnp.maximum(
            jnp.dot(x_ref[...], w1_ref[...], preferred_element_type=f32), 0.0)

    h = h_ref[...]

    # --- residual block b: 1x1 -> ReLU -> 3x3 -> ReLU -> 1x1, + skip -------
    t = jnp.maximum(
        jnp.dot(h.astype(bf16), win_ref[...], preferred_element_type=f32),
        0.0)

    # "Row above" operand for the 3x3 mask-B conv: XLU sublane roll + zero of
    # each image's first row (replaces the old (M,M) shift-matrix matmul).
    # The iota/compare is a handful of VPU ops — negligible vs. the MXU chain.
    row = jax.lax.broadcasted_iota(jnp.int32, t.shape, 0)
    t_up = jnp.where((row % H) == 0, 0.0, pltpu.roll(t, shift=1, axis=0))

    # Single fused GEMM over both vertical taps: K = 2*W*F.
    mid_in = jnp.concatenate([t_up, t], axis=1).astype(bf16)
    t = jnp.maximum(
        jnp.dot(mid_in, wmid_ref[...], preferred_element_type=f32), 0.0)

    h = jnp.dot(t.astype(bf16), wout_ref[...],
                preferred_element_type=f32) + h
    h_ref[...] = h

    # logit head only on the last step: ReLU -> 1x1 -> ReLU -> 1x1.
    @pl.when(b == pl.num_programs(0) - 1)
    def _():
        g = jnp.maximum(h, 0.0).astype(bf16)
        g = jnp.maximum(
            jnp.dot(g, l1_ref[...], preferred_element_type=f32), 0.0)
        out_ref[...] = jnp.dot(g.astype(bf16), l2_ref[...],
                               preferred_element_type=f32)


# ---------------------------------------------------------------------------
# Wrapper: input plumbing (tiny XLA ops) + one pallas_call + output reshape.
# ---------------------------------------------------------------------------
def _shift_rows_down(x3, s):
    # x3: (N, H, W*C). Rows shifted down by s inside each image, zero fill.
    if s == 0:
        return x3
    N, H, WC = x3.shape
    return jnp.concatenate(
        [jnp.zeros((N, s, WC), x3.dtype), x3[:, :H - s, :]], axis=1)


def pixelcnn_forward(prepared, x_nchw):
    N, Cin, H, W = x_nchw.shape
    M = N * H
    NB, WF, _ = prepared['w_in'].shape
    WCout = prepared['logit2'].shape[-1]
    Cout = WCout // W
    k_pad = prepared['k_pad']

    # NCHW -> lane-dense row layout (N*H, W*Cin); stack the vertically shifted
    # copies needed by the 7x7 mask-A layer (so layer1 is a single deep GEMM);
    # zero-pad the contraction to a multiple of 128 lanes.
    x_rows = jnp.transpose(x_nchw, (0, 2, 3, 1)).astype(jnp.float32)
    x_rows = x_rows.reshape(N, H, W * Cin)
    x_stack = jnp.concatenate(
        [_shift_rows_down(x_rows, s) for s in prepared['layer1_shifts']],
        axis=-1).reshape(M, -1)
    x_stack = jnp.pad(x_stack, ((0, 0), (0, k_pad - x_stack.shape[1])))
    x_stack = x_stack.astype(jnp.bfloat16)

    def const_spec(shape):
        return pl.BlockSpec(shape, lambda b: (0,) * len(shape))

    def stream_spec(shape):
        return pl.BlockSpec((None,) + shape, lambda b: (b, 0, 0))

    kernel = functools.partial(_pixelcnn_kernel, H=H)
    out_rows = pl.pallas_call(
        kernel,
        out_shape=jax.ShapeDtypeStruct((M, WCout), jnp.float32),
        grid_spec=pltpu.PrefetchScalarGridSpec(
            num_scalar_prefetch=0,
            grid=(NB,),
            in_specs=[
                const_spec((M, k_pad)),        # x_stack   (loaded once)
                const_spec((k_pad, WF)),       # w1        (loaded once)
                stream_spec((WF, WF)),         # per-block 1x1-in   (streamed)
                stream_spec((2 * WF, WF)),     # per-block fused 3x3(streamed)
                stream_spec((WF, WF)),         # per-block 1x1-out  (streamed)
                const_spec((WF, WF)),          # logit1
                const_spec((WF, WCout)),       # logit2
            ],
            out_specs=const_spec((M, WCout)),
            scratch_shapes=[pltpu.VMEM((M, WF), jnp.float32)],
        ),
        compiler_params=pltpu.CompilerParams(
            dimension_semantics=("arbitrary",),
            vmem_limit_bytes=32 * 1024 * 1024),
    )(x_stack, prepared['w1'], prepared['w_in'], prepared['w_mid'],
      prepared['w_out'], prepared['logit1'], prepared['logit2'])

    # (N*H, W*Cout) -> NCHW logits (cheap XLA reshape/transpose of ~48 KB).
    return jnp.transpose(out_rows.reshape(N, H, W, Cout), (0, 3, 1, 2))


if __name__ == "__main__":
    key = jax.random.PRNGKey(0)
    pkey, xkey = jax.random.split(key)

    # Small, module-consistent config.
    in_channels = 3
    num_filters = 32
    num_color_values = 8
    num_blocks = 2
    N, H, W = 2, 16, 16

    params = init_pixelcnn_params(pkey, in_channels, num_filters,
                                  num_color_values, num_blocks)
    prepared = prepare_pixelcnn(params, W)
    x = jax.random.uniform(xkey, (N, in_channels, H, W), jnp.float32)

    fwd = jax.jit(lambda xx: pixelcnn_forward(prepared, xx))
    out = jax.block_until_ready(fwd(x))

    expected_shape = (N, in_channels * num_color_values, H, W)
    assert out.shape == expected_shape, (out.shape, expected_shape)
    assert bool(jnp.all(jnp.isfinite(out)))

    # Self-check vs. pure-JAX f32 reference. Kernel uses bf16 GEMM operands
    # with f32 accumulation, so allow a few percent relative (Frobenius) error.
    ref = jax.block_until_ready(
        jax.jit(lambda xx: pixelcnn_reference(params, xx))(x))
    rel = float(jnp.linalg.norm(out - ref) / jnp.linalg.norm(ref))
    assert rel < 5e-2, f"relative error too large: {rel}"

    print("KERNEL_OK")
</pallas_src>

<mosaic_0001>
module attributes {stable_mosaic.version = 11 : i64} {
  func.func @_pixelcnn_kernel(%arg0: i32, %arg1: memref<32x256xbf16, #tpu.memory_space<vmem>>, %arg2: memref<256x512xbf16, #tpu.memory_space<vmem>>, %arg3: memref<1x512x512xbf16, #tpu.memory_space<vmem>>, %arg4: memref<1x1024x512xbf16, #tpu.memory_space<vmem>>, %arg5: memref<1x512x512xbf16, #tpu.memory_space<vmem>>, %arg6: memref<512x512xbf16, #tpu.memory_space<vmem>>, %arg7: memref<512x384xbf16, #tpu.memory_space<vmem>>, %arg8: memref<32x384xf32, #tpu.memory_space<vmem>>, %arg9: memref<32x512xf32, #tpu.memory_space<vmem>>) attributes {dimension_semantics = [#tpu.dimension_semantics<arbitrary>], iteration_bounds = array<i64: 2>, scalar_prefetch = 0 : i64, scratch_operands = 1 : i64, tpu.core_type = #tpu.core_type<tc>, window_params = [{pipeline_mode = #tpu.pipeline_mode<synchronous>, transform_indices = @transform_0, window_bounds = array<i64: 32, 256>}, {pipeline_mode = #tpu.pipeline_mode<synchronous>, transform_indices = @transform_1, window_bounds = array<i64: 256, 512>}, {transform_indices = @transform_2, window_bounds = array<i64: 1, 512, 512>}, {transform_indices = @transform_3, window_bounds = array<i64: 1, 1024, 512>}, {transform_indices = @transform_4, window_bounds = array<i64: 1, 512, 512>}, {pipeline_mode = #tpu.pipeline_mode<synchronous>, transform_indices = @transform_5, window_bounds = array<i64: 512, 512>}, {pipeline_mode = #tpu.pipeline_mode<synchronous>, transform_indices = @transform_6, window_bounds = array<i64: 512, 384>}, {pipeline_mode = #tpu.pipeline_mode<synchronous>, transform_indices = @transform_7, window_bounds = array<i64: 32, 384>}]} {
    %c0_i32 = arith.constant 0 : i32
    %0 = arith.cmpi eq, %arg0, %c0_i32 : i32
    %1 = arith.extui %0 : i1 to i32
    %c0_i32_0 = arith.constant 0 : i32
    %2 = arith.cmpi ne, %1, %c0_i32_0 : i32
    scf.if %2 {
      %c0_26 = arith.constant 0 : index
      %c0_27 = arith.constant 0 : index
      %48 = vector.load %arg1[%c0_26, %c0_27] : memref<32x256xbf16, #tpu.memory_space<vmem>>, vector<32x256xbf16>
      %c0_28 = arith.constant 0 : index
      %c0_29 = arith.constant 0 : index
      %49 = vector.load %arg2[%c0_28, %c0_29] : memref<256x512xbf16, #tpu.memory_space<vmem>>, vector<256x512xbf16>
      %cst_30 = arith.constant dense<0.000000e+00> : vector<32x512xf32>
      %50 = tpu.matmul %48, %49, %cst_30 {dimension_numbers = #tpu.dot_dimension_numbers<[1], [0], [0], [1], [0, 0, 1, 1], [], []>} : vector<32x256xbf16>, vector<256x512xbf16>, vector<32x512xf32> -> vector<32x512xf32>
      %cst_31 = arith.constant 0.000000e+00 : f32
      %51 = vector.broadcast %cst_31 : f32 to vector<32x512xf32>
      %52 = arith.maximumf %50, %51 : vector<32x512xf32>
      %c0_32 = arith.constant 0 : index
      %c0_33 = arith.constant 0 : index
      %53 = vector.load %arg9[%c0_32, %c0_33] : memref<32x512xf32, #tpu.memory_space<vmem>>, vector<32x512xf32>
      tpu.vector_store %arg9[%c0_32, %c0_33], %52 {strides = array<i32>} : memref<32x512xf32, #tpu.memory_space<vmem>>, vector<32x512xf32>,
    } else {
    }
    %c0 = arith.constant 0 : index
    %c0_1 = arith.constant 0 : index
    %3 = vector.load %arg9[%c0, %c0_1] : memref<32x512xf32, #tpu.memory_space<vmem>>, vector<32x512xf32>
    %4 = arith.truncf %3 : vector<32x512xf32> to vector<32x512xbf16>
    %c0_2 = arith.constant 0 : index
    %c0_3 = arith.constant 0 : index
    %c0_4 = arith.constant 0 : index
    %5 = vector.load %arg3[%c0_2, %c0_3, %c0_4] : memref<1x512x512xbf16, #tpu.memory_space<vmem>>, vector<1x512x512xbf16>
    %6 = vector.shape_cast %5 : vector<1x512x512xbf16> to vector<512x512xbf16>
    %cst = arith.constant dense<0.000000e+00> : vector<32x512xf32>
    %7 = tpu.matmul %4, %6, %cst {dimension_numbers = #tpu.dot_dimension_numbers<[1], [0], [0], [1], [0, 0, 1, 1], [], []>} : vector<32x512xbf16>, vector<512x512xbf16>, vector<32x512xf32> -> vector<32x512xf32>
    %cst_5 = arith.constant 0.000000e+00 : f32
    %8 = vector.broadcast %cst_5 : f32 to vector<32x512xf32>
    %9 = arith.maximumf %7, %8 : vector<32x512xf32>
    %10 = tpu.iota {dimensions = array<i32: 0>} : vector<32x512xi32>
    %c16_i32 = arith.constant 16 : i32
    %c0_i32_6 = arith.constant 0 : i32
    %11 = arith.cmpi eq, %c16_i32, %c0_i32_6 : i32
    %c1_i32 = arith.constant 1 : i32
    %12 = arith.select %11, %c1_i32, %c16_i32 : i32
    %13 = vector.broadcast %12 : i32 to vector<32x512xi32>
    %14 = arith.remsi %10, %13 : vector<32x512xi32>
    %c0_i32_7 = arith.constant 0 : i32
    %15 = vector.broadcast %c0_i32_7 : i32 to vector<32x512xi32>
    %16 = arith.cmpi ne, %14, %15 : vector<32x512xi32>
    %c0_i32_8 = arith.constant 0 : i32
    %17 = vector.broadcast %c0_i32_8 : i32 to vector<32x512xi32>
    %18 = arith.cmpi slt, %14, %17 : vector<32x512xi32>
    %c0_i32_9 = arith.constant 0 : i32
    %19 = arith.cmpi slt, %12, %c0_i32_9 : i32
    %20 = vector.broadcast %19 : i1 to vector<32x512xi1>
    %21 = vector.broadcast %20 : vector<32x512xi1> to vector<32x512xi1>
    %22 = arith.xori %18, %21 : vector<32x512xi1>
    %23 = arith.andi %22, %16 : vector<32x512xi1>
    %24 = vector.broadcast %12 : i32 to vector<32x512xi32>
    %25 = arith.addi %14, %24 : vector<32x512xi32>
    %26 = arith.select %23, %25, %14 : vector<32x512xi1>, vector<32x512xi32>
    %c0_i32_10 = arith.constant 0 : i32
    %27 = vector.broadcast %c0_i32_10 : i32 to vector<32x512xi32>
    %28 = arith.cmpi eq, %26, %27 : vector<32x512xi32>
    %c1_i32_11 = arith.constant 1 : i32
    %29 = tpu.dynamic_rotate %9 by %c1_i32_11 dim 0 : vector<32x512xf32>, i32 -> vector<32x512xf32>
    %cst_12 = arith.constant 0.000000e+00 : f32
    %30 = vector.broadcast %cst_12 : f32 to vector<32x512xf32>
    %31 = arith.select %28, %30, %29 : vector<32x512xi1>, vector<32x512xf32>
    %32 = tpu.concatenate %31, %9 in 1 : vector<32x512xf32>, vector<32x512xf32> -> vector<32x1024xf32>
    %33 = arith.truncf %32 : vector<32x1024xf32> to vector<32x1024xbf16>
    %c0_13 = arith.constant 0 : index
    %c0_14 = arith.constant 0 : index
    %c0_15 = arith.constant 0 : index
    %34 = vector.load %arg4[%c0_13, %c0_14, %c0_15] : memref<1x1024x512xbf16, #tpu.memory_space<vmem>>, vector<1x1024x512xbf16>
    %35 = vector.shape_cast %34 : vector<1x1024x512xbf16> to vector<1024x512xbf16>
    %cst_16 = arith.constant dense<0.000000e+00> : vector<32x512xf32>
    %36 = tpu.matmul %33, %35, %cst_16 {dimension_numbers = #tpu.dot_dimension_numbers<[1], [0], [0], [1], [0, 0, 1, 1], [], []>} : vector<32x1024xbf16>, vector<1024x512xbf16>, vector<32x512xf32> -> vector<32x512xf32>
    %cst_17 = arith.constant 0.000000e+00 : f32
    %37 = vector.broadcast %cst_17 : f32 to vector<32x512xf32>
    %38 = arith.maximumf %36, %37 : vector<32x512xf32>
    %39 = arith.truncf %38 : vector<32x512xf32> to vector<32x512xbf16>
    %c0_18 = arith.constant 0 : index
    %c0_19 = arith.constant 0 : index
    %c0_20 = arith.constant 0 : index
    %40 = vector.load %arg5[%c0_18, %c0_19, %c0_20] : memref<1x512x512xbf16, #tpu.memory_space<vmem>>, vector<1x512x512xbf16>
    %41 = vector.shape_cast %40 : vector<1x512x512xbf16> to vector<512x512xbf16>
    %cst_21 = arith.constant dense<0.000000e+00> : vector<32x512xf32>
    %42 = tpu.matmul %39, %41, %cst_21 {dimension_numbers = #tpu.dot_dimension_numbers<[1], [0], [0], [1], [0, 0, 1, 1], [], []>} : vector<32x512xbf16>, vector<512x512xbf16>, vector<32x512xf32> -> vector<32x512xf32>
    %43 = arith.addf %42, %3 : vector<32x512xf32>
    %c0_22 = arith.constant 0 : index
    %c0_23 = arith.constant 0 : index
    %44 = vector.load %arg9[%c0_22, %c0_23] : memref<32x512xf32, #tpu.memory_space<vmem>>, vector<32x512xf32>
    tpu.vector_store %arg9[%c0_22, %c0_23], %43 {strides = array<i32>} : memref<32x512xf32, #tpu.memory_space<vmem>>, vector<32x512xf32>,
    %c1_i32_24 = arith.constant 1 : i32
    %45 = arith.cmpi eq, %arg0, %c1_i32_24 : i32
    %46 = arith.extui %45 : i1 to i32
    %c0_i32_25 = arith.constant 0 : i32
    %47 = arith.cmpi ne, %46, %c0_i32_25 : i32
    scf.if %47 {
      %cst_26 = arith.constant 0.000000e+00 : f32
      %48 = vector.broadcast %cst_26 : f32 to vector<32x512xf32>
      %49 = arith.maximumf %43, %48 : vector<32x512xf32>
      %50 = arith.truncf %49 : vector<32x512xf32> to vector<32x512xbf16>
      %c0_27 = arith.constant 0 : index
      %c0_28 = arith.constant 0 : index
      %51 = vector.load %arg6[%c0_27, %c0_28] : memref<512x512xbf16, #tpu.memory_space<vmem>>, vector<512x512xbf16>
      %cst_29 = arith.constant dense<0.000000e+00> : vector<32x512xf32>
      %52 = tpu.matmul %50, %51, %cst_29 {dimension_numbers = #tpu.dot_dimension_numbers<[1], [0], [0], [1], [0, 0, 1, 1], [], []>} : vector<32x512xbf16>, vector<512x512xbf16>, vector<32x512xf32> -> vector<32x512xf32>
      %cst_30 = arith.constant 0.000000e+00 : f32
      %53 = vector.broadcast %cst_30 : f32 to vector<32x512xf32>
      %54 = arith.maximumf %52, %53 : vector<32x512xf32>
      %55 = arith.truncf %54 : vector<32x512xf32> to vector<32x512xbf16>
      %c0_31 = arith.constant 0 : index
      %c0_32 = arith.constant 0 : index
      %56 = vector.load %arg7[%c0_31, %c0_32] : memref<512x384xbf16, #tpu.memory_space<vmem>>, vector<512x384xbf16>
      %cst_33 = arith.constant dense<0.000000e+00> : vector<32x384xf32>
      %57 = tpu.matmul %55, %56, %cst_33 {dimension_numbers = #tpu.dot_dimension_numbers<[1], [0], [0], [1], [0, 0, 1, 1], [], []>} : vector<32x512xbf16>, vector<512x384xbf16>, vector<32x384xf32> -> vector<32x384xf32>
      %c0_34 = arith.constant 0 : index
      %c0_35 = arith.constant 0 : index
      %58 = vector.load %arg8[%c0_34, %c0_35] : memref<32x384xf32, #tpu.memory_space<vmem>>, vector<32x384xf32>
      tpu.vector_store %arg8[%c0_34, %c0_35], %57 {strides = array<i32>} : memref<32x384xf32, #tpu.memory_space<vmem>>, vector<32x384xf32>,
    } else {
    }
    return
  }
  func.func @transform_0(%arg0: i32) -> (i32, i32) {
    %c0_i32 = arith.constant 0 : i32
    %c0_i32_0 = arith.constant 0 : i32
    %c0_i32_1 = arith.constant 0 : i32
    return %c0_i32, %c0_i32_0 : i32, i32
  }
  func.func @transform_1(%arg0: i32) -> (i32, i32) {
    %c0_i32 = arith.constant 0 : i32
    %c0_i32_0 = arith.constant 0 : i32
    %c0_i32_1 = arith.constant 0 : i32
    return %c0_i32, %c0_i32_0 : i32, i32
  }
  func.func @transform_2(%arg0: i32) -> (i32, i32, i32) {
    %c0_i32 = arith.constant 0 : i32
    %c0_i32_0 = arith.constant 0 : i32
    %c0_i32_1 = arith.constant 0 : i32
    return %arg0, %c0_i32, %c0_i32_0 : i32, i32, i32
  }
  func.func @transform_3(%arg0: i32) -> (i32, i32, i32) {
    %c0_i32 = arith.constant 0 : i32
    %c0_i32_0 = arith.constant 0 : i32
    %c0_i32_1 = arith.constant 0 : i32
    return %arg0, %c0_i32, %c0_i32_0 : i32, i32, i32
  }
  func.func @transform_4(%arg0: i32) -> (i32, i32, i32) {
    %c0_i32 = arith.constant 0 : i32
    %c0_i32_0 = arith.constant 0 : i32
    %c0_i32_1 = arith.constant 0 : i32
    return %arg0, %c0_i32, %c0_i32_0 : i32, i32, i32
  }
  func.func @transform_5(%arg0: i32) -> (i32, i32) {
    %c0_i32 = arith.constant 0 : i32
    %c0_i32_0 = arith.constant 0 : i32
    %c0_i32_1 = arith.constant 0 : i32
    return %c0_i32, %c0_i32_0 : i32, i32
  }
  func.func @transform_6(%arg0: i32) -> (i32, i32) {
    %c0_i32 = arith.constant 0 : i32
    %c0_i32_0 = arith.constant 0 : i32
    %c0_i32_1 = arith.constant 0 : i32
    return %c0_i32, %c0_i32_0 : i32, i32
  }
  func.func @transform_7(%arg0: i32) -> (i32, i32) {
    %c0_i32 = arith.constant 0 : i32
    %c0_i32_0 = arith.constant 0 : i32
    %c0_i32_1 = arith.constant 0 : i32
    return %c0_i32, %c0_i32_0 : i32, i32
  }
}

</mosaic_0001>

<bundles_post_ra>
// kernel: _lambda_.1
= control target key start
LH: loop header
LB: loop body
LE: loop exit
PB: predicated region body
PF: predicated region fallthrough
CT: control target
= control target key end

     0   :  { %s10693_s0 = inlined_call_operand.vmem [shape: bf16[32,256], index: 0, kind: input, shape index: {}]   ;;  %s10694_s1 = inlined_call_operand.hbm [shape: bf16[256,512], index: 1, kind: input, shape index: {}]   ;;  %s10695_s2 = inlined_call_operand.hbm [shape: bf16[2,512,512], index: 2, kind: input, shape index: {}]   ;;  %s10696_s3 = inlined_call_operand.hbm [shape: bf16[2,1024,512], index: 3, kind: input, shape index: {}]   ;;  %s10697_s4 = inlined_call_operand.hbm [shape: bf16[2,512,512], index: 4, kind: input, shape index: {}]   ;;  %s10698_s5 = inlined_call_operand.hbm [shape: bf16[512,512], index: 5, kind: input, shape index: {}]   ;;  %s10699_s6 = inlined_call_operand.hbm [shape: bf16[512,384], index: 6, kind: input, shape index: {}]   ;;  %s10700_s7 = inlined_call_operand.vmem [shape: f32[32,384], index: 7, kind: output, shape index: {}]  }
   0x1   :  { %10716 = sst [smem:[#allocation21_spill]] %s10694_s1 }
   0x2   :  { %10717 = sst [smem:[#allocation22_spill]] %s10695_s2 }
   0x3   :  { %10718 = sst [smem:[#allocation23_spill]] %s10698_s5 }
   0x4   :  { %12 = vsyncpa [#allocation4], 0 }
   0x5   :  { %13 = vsyncpa [#allocation6], 0 }
   0x6   :  { %15 = vsyncpa [#allocation6 + $0x1], 0 }
   0x7   :  { %16 = vsyncpa [#allocation9], 0 }
   0x8   :  { %18 = vsyncpa [#allocation9 + $0x1], 0 }
   0x9   :  { %19 = vsyncpa [#allocation12], 0  ;;  %s9590_s24 = smov 0   ;;  %s9592_s25 = smov 0  }
   0xa   :  { %s9594_s26 = smov 0   ;;  %s9596_s27 = smov 0  }
   0xb LB: > { %10719 = sst [smem:[#allocation18_spill]] %s9533_s26  ;;  %s9609_s28 = sadd.s32 4294967295, %s9537_s27   ;;  %s9537_s27 = sphi %s9596_s27, %s10750_s27   ;;  %s9533_s26 = sphi %s9594_s26, %s10752_s26   ;;  %s9529_s25 = sphi %s9592_s25, %s10754_s25   ;;  %s9525_s24 = sphi %s9590_s24, %s10753_s24  }
   0xc   : > { %p87_p0 = scmp.ne.s32.totalorder %s9529_s25, %s9525_s24  ;;  %p10707_p1 = scmp.eq.s32.totalorder %s9609_s28, 0 }
   0xd   : > { %p7080_p2 = scmp.ge.s32.totalorder %s9537_s27, 1  ;;  %p213_p3 = scmp.lt.s32.totalorder %s9537_s27, 3 }
   0xe   : > { %p9618_p5 = por %p10707_p1, %p87_p0  ;;  %s9539_s8 = smov [#allocation10]  }
   0xf   : > { %p9622_p6 = pnand %p7080_p2, %p213_p3  ;;  %s241_s9 = sshll.u32 %s9539_s8, 4  ;;  %s242_s9 = int_to_ptr.vmem [resolvable:$true] %s241_s9 }
  0x10   : > { %s10720_s29 = scalar_select %p9618_p5, 1, 0 }
  0x11   : > { %s10721_s30 = scalar_select %p9622_p6, 1, 0 }
  0x12   : > { %p8052_p7 = pneg %p9622_p6  ;;  %s9635_s11 = sadd.s32 1, %s9537_s27  }
  0x13   : > { %10723 = sst [smem:[#allocation19_spill]] %s9635_s11  ;;  %s74_s12 = sadd.s32 1, %s9533_s26 }
  0x14   : > { %p9630_p8 = pnand %p8052_p7, %p10707_p1  ;;  %s71_s13 = ssub.s32 %s9537_s27, %s9635_s11 }
  0x15   : > { %s9336_s14 = scalar_lea.vmem %s242_s9, 16384  ;;  %p9344_p13 = scmp.lt.s32.totalorder %s242_s9, %s242_s9 }
  0x16   : > { %s10722_s10 = scalar_select %p9630_p8, 1, 0 }
  0x17   : > { %p10708_p9 = pneg %p9630_p8  ;;  %p9337_p10 = scmp.ne.s32.totalorder %s242_s9, %s9336_s14 }
  0x18   : > { %p9345_p0 = scmp.lt.s32.totalorder %s9336_s14, %s9336_s14 }
  0x19   : > { %p9339_p11 = pnand %p9337_p10, %p10708_p9 }
  0x1a   : > { %p9346_p2 = por %p9345_p0, %p9344_p13 }
  0x1b   : > { %p9340_p12 = pneg %p9339_p11 }
  0x1d   : > { %p9347_p3 = pnand %p9346_p2, %p9340_p12 }
  0x1f   : > { %9350 = shalt.err (!%p9347_p3)
}
  0x20   : > { %s10702_s15 = smov 256   ;;  %s10704_s16 = smov 16  }
  0x21   : > { %s10724_s5 = sld [smem:[#allocation23_spill]]  ;;  %p72_p7 = scmp.eq.s32.totalorder %s71_s13, 0 }
  0x22   : > { %p81_p10 = scmp.ne.s32.totalorder %s9533_s26, %s9529_s25  ;;  %p82_p11 = scmp.eq.s32.totalorder %s9537_s27, 0 }
  0x23   : > { %p8075_p12 = scmp.lt.s32.totalorder %s9537_s27, 2  ;;  %s10706_s20 = sand.u32 1, %s9537_s27  }
  0x24   : > { %s9658_s19 = scalar_select %p72_p7, %s9533_s26, %s74_s12  }
  0x25   : > { %p83_p13 = por %p82_p11, %p81_p10  ;;  %s270_s21 = sand.u32 1, %s9533_s26  }
  0x26   : > { %10725 = sst [smem:[#allocation20_spill]] %s9658_s19  ;;  %s9662_s22 = sshll.u32 %s270_s21, 10 }
  0x27   : > { %8058 = dma.hbm_to_vmem [thread:$0]  (!%p9630_p8), %s10724_s5, 16384, %s242_s9, [#allocation9], %s10702_s15, %s10702_s15, %s10704_s16  }
  0x28   : > { %s10701_s23 = sshll.u32 %s9537_s27, 14  ;;  %s10726_s2 = sld [smem:[#allocation22_spill]] }
  0x29   : > { %s272_s9 = scalar_lea.vmem [#allocation5], %s9662_s22  ;;  %p9673_p0 = pnand %p8075_p12, %p83_p13 }
  0x2a   : > { %s279_s13 = sshll.u32 %s272_s9, 4  ;;  %s9679_s17 = sshll.u32 %s270_s21, 11  ;;  %s9677_s13 = int_to_ptr.vmem [resolvable:$true] %s279_s13 }
  0x2b   : > { %s9683_s18 = scalar_lea.sflag [#allocation6], %s10706_s20  ;;  %p9689_p3 = pneg %p9673_p0 }
  0x2e   : > { %s9670_s14 = scalar_lea.hbm %s10726_s2, %s10701_s23  ;;  %s9356_s15 = scalar_lea.hbm %s10726_s2, 32768 }
  0x2f   : > { %s9351_s24 = scalar_lea.hbm %s9670_s14, 16384  ;;  %p9357_p11 = scmp.lt.s32.totalorder %s9670_s14, %s10726_s2 }
  0x30   : > { %p9352_p2 = scmp.ne.s32.totalorder %s9670_s14, %s9351_s24  ;;  %p9358_p12 = scmp.lt.s32.totalorder %s9356_s15, %s9351_s24 }
  0x32   : > { %p9354_p7 = pnand %p9689_p3, %p9352_p2  ;;  %p9359_p13 = por %p9358_p12, %p9357_p11 }
  0x34   : > { %p9355_p10 = pneg %p9354_p7 }
  0x36   : > { %p9360_p4 = pnand %p9359_p13, %p9355_p10 }
  0x38   : > { %9363 = shalt.err (!%p9360_p4)
}
  0x39   : > { %s9364_s20 = scalar_lea.vmem %s9677_s13, 16384  ;;  %s9542_s5 = smov [#allocation5]  }
  0x3a   : > { %p9365_p1 = scmp.ne.s32.totalorder %s9677_s13, %s9364_s20  ;;  %s9369_s23 = sshll.u32 %s9542_s5, 4  ;;  %s9370_s23 = int_to_ptr.vmem [resolvable:$false] %s9369_s23 }
  0x3b   : > { %s9371_s9 = scalar_lea.vmem %s9370_s23, 32768  ;;  %p9372_p9 = scmp.lt.s32.totalorder %s9677_s13, %s9370_s23 }
  0x3c   : > { %p9367_p2 = pnand %p9365_p1, %p9689_p3  ;;  %p9373_p5 = scmp.lt.s32.totalorder %s9371_s9, %s9364_s20 }
  0x3e   : > { %p9368_p7 = pneg %p9367_p2  ;;  %p9374_p6 = por %p9373_p5, %p9372_p9 }
  0x40   : > { %p9375_p8 = pnand %p9374_p6, %p9368_p7 }
  0x42   : > { %9378 = shalt.err (!%p9375_p8)
}
  0x43   : > { %s10729_s15 = smov 16   ;;  %s10730_s16 = smov 256  }
  0x44   : > { %8065 = dma.hbm_to_vmem [thread:$0]  (!%p9673_p0), %s9670_s14, 16384, %s9677_s13, %s9683_s18, %s10730_s16, %s10730_s16, %s10729_s15  }
  0x45   : > { %s10731_s5 = sshll.u32 %s9537_s27, 14  ;;  %s314_s23 = scalar_lea.vmem [#allocation8], %s9662_s22 }
  0x46   : > { %s9720_s20 = scalar_lea.hbm %s10697_s4, %s10731_s5  ;;  %s321_s9 = sshll.u32 %s314_s23, 4  ;;  %s9723_s9 = int_to_ptr.vmem [resolvable:$true] %s321_s9 }
  0x47   : > { %s9543_s2 = smov [#allocation3]   ;;  %p10732_p4 = scmp.ne.s32.totalorder %s10722_s10, 0 }
  0x48   : > { %s228_s19 = sshll.u32 %s9543_s2, 4  ;;  %s229_s19 = int_to_ptr.vmem [resolvable:$true] %s228_s19 }
  0x49   : > { %s9390_s26 = scalar_lea.vmem %s229_s19, 8192  ;;  %p10733_p5 = pneg %p10732_p4 }
  0x4a   : > { %p9391_p1 = scmp.ne.s32.totalorder %s229_s19, %s9390_s26  ;;  %p9398_p9 = scmp.lt.s32.totalorder %s229_s19, %s229_s19 }
  0x4b   : > { %p9399_p10 = scmp.lt.s32.totalorder %s9390_s26, %s9390_s26 }
  0x4c   : > { %p9393_p6 = pnand %p9391_p1, %p10733_p5 }
  0x4d   : > { %p9400_p11 = por %p9399_p10, %p9398_p9 }
  0x4e   : > { %p9394_p8 = pneg %p9393_p6 }
  0x50   : > { %p9401_p12 = pnand %p9400_p11, %p9394_p8 }
  0x52   : > { %9404 = shalt.err (!%p9401_p12)
}
  0x53   : > { %s10734_s1 = sld [smem:[#allocation21_spill]]  ;;  %s9544_s2 = smov [#allocation11]  }
  0x54   : > { %s254_s13 = sshll.u32 %s9544_s2, 4  ;;  %p10735_p2 = pmov %p10733_p5  ;;  %s255_s13 = int_to_ptr.vmem [resolvable:$true] %s254_s13 }
  0x55   : > { %s9416_s5 = scalar_lea.vmem %s255_s13, 12288  ;;  %p9424_p5 = scmp.lt.s32.totalorder %s255_s13, %s255_s13 }
  0x56   : > { %p9417_p13 = scmp.ne.s32.totalorder %s255_s13, %s9416_s5  ;;  %p9425_p6 = scmp.lt.s32.totalorder %s9416_s5, %s9416_s5 }
  0x58   : > { %p9419_p7 = pnand %p9417_p13, %p10735_p2  ;;  %p9426_p8 = por %p9425_p6, %p9424_p5 }
  0x59   : > { %8055 = dma.hbm_to_vmem [thread:$0]  (!%p10732_p4), %s10734_s1, 8192, %s229_s19, [#allocation4], %s10730_s16, %s10730_s16, %s10729_s15  }
  0x5a   : > { %p9420_p1 = pneg %p9419_p7 }
  0x5c   : > { %p9427_p9 = pnand %p9426_p8, %p9420_p1 }
  0x5e   : > { %9430 = shalt.err (!%p9427_p9)
}
  0x5f   : > { %s9545_s26 = smov 192   ;;  %s9546_s19 = smov 12  }
  0x60   : > { %8061 = dma.hbm_to_vmem [thread:$0]  (!%p10732_p4), %s10699_s6, 12288, %s255_s13, [#allocation12], %s9545_s26, %s9545_s26, %s9546_s19  }
  0x61   : > { %s7974_s23 = sshll.u32 %s9537_s27, 15  ;;  %s293_s5 = scalar_lea.vmem [#allocation7], %s9679_s17 }
  0x62   : > { %s9748_s2 = scalar_lea.hbm %s10696_s3, %s7974_s23  ;;  %s300_s1 = sshll.u32 %s293_s5, 4  ;;  %s301_s1 = int_to_ptr.vmem [resolvable:$true] %s300_s1 }
  0x63   : > { %s9431_s11 = scalar_lea.hbm %s9748_s2, 32768  ;;  %s9436_s13 = scalar_lea.hbm %s10696_s3, 65536 }
  0x64   : > { %p9432_p10 = scmp.ne.s32.totalorder %s9748_s2, %s9431_s11  ;;  %p9437_p4 = scmp.lt.s32.totalorder %s9748_s2, %s10696_s3 }
  0x65   : > { %p9438_p13 = scmp.lt.s32.totalorder %s9436_s13, %s9431_s11 }
  0x66   : > { %p9434_p11 = pnand %p9432_p10, %p9689_p3 }
  0x67   : > { %p9439_p2 = por %p9438_p13, %p9437_p4 }
  0x68   : > { %p9435_p12 = pneg %p9434_p11 }
  0x6a   : > { %p9440_p7 = pnand %p9439_p2, %p9435_p12 }
  0x6c   : > { %9443 = shalt.err (!%p9440_p7)
}
  0x6d   : > { %s9444_s17 = scalar_lea.vmem %s301_s1, 32768  ;;  %s9547_s21 = smov [#allocation7]  }
  0x6e   : > { %p9445_p1 = scmp.ne.s32.totalorder %s301_s1, %s9444_s17  ;;  %s9449_s23 = sshll.u32 %s9547_s21, 4  ;;  %s9450_s23 = int_to_ptr.vmem [resolvable:$false] %s9449_s23 }
  0x6f   : > { %s9451_s22 = scalar_lea.vmem %s9450_s23, 65536  ;;  %p9452_p8 = scmp.lt.s32.totalorder %s301_s1, %s9450_s23 }
  0x70   : > { %p9447_p5 = pnand %p9445_p1, %p9689_p3  ;;  %p9453_p9 = scmp.lt.s32.totalorder %s9451_s22, %s9444_s17 }
  0x72   : > { %p9448_p6 = pneg %p9447_p5  ;;  %p9454_p10 = por %p9453_p9, %p9452_p8 }
  0x74   : > { %p9455_p11 = pnand %p9454_p10, %p9448_p6 }
  0x76   : > { %9458 = shalt.err (!%p9455_p11)
}
  0x77   : > { %8068 = dma.hbm_to_vmem [thread:$0]  (!%p9673_p0), %s9748_s2, 32768, %s301_s1, %s9683_s18, %s10730_s16, %s10730_s16, %s10729_s15  }
  0x78   : > { %s10736_s11 = sand.u32 1, %s9537_s27   ;;  %s9459_s5 = scalar_lea.hbm %s9720_s20, 16384 }
  0x79   : > { %s311_s14 = scalar_lea.sflag [#allocation9], %s10736_s11  ;;  %p9460_p12 = scmp.ne.s32.totalorder %s9720_s20, %s9459_s5 }
  0x7a   : > { %s9464_s13 = scalar_lea.hbm %s10697_s4, 32768  ;;  %p9465_p2 = scmp.lt.s32.totalorder %s9720_s20, %s10697_s4 }
  0x7b   : > { %p9462_p4 = pnand %p9460_p12, %p9689_p3  ;;  %p9466_p7 = scmp.lt.s32.totalorder %s9464_s13, %s9459_s5 }
  0x7d   : > { %p9463_p13 = pneg %p9462_p4  ;;  %p9467_p1 = por %p9466_p7, %p9465_p2 }
  0x7f   : > { %p9468_p5 = pnand %p9467_p1, %p9463_p13 }
  0x81   : > { %9471 = shalt.err (!%p9468_p5)
}
  0x82   : > { %s9472_s1 = scalar_lea.vmem %s9723_s9, 16384  ;;  %s9548_s27 = smov [#allocation8]  }
  0x83   : > { %p9473_p6 = scmp.ne.s32.totalorder %s9723_s9, %s9472_s1  ;;  %s9477_s18 = sshll.u32 %s9548_s27, 4  ;;  %s9478_s18 = int_to_ptr.vmem [resolvable:$false] %s9477_s18 }
  0x84   : > { %s9479_s2 = scalar_lea.vmem %s9478_s18, 32768  ;;  %p9480_p10 = scmp.lt.s32.totalorder %s9723_s9, %s9478_s18 }
  0x85   : > { %p9475_p8 = pnand %p9473_p6, %p9689_p3  ;;  %p9481_p11 = scmp.lt.s32.totalorder %s9479_s2, %s9472_s1 }
  0x87   : > { %p9476_p9 = pneg %p9475_p8  ;;  %p9482_p12 = por %p9481_p11, %p9480_p10 }
  0x89   : > { %p9483_p4 = pnand %p9482_p12, %p9476_p9 }
  0x8b   : > { %9486 = shalt.err (!%p9483_p4)
}
  0x8c   : > { %8071 = dma.hbm_to_vmem [thread:$0]  (!%p9673_p0), %s9720_s20, 16384, %s9723_s9, %s311_s14, %s10730_s16, %s10730_s16, %s10729_s15  }
  0x8d   : > { %p10737_p3 = scmp.ne.s32.totalorder %s10721_s30, 0 }
  0x8e   : > { %p10738_p13 = scmp.eq.s32.totalorder (!%p10737_p3), %s9609_s28, 0 }
  0x8f   : > { %333 = sbr.rel (%p10737_p3) target bundleno = 2046 (0x7fe), region = 48 }
  0x94   : > { %9504 = dma.done.wait (%p10738_p13), [#allocation4], 8192   ;;  %p10739_p2 = pmov %p10738_p13 }
  0x95   : > { %s339_s8 = sand.u32 1, %s9609_s28   ;;  %s341_s12 = sand.u32 1, %s9529_s25  }
  0x96   : > { %9506 = vsyncadd (%p10739_p2), [#allocation4], 4294959104  ;;  %s7096_s17 = sshll.u32 %s341_s12, 10  ;;  %s340_s21 = scalar_lea.sflag [#allocation6], %s339_s8 }
  0x97   : > { %s9804_s23 = scalar_lea.vmem [#allocation5], %s7096_s17  ;;  %p10740_p7 = scmp.ne.s32.totalorder %s10720_s29, 0 }
  0x99   : > { %9508 = dma.done.wait (%p10740_p7), %s340_s21, 49152  }
  0x9a   : > { %9510 = vsyncadd (%p10740_p7), %s340_s21, 4294918144  ;;  %s7097_s30 = sshll.u32 %s341_s12, 11  ;;  %s358_s16 = scalar_lea.sflag [#allocation9], %s339_s8 }
  0x9b   : > { %s9810_s15 = scalar_lea.vmem [#allocation7], %s7097_s30  ;;  %s9812_s20 = scalar_lea.vmem [#allocation8], %s7096_s17 }
  0x9c   : > { %9512 = dma.done.wait (%p10740_p7), %s358_s16, 16384  }
  0x9d   : > { %9514 = vsyncadd (%p10740_p7), %s358_s16, 4294950912  ;;  %p10741_p0 = pmov %p10739_p2 }
  0x9f   : > { %9516 = dma.done.wait (%p10741_p0), [#allocation9], 16384   ;;  %p10742_p1 = pmov %p10741_p0 }
  0xa0   : > { %p10743_p5 = pmov %p10741_p0 }
  0xa1   : > { %9518 = vsyncadd (%p10742_p1), [#allocation9], 4294950912 }
  0xa2   : > { %9520 = dma.done.wait (%p10743_p5), [#allocation12], 12288   ;;  %p10744_p6 = pmov %p10741_p0 }
  0xa3   : > { %p10745_p8 = scmp.ne.s32.totalorder %s9609_s28, 0 }
  0xa4   : > { %9522 = vsyncadd (%p10744_p6), [#allocation12], 4294955008 }
  0xa5   : > { %409 = sbr.rel (%p10745_p8) target bundleno = 445 (0x1bd), region = 76 }
  0xaa   : > { %v8119_v0 = vld [vmem:[#allocation3 + $0xe4] ss:$16 sps:$4 sm:$0xff]   ;;  %v8121_v1 = vld [vmem:[#allocation3 + $0xec] ss:$16 sps:$4 sm:$0xff]   ;;  %v8123_v2 = vld [vmem:[#allocation3 + $0xe0] ss:$16 sps:$4 sm:$0xff]  }
  0xab   : > { %818 = vmatprep.subr.bf16.mxu0 %v8119_v0  ;;  %v8124_v3 = vld [vmem:[#allocation3 + $0xe8] ss:$16 sps:$4 sm:$0xff]   ;;  %871 = vmatprep.subr.bf16.mxu1 %v8121_v1  ;;  %v8125_v4 = vld [vmem:[#allocation3 + $0xc4] ss:$16 sps:$4 sm:$0xff]   ;;  %v8127_v5 = vld [vmem:[#allocation3 + $0xcc] ss:$16 sps:$4 sm:$0xff]  }
  0xac   : > { %819 = vmatpush1.bf16.msra.mxu0 %v8123_v2  ;;  %872 = vmatpush1.bf16.msra.mxu1 %v8124_v3  ;;  %v8129_v6 = vld [vmem:[#allocation3 + $0xc0] ss:$16 sps:$4 sm:$0xff]   ;;  %v8130_v7 = vld [vmem:[#allocation3 + $0xc8] ss:$16 sps:$4 sm:$0xff]   ;;  %v8131_v8 = vld [vmem:[#allocation3 + $0xa4] ss:$16 sps:$4 sm:$0xff]  }
  0xad   : > { %820 = vmatprep.subr.bf16.mxu0 %v8125_v4  ;;  %873 = vmatprep.subr.bf16.mxu1 %v8127_v5  ;;  %v8133_v9 = vld [vmem:[#allocation3 + $0xac] ss:$16 sps:$4 sm:$0xff]   ;;  %v8135_v10 = vld [vmem:[#allocation3 + $0xa0] ss:$16 sps:$4 sm:$0xff]   ;;  %v8136_v11 = vld [vmem:[#allocation3 + $0xa8] ss:$16 sps:$4 sm:$0xff]  }
  0xae   : > { %v8137_v12 = vld [vmem:[#allocation3 + $0x84] ss:$16 sps:$4 sm:$0xff]   ;;  %v8139_v13 = vld [vmem:[#allocation3 + $0x8c] ss:$16 sps:$4 sm:$0xff]   ;;  %v8141_v14 = vld [vmem:[#allocation3 + $0x80] ss:$16 sps:$4 sm:$0xff]  }
  0xaf   : > { %v8142_v15 = vld [vmem:[#allocation3 + $0x88] ss:$16 sps:$4 sm:$0xff]   ;;  %v8143_v16 = vld [vmem:[#allocation3 + $0x64] ss:$16 sps:$4 sm:$0xff]   ;;  %v8145_v17 = vld [vmem:[#allocation3 + $0x6c] ss:$16 sps:$4 sm:$0xff]  }
  0xb0   : > { %821 = vmatpush1.bf16.msra.mxu0 %v8129_v6  ;;  %874 = vmatpush1.bf16.msra.mxu1 %v8130_v7  ;;  %v8147_v18 = vld [vmem:[#allocation3 + $0x60] ss:$16 sps:$4 sm:$0xff]   ;;  %v8148_v19 = vld [vmem:[#allocation3 + $0x68] ss:$16 sps:$4 sm:$0xff]   ;;  %v8149_v20 = vld [vmem:[#allocation3 + $0x44] ss:$16 sps:$4 sm:$0xff]  }
  0xb1   : > { %822 = vmatprep.subr.bf16.mxu0 %v8131_v8  ;;  %875 = vmatprep.subr.bf16.mxu1 %v8133_v9  ;;  %v8151_v21 = vld [vmem:[#allocation3 + $0x4c] ss:$16 sps:$4 sm:$0xff]   ;;  %v8153_v22 = vld [vmem:[#allocation3 + $0x40] ss:$16 sps:$4 sm:$0xff]   ;;  %v8154_v23 = vld [vmem:[#allocation3 + $0x48] ss:$16 sps:$4 sm:$0xff]  }
  0xb2   : > { %v8155_v24 = vld [vmem:[#allocation3 + $0x24] ss:$16 sps:$4 sm:$0xff]   ;;  %v8157_v25 = vld [vmem:[#allocation3 + $0x2c] ss:$16 sps:$4 sm:$0xff]   ;;  %v8159_v26 = vld [vmem:[#allocation3 + $0x20] ss:$16 sps:$4 sm:$0xff]  }
  0xb3   : > { %v8160_v27 = vld [vmem:[#allocation3 + $0x28] ss:$16 sps:$4 sm:$0xff]   ;;  %v8161_v28 = vld [vmem:[#allocation3 + $0x4] ss:$16 sps:$4 sm:$0xff]   ;;  %v8163_v29 = vld [vmem:[#allocation3 + $0xc] ss:$16 sps:$4 sm:$0xff]  }
  0xb4   : > { %823 = vmatpush1.bf16.msra.mxu0 %v8135_v10  ;;  %876 = vmatpush1.bf16.msra.mxu1 %v8136_v11  ;;  %v8165_v30 = vld [vmem:[#allocation3] ss:$16 sps:$4 sm:$0xff]   ;;  %v8166_v31 = vld [vmem:[#allocation3 + $0x8] ss:$16 sps:$4 sm:$0xff]   ;;  %v8167_v32 = vld [vmem:[#allocation3 + $0x1e4] ss:$16 sps:$4 sm:$0xff]  }
  0xb5   : > { %824 = vmatprep.subr.bf16.mxu0 %v8137_v12  ;;  %877 = vmatprep.subr.bf16.mxu1 %v8139_v13  ;;  %v8169_v33 = vld [vmem:[#allocation3 + $0x1ec] ss:$16 sps:$4 sm:$0xff]   ;;  %v8171_v34 = vld [vmem:[#allocation3 + $0x1e0] ss:$16 sps:$4 sm:$0xff]   ;;  %v8172_v35 = vld [vmem:[#allocation3 + $0x1e8] ss:$16 sps:$4 sm:$0xff]  }
  0xb6   : > { %v8173_v36 = vld [vmem:[#allocation3 + $0x1c4] ss:$16 sps:$4 sm:$0xff]   ;;  %v8175_v37 = vld [vmem:[#allocation3 + $0x1cc] ss:$16 sps:$4 sm:$0xff]   ;;  %v8177_v38 = vld [vmem:[#allocation3 + $0x1c0] ss:$16 sps:$4 sm:$0xff]  }
  0xb7   : > { %v8178_v39 = vld [vmem:[#allocation3 + $0x1c8] ss:$16 sps:$4 sm:$0xff]   ;;  %v8179_v40 = vld [vmem:[#allocation3 + $0x1a4] ss:$16 sps:$4 sm:$0xff]   ;;  %v8181_v41 = vld [vmem:[#allocation3 + $0x1ac] ss:$16 sps:$4 sm:$0xff]  }
  0xb8   : > { %825 = vmatpush1.bf16.msra.mxu0 %v8141_v14  ;;  %878 = vmatpush1.bf16.msra.mxu1 %v8142_v15  ;;  %v8183_v42 = vld [vmem:[#allocation3 + $0x1a0] ss:$16 sps:$4 sm:$0xff]   ;;  %v8184_v43 = vld [vmem:[#allocation3 + $0x1a8] ss:$16 sps:$4 sm:$0xff]   ;;  %v8185_v44 = vld [vmem:[#allocation3 + $0x184] ss:$16 sps:$4 sm:$0xff]  }
  0xb9   : > { %826 = vmatprep.subr.bf16.mxu0 %v8143_v16  ;;  %879 = vmatprep.subr.bf16.mxu1 %v8145_v17  ;;  %v8187_v45 = vld [vmem:[#allocation3 + $0x18c] ss:$16 sps:$4 sm:$0xff]   ;;  %v8189_v46 = vld [vmem:[#allocation3 + $0x180] ss:$16 sps:$4 sm:$0xff]   ;;  %v8190_v48 = vld [vmem:[#allocation3 + $0x188] ss:$16 sps:$4 sm:$0xff]  }
  0xba   : > { %v8217_v47 = vld [vmem:[%s10693_s0 + $0x4] ss:$8 sps:$4 sm:$0xff]   ;;  %v8195_v51 = vld [vmem:[#allocation3 + $0x160] ss:$16 sps:$4 sm:$0xff]   ;;  %v8196_v52 = vld [vmem:[#allocation3 + $0x168] ss:$16 sps:$4 sm:$0xff]  }
  0xbb   : > { %v8191_v49 = vld [vmem:[#allocation3 + $0x164] ss:$16 sps:$4 sm:$0xff]   ;;  %v8193_v50 = vld [vmem:[#allocation3 + $0x16c] ss:$16 sps:$4 sm:$0xff]   ;;  %850 = vmatprep.mubr.bf16.mxu0 %v8217_v47  ;;  %903 = vmatprep.mubr.bf16.mxu1 %v8217_v47  ;;  %v8201_v55 = vld [vmem:[#allocation3 + $0x140] ss:$16 sps:$4 sm:$0xff]  }
  0xbc   : > { %827 = vmatpush1.bf16.msra.mxu0 %v8147_v18  ;;  %880 = vmatpush1.bf16.msra.mxu1 %v8148_v19  ;;  %v8197_v53 = vld [vmem:[#allocation3 + $0x144] ss:$16 sps:$4 sm:$0xff]   ;;  %v8199_v54 = vld [vmem:[#allocation3 + $0x14c] ss:$16 sps:$4 sm:$0xff]   ;;  %v8202_v56 = vld [vmem:[#allocation3 + $0x148] ss:$16 sps:$4 sm:$0xff]  }
  0xbd   : > { %828 = vmatprep.subr.bf16.mxu0 %v8149_v20  ;;  %881 = vmatprep.subr.bf16.mxu1 %v8151_v21  ;;  %v8203_v57 = vld [vmem:[#allocation3 + $0x124] ss:$16 sps:$4 sm:$0xff]   ;;  %v8205_v58 = vld [vmem:[#allocation3 + $0x12c] ss:$16 sps:$4 sm:$0xff]   ;;  %v8207_v59 = vld [vmem:[#allocation3 + $0x120] ss:$16 sps:$4 sm:$0xff]  }
  0xbe   : > { %v8208_v60 = vld [vmem:[#allocation3 + $0x128] ss:$16 sps:$4 sm:$0xff]   ;;  %v8209_v61 = vld [vmem:[#allocation3 + $0x104] ss:$16 sps:$4 sm:$0xff]   ;;  %v8211_v62 = vld [vmem:[#allocation3 + $0x10c] ss:$16 sps:$4 sm:$0xff]  }
  0xbf   : > { %v8213_v63 = vld [vmem:[#allocation3 + $0x100] ss:$16 sps:$4 sm:$0xff]   ;;  %v8214_v0 = vld [vmem:[#allocation3 + $0x108] ss:$16 sps:$4 sm:$0xff]   ;;  %v8218_v2 = vld [vmem:[%s10693_s0 + $0x14] ss:$8 sps:$4 sm:$0xff]  }
  0xc0   : > { %829 = vmatpush1.bf16.msra.mxu0 %v8153_v22  ;;  %882 = vmatpush1.bf16.msra.mxu1 %v8154_v23  ;;  %v8215_v1 = vld [vmem:[%s10693_s0] ss:$8 sps:$4 sm:$0xff]   ;;  %v8220_v3 = vld [vmem:[%s10693_s0 + $0x10] ss:$8 sps:$4 sm:$0xff]  }
  0xc1   : > { %830 = vmatprep.subr.bf16.mxu0 %v8155_v24  ;;  %883 = vmatprep.subr.bf16.mxu1 %v8157_v25 }
  0xc4   : > { %831 = vmatpush1.bf16.msra.mxu0 %v8159_v26  ;;  %884 = vmatpush1.bf16.msra.mxu1 %v8160_v27 }
  0xc5   : > { %832 = vmatprep.subr.bf16.mxu0 %v8161_v28  ;;  %885 = vmatprep.subr.bf16.mxu1 %v8163_v29 }
  0xc8   : > { %833 = vmatpush1.bf16.msra.mxu0 %v8165_v30  ;;  %886 = vmatpush1.bf16.msra.mxu1 %v8166_v31 }
  0xc9   : > { %834 = vmatprep.subr.bf16.mxu0 %v8167_v32  ;;  %887 = vmatprep.subr.bf16.mxu1 %v8169_v33 }
  0xcc   : > { %835 = vmatpush2.bf16.msra.mxu0 %v8171_v34  ;;  %888 = vmatpush2.bf16.msra.mxu1 %v8172_v35 }
  0xcd   : > { %836 = vmatprep.subr.bf16.mxu0 %v8173_v36  ;;  %889 = vmatprep.subr.bf16.mxu1 %v8175_v37 }
  0xd0   : > { %837 = vmatpush2.bf16.msra.mxu0 %v8177_v38  ;;  %890 = vmatpush2.bf16.msra.mxu1 %v8178_v39 }
  0xd1   : > { %838 = vmatprep.subr.bf16.mxu0 %v8179_v40  ;;  %891 = vmatprep.subr.bf16.mxu1 %v8181_v41 }
  0xd4   : > { %839 = vmatpush2.bf16.msra.mxu0 %v8183_v42  ;;  %892 = vmatpush2.bf16.msra.mxu1 %v8184_v43 }
  0xd5   : > { %840 = vmatprep.subr.bf16.mxu0 %v8185_v44  ;;  %893 = vmatprep.subr.bf16.mxu1 %v8187_v45 }
  0xd8   : > { %841 = vmatpush2.bf16.msra.mxu0 %v8189_v46  ;;  %894 = vmatpush2.bf16.msra.mxu1 %v8190_v48 }
  0xd9   : > { %842 = vmatprep.subr.bf16.mxu0 %v8191_v49  ;;  %895 = vmatprep.subr.bf16.mxu1 %v8193_v50 }
  0xdc   : > { %843 = vmatpush2.bf16.msra.mxu0 %v8195_v51  ;;  %896 = vmatpush2.bf16.msra.mxu1 %v8196_v52 }
  0xdd   : > { %844 = vmatprep.subr.bf16.mxu0 %v8197_v53  ;;  %897 = vmatprep.subr.bf16.mxu1 %v8199_v54 }
  0xe0   : > { %845 = vmatpush2.bf16.msra.mxu0 %v8201_v55  ;;  %898 = vmatpush2.bf16.msra.mxu1 %v8202_v56 }
  0xe1   : > { %846 = vmatprep.subr.bf16.mxu0 %v8203_v57  ;;  %899 = vmatprep.subr.bf16.mxu1 %v8205_v58 }
  0xe4   : > { %847 = vmatpush2.bf16.msra.mxu0 %v8207_v59  ;;  %900 = vmatpush2.bf16.msra.mxu1 %v8208_v60 }
  0xe5   : > { %848 = vmatprep.subr.bf16.mxu0 %v8209_v61  ;;  %901 = vmatprep.subr.bf16.mxu1 %v8211_v62 }
  0xe8   : > { %849 = vmatpush2.bf16.msra.mxu0 %v8213_v63  ;;  %902 = vmatpush2.bf16.msra.mxu1 %v8214_v0 }
  0xeb   : > { %851 = vmatmul.mubr.bf16.vlgmr.msra.gmra.mxu0 %v8215_v1  ;;  %904 = vmatmul.mubr.bf16.vlgmr.msra.gmra.mxu1 %v8215_v1 }
  0xec   : > { %860 = vmatprep.mubr.bf16.mxu0 %v8218_v2  ;;  %913 = vmatprep.mubr.bf16.mxu1 %v8218_v2 }
  0xf3   : > { %861 = vmatmul.mubr.bf16.gmra.mxu0 %v8220_v3  ;;  %914 = vmatmul.mubr.bf16.gmra.mxu1 %v8220_v3 }
 0x1ab   : > { %v852_v4 = vpop.f32.mrf.mxu0  ;;  %v905_v5 = vpop.f32.mrf.mxu1 }
 0x1ac   : > { %v924_v6 = vmax.f32 %v852_v4, 0.0  ;;  %v926_v7 = vmax.f32 %v905_v5, 0.0 }
 0x1ad   : > { %v854_v8 = vpop.f32.mrf.mxu0  ;;  %v907_v9 = vpop.f32.mrf.mxu1 }
 0x1ae   : > { %940 = vst [vmem:[#allocation2 + $0x30] sm:$0xff] %v924_v6  ;;  %942 = vst [vmem:[#allocation2 + $0x58] sm:$0xff] %v926_v7  ;;  %v925_v10 = vmax.f32 %v854_v8, 0.0  ;;  %v927_v11 = vmax.f32 %v907_v9, 0.0 }
 0x1af   : > { %v856_v12 = vpop.f32.mrf.mxu0  ;;  %v909_v13 = vpop.f32.mrf.mxu1 }
 0x1b0   : > { %941 = vst [vmem:[#allocation2] sm:$0xff] %v925_v10  ;;  %943 = vst [vmem:[#allocation2 + $0x18] sm:$0xff] %v927_v11  ;;  %v928_v14 = vmax.f32 %v856_v12, 0.0  ;;  %v930_v15 = vmax.f32 %v909_v13, 0.0 }
 0x1b1   : > { %v858_v16 = vpop.f32.mrf.mxu0  ;;  %v911_v17 = vpop.f32.mrf.mxu1 }
 0x1b2   : > { %944 = vst [vmem:[#allocation2 + $0x50] sm:$0xff] %v928_v14  ;;  %946 = vst [vmem:[#allocation2 + $0x8] sm:$0xff] %v930_v15  ;;  %v929_v18 = vmax.f32 %v858_v16, 0.0  ;;  %v931_v19 = vmax.f32 %v911_v17, 0.0 }
 0x1b3   : > { %v862_v20 = vpop.f32.mrf.mxu0  ;;  %v915_v21 = vpop.f32.mrf.mxu1 }
 0x1b4   : > { %945 = vst [vmem:[#allocation2 + $0x68] sm:$0xff] %v929_v18  ;;  %947 = vst [vmem:[#allocation2 + $0x48] sm:$0xff] %v931_v19  ;;  %v932_v22 = vmax.f32 %v862_v20, 0.0  ;;  %v934_v23 = vmax.f32 %v915_v21, 0.0 }
 0x1b5   : > { %v864_v24 = vpop.f32.mrf.mxu0  ;;  %v917_v25 = vpop.f32.mrf.mxu1 }
 0x1b6   : > { %948 = vst [vmem:[#allocation2 + $0x40] sm:$0xff] %v932_v22  ;;  %950 = vst [vmem:[#allocation2 + $0x10] sm:$0xff] %v934_v23  ;;  %v933_v26 = vmax.f32 %v864_v24, 0.0  ;;  %v935_v27 = vmax.f32 %v917_v25, 0.0 }
 0x1b7   : > { %v866_v28 = vpop.f32.mrf.mxu0  ;;  %v919_v29 = vpop.f32.mrf.mxu1 }
 0x1b8   : > { %949 = vst [vmem:[#allocation2 + $0x20] sm:$0xff] %v933_v26  ;;  %951 = vst [vmem:[#allocation2 + $0x38] sm:$0xff] %v935_v27  ;;  %v936_v30 = vmax.f32 %v866_v28, 0.0  ;;  %v938_v31 = vmax.f32 %v919_v29, 0.0 }
 0x1b9   : > { %v868_v32 = vpop.f32.mrf.mxu0  ;;  %v921_v33 = vpop.f32.mrf.mxu1 }
 0x1ba   : > { %952 = vst [vmem:[#allocation2 + $0x60] sm:$0xff] %v936_v30  ;;  %954 = vst [vmem:[#allocation2 + $0x78] sm:$0xff] %v938_v31  ;;  %v937_v34 = vmax.f32 %v868_v32, 0.0  ;;  %v939_v35 = vmax.f32 %v921_v33, 0.0 }
 0x1bc   : > { %953 = vst [vmem:[#allocation2 + $0x70] sm:$0xff] %v937_v34  ;;  %955 = vst [vmem:[#allocation2 + $0x28] sm:$0xff] %v939_v35 }
 0x1bd PF: > { %v8221_v36 = vld [vmem:[%s9804_s23 + $0xe4] ss:$16 sps:$4 sm:$0xff]   ;;  %v8225_v38 = vld [vmem:[%s9804_s23 + $0xe0] ss:$16 sps:$4 sm:$0xff]   ;;  %v961_v19 = vld [vmem:[#allocation2 + $0x68] sm:$0xff]  ;;  %vm9549_vm3 = vmmov 1  }
 0x1be   : > { %v8223_v37 = vld [vmem:[%s9804_s23 + $0x2e4] ss:$16 sps:$4 sm:$0xff]   ;;  %1748 = vmatprep.subr.bf16.mxu0 %v8221_v36  ;;  %v8226_v39 = vld [vmem:[%s9804_s23 + $0x2e0] ss:$16 sps:$4 sm:$0xff]   ;;  %v959_v20 = vld [vmem:[#allocation2 + $0x18] sm:$0xff]  ;;  %p7746_p9 = scmp.ne.s32.totalorder %s9609_s28, 1 }
 0x1bf   : > { %1801 = vmatprep.subr.bf16.mxu1 %v8223_v37  ;;  %v8227_v40 = vld [vmem:[%s9804_s23 + $0xc4] ss:$16 sps:$4 sm:$0xff]   ;;  %1749 = vmatpush1.bf16.msra.mxu0 %v8225_v38  ;;  %v8231_v42 = vld [vmem:[%s9804_s23 + $0xc0] ss:$16 sps:$4 sm:$0xff]   ;;  %v963_v21 = vld [vmem:[#allocation2 + $0x48] sm:$0xff] }
 0x1c0   : > { %1802 = vmatpush1.bf16.msra.mxu1 %v8226_v39  ;;  %v8229_v41 = vld [vmem:[%s9804_s23 + $0x2c4] ss:$16 sps:$4 sm:$0xff]   ;;  %1750 = vmatprep.subr.bf16.mxu0 %v8227_v40  ;;  %v8232_v43 = vld [vmem:[%s9804_s23 + $0x2c0] ss:$16 sps:$4 sm:$0xff]   ;;  %v9891_v26 = vpack.c.bf16 %v963_v21, %v959_v20  ;;  %v8355_v20 = vld [vmem:[%s9804_s23 + $0x2c] ss:$16 sps:$4 sm:$0xff]  }
 0x1c1   : > { %1803 = vmatprep.subr.bf16.mxu1 %v8229_v41  ;;  %v8233_v44 = vld [vmem:[%s9804_s23 + $0xa4] ss:$16 sps:$4 sm:$0xff]   ;;  %v8237_v46 = vld [vmem:[%s9804_s23 + $0xa0] ss:$16 sps:$4 sm:$0xff]   ;;  %v8358_v21 = vld [vmem:[%s9804_s23 + $0x22c] ss:$16 sps:$4 sm:$0xff]  }
 0x1c2   : > { %v8235_v45 = vld [vmem:[%s9804_s23 + $0x2a4] ss:$16 sps:$4 sm:$0xff]   ;;  %v8238_v47 = vld [vmem:[%s9804_s23 + $0x2a0] ss:$16 sps:$4 sm:$0xff]   ;;  %1833 = vmatprep.mubr.bf16.mxu1 %v9891_v26 }
 0x1c3   : > { %1751 = vmatpush1.bf16.msra.mxu0 %v8231_v42  ;;  %v8239_v48 = vld [vmem:[%s9804_s23 + $0x84] ss:$16 sps:$4 sm:$0xff]   ;;  %v8243_v50 = vld [vmem:[%s9804_s23 + $0x80] ss:$16 sps:$4 sm:$0xff]  }
 0x1c4   : > { %1804 = vmatpush1.bf16.msra.mxu1 %v8232_v43  ;;  %1752 = vmatprep.subr.bf16.mxu0 %v8233_v44  ;;  %v8241_v49 = vld [vmem:[%s9804_s23 + $0x284] ss:$16 sps:$4 sm:$0xff]   ;;  %v8244_v51 = vld [vmem:[%s9804_s23 + $0x280] ss:$16 sps:$4 sm:$0xff]   ;;  %v958_v44 = vld [vmem:[#allocation2 + $0x58] sm:$0xff] }
 0x1c5   : > { %1805 = vmatprep.subr.bf16.mxu1 %v8235_v45  ;;  %v8245_v52 = vld [vmem:[%s9804_s23 + $0x64] ss:$16 sps:$4 sm:$0xff]   ;;  %v8249_v54 = vld [vmem:[%s9804_s23 + $0x60] ss:$16 sps:$4 sm:$0xff]   ;;  %v962_v45 = vld [vmem:[#allocation2 + $0x8] sm:$0xff] }
 0x1c6   : > { %v8247_v53 = vld [vmem:[%s9804_s23 + $0x264] ss:$16 sps:$4 sm:$0xff]   ;;  %v8250_v55 = vld [vmem:[%s9804_s23 + $0x260] ss:$16 sps:$4 sm:$0xff]  }
 0x1c7   : > { %1753 = vmatpush1.bf16.msra.mxu0 %v8237_v46  ;;  %v8251_v56 = vld [vmem:[%s9804_s23 + $0x44] ss:$16 sps:$4 sm:$0xff]   ;;  %v8255_v58 = vld [vmem:[%s9804_s23 + $0x40] ss:$16 sps:$4 sm:$0xff]   ;;  %v8319_v46 = vld [vmem:[%s9804_s23 + $0xec] ss:$16 sps:$4 sm:$0xff]  }
 0x1c8   : > { %1806 = vmatpush1.bf16.msra.mxu1 %v8238_v47  ;;  %1754 = vmatprep.subr.bf16.mxu0 %v8239_v48  ;;  %v8253_v57 = vld [vmem:[%s9804_s23 + $0x244] ss:$16 sps:$4 sm:$0xff]   ;;  %v8256_v59 = vld [vmem:[%s9804_s23 + $0x240] ss:$16 sps:$4 sm:$0xff]   ;;  %v8322_v47 = vld [vmem:[%s9804_s23 + $0x2ec] ss:$16 sps:$4 sm:$0xff]  }
 0x1c9   : > { %1807 = vmatprep.subr.bf16.mxu1 %v8241_v49  ;;  %v8257_v60 = vld [vmem:[%s9804_s23 + $0x24] ss:$16 sps:$4 sm:$0xff]   ;;  %v8261_v62 = vld [vmem:[%s9804_s23 + $0x20] ss:$16 sps:$4 sm:$0xff]   ;;  %v8317_v48 = vld [vmem:[%s9804_s23 + $0xe8] ss:$16 sps:$4 sm:$0xff]  }
 0x1ca   : > { %v8259_v61 = vld [vmem:[%s9804_s23 + $0x224] ss:$16 sps:$4 sm:$0xff]   ;;  %v8262_v63 = vld [vmem:[%s9804_s23 + $0x220] ss:$16 sps:$4 sm:$0xff]   ;;  %v8320_v49 = vld [vmem:[%s9804_s23 + $0x2e8] ss:$16 sps:$4 sm:$0xff]  }
 0x1cb   : > { %1755 = vmatpush1.bf16.msra.mxu0 %v8243_v50  ;;  %v8263_v0 = vld [vmem:[%s9804_s23 + $0x4] ss:$16 sps:$4 sm:$0xff]   ;;  %v8267_v2 = vld [vmem:[%s9804_s23] ss:$16 sps:$4 sm:$0xff]  }
 0x1cc   : > { %1808 = vmatpush1.bf16.msra.mxu1 %v8244_v51  ;;  %1756 = vmatprep.subr.bf16.mxu0 %v8245_v52  ;;  %v8265_v1 = vld [vmem:[%s9804_s23 + $0x204] ss:$16 sps:$4 sm:$0xff]   ;;  %v8268_v3 = vld [vmem:[%s9804_s23 + $0x200] ss:$16 sps:$4 sm:$0xff]  }
 0x1cd   : > { %1809 = vmatprep.subr.bf16.mxu1 %v8247_v53  ;;  %v8269_v4 = vld [vmem:[%s9804_s23 + $0x1e4] ss:$16 sps:$4 sm:$0xff]   ;;  %v8273_v6 = vld [vmem:[%s9804_s23 + $0x1e0] ss:$16 sps:$4 sm:$0xff]   ;;  %v9916_v53 = vpack.c.bf16 %v962_v45, %v958_v44  ;;  %v8391_v44 = vld [vmem:[%s9804_s23 + $0x16c] ss:$16 sps:$4 sm:$0xff]  }
 0x1ce   : > { %v8271_v5 = vld [vmem:[%s9804_s23 + $0x3e4] ss:$16 sps:$4 sm:$0xff]   ;;  %v8274_v7 = vld [vmem:[%s9804_s23 + $0x3e0] ss:$16 sps:$4 sm:$0xff]   ;;  %v8394_v45 = vld [vmem:[%s9804_s23 + $0x36c] ss:$16 sps:$4 sm:$0xff]  }
 0x1cf   : > { %1757 = vmatpush1.bf16.msra.mxu0 %v8249_v54  ;;  %v8275_v8 = vld [vmem:[%s9804_s23 + $0x1c4] ss:$16 sps:$4 sm:$0xff]   ;;  %v8279_v10 = vld [vmem:[%s9804_s23 + $0x1c0] ss:$16 sps:$4 sm:$0xff]   ;;  %v967_v54 = vld [vmem:[#allocation2 + $0x38] sm:$0xff] }
 0x1d0   : > { %1810 = vmatpush1.bf16.msra.mxu1 %v8250_v55  ;;  %1758 = vmatprep.subr.bf16.mxu0 %v8251_v56  ;;  %v8277_v9 = vld [vmem:[%s9804_s23 + $0x3c4] ss:$16 sps:$4 sm:$0xff]   ;;  %v8280_v11 = vld [vmem:[%s9804_s23 + $0x3c0] ss:$16 sps:$4 sm:$0xff]   ;;  %v971_v55 = vld [vmem:[#allocation2 + $0x28] sm:$0xff] }
 0x1d1   : > { %1811 = vmatprep.subr.bf16.mxu1 %v8253_v57  ;;  %v8281_v12 = vld [vmem:[%s9804_s23 + $0x1a4] ss:$16 sps:$4 sm:$0xff]   ;;  %v8285_v14 = vld [vmem:[%s9804_s23 + $0x1a0] ss:$16 sps:$4 sm:$0xff]   ;;  %v8325_v56 = vld [vmem:[%s9804_s23 + $0xcc] ss:$16 sps:$4 sm:$0xff]  }
 0x1d2   : > { %v8283_v13 = vld [vmem:[%s9804_s23 + $0x3a4] ss:$16 sps:$4 sm:$0xff]   ;;  %v8286_v15 = vld [vmem:[%s9804_s23 + $0x3a0] ss:$16 sps:$4 sm:$0xff]   ;;  %v8328_v57 = vld [vmem:[%s9804_s23 + $0x2cc] ss:$16 sps:$4 sm:$0xff]  }
 0x1d3   : > { %1759 = vmatpush1.bf16.msra.mxu0 %v8255_v58  ;;  %v8287_v16 = vld [vmem:[%s9804_s23 + $0x184] ss:$16 sps:$4 sm:$0xff]   ;;  %v8291_v22 = vld [vmem:[%s9804_s23 + $0x180] ss:$16 sps:$4 sm:$0xff]   ;;  %v8323_v58 = vld [vmem:[%s9804_s23 + $0xc8] ss:$16 sps:$4 sm:$0xff]  }
 0x1d4   : > { %1812 = vmatpush1.bf16.msra.mxu1 %v8256_v59  ;;  %1760 = vmatprep.subr.bf16.mxu0 %v8257_v60  ;;  %v8289_v17 = vld [vmem:[%s9804_s23 + $0x384] ss:$16 sps:$4 sm:$0xff]   ;;  %v8292_v23 = vld [vmem:[%s9804_s23 + $0x380] ss:$16 sps:$4 sm:$0xff]   ;;  %v8326_v59 = vld [vmem:[%s9804_s23 + $0x2c8] ss:$16 sps:$4 sm:$0xff]  }
 0x1d5   : > { %1813 = vmatprep.subr.bf16.mxu1 %v8259_v61  ;;  %v957_v18 = vld [vmem:[#allocation2] sm:$0xff]  ;;  %v956_v42 = vld [vmem:[#allocation2 + $0x30] sm:$0xff]  ;;  %v9924_v61 = vpack.c.bf16 %v971_v55, %v967_v54  ;;  %v8403_v54 = vld [vmem:[%s9804_s23 + $0x12c] ss:$16 sps:$4 sm:$0xff]  }
 0x1d6   : > { %v8293_v24 = vld [vmem:[%s9804_s23 + $0x164] ss:$16 sps:$4 sm:$0xff]   ;;  %v9889_v25 = vpack.c.bf16 %v961_v19, %v957_v18  ;;  %v8297_v28 = vld [vmem:[%s9804_s23 + $0x160] ss:$16 sps:$4 sm:$0xff]   ;;  %v8347_v18 = vld [vmem:[%s9804_s23 + $0x48] ss:$16 sps:$4 sm:$0xff]  }
 0x1d7   : > { %1761 = vmatpush1.bf16.msra.mxu0 %v8261_v62  ;;  %v8295_v27 = vld [vmem:[%s9804_s23 + $0x364] ss:$16 sps:$4 sm:$0xff]   ;;  %v8298_v29 = vld [vmem:[%s9804_s23 + $0x360] ss:$16 sps:$4 sm:$0xff]   ;;  %v8350_v19 = vld [vmem:[%s9804_s23 + $0x248] ss:$16 sps:$4 sm:$0xff]  }
 0x1d8   : > { %1814 = vmatpush1.bf16.msra.mxu1 %v8262_v63  ;;  %1762 = vmatprep.subr.bf16.mxu0 %v8263_v0  ;;  %v8299_v30 = vld [vmem:[%s9804_s23 + $0x144] ss:$16 sps:$4 sm:$0xff]   ;;  %v8303_v32 = vld [vmem:[%s9804_s23 + $0x140] ss:$16 sps:$4 sm:$0xff]   ;;  %v8406_v55 = vld [vmem:[%s9804_s23 + $0x32c] ss:$16 sps:$4 sm:$0xff]  }
 0x1d9   : > { %1815 = vmatprep.subr.bf16.mxu1 %v8265_v1  ;;  %1780 = vmatprep.mubr.bf16.mxu0 %v9889_v25  ;;  %v8301_v31 = vld [vmem:[%s9804_s23 + $0x344] ss:$16 sps:$4 sm:$0xff]   ;;  %v8304_v33 = vld [vmem:[%s9804_s23 + $0x340] ss:$16 sps:$4 sm:$0xff]   ;;  %v970_v1 = vld [vmem:[#allocation2 + $0x78] sm:$0xff] }
 0x1da   : > { %v8305_v34 = vld [vmem:[%s9804_s23 + $0x124] ss:$16 sps:$4 sm:$0xff]   ;;  %v8309_v36 = vld [vmem:[%s9804_s23 + $0x120] ss:$16 sps:$4 sm:$0xff]  }
 0x1db   : > { %1763 = vmatpush1.bf16.msra.mxu0 %v8267_v2  ;;  %v8307_v35 = vld [vmem:[%s9804_s23 + $0x324] ss:$16 sps:$4 sm:$0xff]   ;;  %v8310_v37 = vld [vmem:[%s9804_s23 + $0x320] ss:$16 sps:$4 sm:$0xff]   ;;  %v8331_v2 = vld [vmem:[%s9804_s23 + $0xac] ss:$16 sps:$4 sm:$0xff]  }
 0x1dc   : > { %1816 = vmatpush1.bf16.msra.mxu1 %v8268_v3  ;;  %1764 = vmatprep.subr.bf16.mxu0 %v8269_v4  ;;  %v8311_v38 = vld [vmem:[%s9804_s23 + $0x104] ss:$16 sps:$4 sm:$0xff]   ;;  %v8315_v40 = vld [vmem:[%s9804_s23 + $0x100] ss:$16 sps:$4 sm:$0xff]   ;;  %v8334_v3 = vld [vmem:[%s9804_s23 + $0x2ac] ss:$16 sps:$4 sm:$0xff]  }
 0x1dd   : > { %1817 = vmatprep.subr.bf16.mxu1 %v8271_v5  ;;  %v8313_v39 = vld [vmem:[%s9804_s23 + $0x304] ss:$16 sps:$4 sm:$0xff]   ;;  %v8316_v41 = vld [vmem:[%s9804_s23 + $0x300] ss:$16 sps:$4 sm:$0xff]  }
 0x1de   : > { %v960_v43 = vld [vmem:[#allocation2 + $0x50] sm:$0xff]  ;;  %v965_v50 = vld [vmem:[#allocation2 + $0x20] sm:$0xff] }
 0x1df   : > { %1765 = vmatpush2.bf16.msra.mxu0 %v8273_v6  ;;  %v969_v51 = vld [vmem:[#allocation2 + $0x70] sm:$0xff]  ;;  %v9914_v52 = vpack.c.bf16 %v960_v43, %v956_v42  ;;  %v964_v62 = vld [vmem:[#allocation2 + $0x40] sm:$0xff]  ;;  %v8329_v6 = vld [vmem:[%s9804_s23 + $0xa8] ss:$16 sps:$4 sm:$0xff]  }
 0x1e0   : > { %1818 = vmatpush2.bf16.msra.mxu1 %v8274_v7  ;;  %1766 = vmatprep.subr.bf16.mxu0 %v8275_v8  ;;  %v9922_v60 = vpack.c.bf16 %v969_v51, %v965_v50  ;;  %v968_v63 = vld [vmem:[#allocation2 + $0x60] sm:$0xff]  ;;  %v966_v0 = vld [vmem:[#allocation2 + $0x10] sm:$0xff]  ;;  %v8332_v7 = vld [vmem:[%s9804_s23 + $0x2a8] ss:$16 sps:$4 sm:$0xff]  }
 0x1e1   : > { %1819 = vmatprep.subr.bf16.mxu1 %v8277_v9  ;;  %v9932_v4 = vpack.c.bf16 %v968_v63, %v964_v62  ;;  %v9934_v5 = vpack.c.bf16 %v970_v1, %v966_v0  ;;  %v8337_v8 = vld [vmem:[%s9804_s23 + $0x8c] ss:$16 sps:$4 sm:$0xff]   ;;  %v8383_v42 = vld [vmem:[%s9804_s23 + $0x188] ss:$16 sps:$4 sm:$0xff]   ;;  %v8415_v0 = vld [vmem:[%s9810_s15 + $0xe4] ss:$16 sps:$4 sm:$0xff]  }
 0x1e2   : > { %v8340_v9 = vld [vmem:[%s9804_s23 + $0x28c] ss:$16 sps:$4 sm:$0xff]   ;;  %v8386_v43 = vld [vmem:[%s9804_s23 + $0x388] ss:$16 sps:$4 sm:$0xff]   ;;  %v8413_v1 = vld [vmem:[%s9810_s15 + $0xe0] ss:$16 sps:$4 sm:$0xff]  }
 0x1e3   : > { %1767 = vmatpush2.bf16.msra.mxu0 %v8279_v10  ;;  %v8335_v10 = vld [vmem:[%s9804_s23 + $0x88] ss:$16 sps:$4 sm:$0xff]  }
 0x1e4   : > { %1820 = vmatpush2.bf16.msra.mxu1 %v8280_v11  ;;  %1768 = vmatprep.subr.bf16.mxu0 %v8281_v12  ;;  %v8338_v11 = vld [vmem:[%s9804_s23 + $0x288] ss:$16 sps:$4 sm:$0xff]   ;;  %v8343_v12 = vld [vmem:[%s9804_s23 + $0x6c] ss:$16 sps:$4 sm:$0xff]  }
 0x1e5   : > { %1821 = vmatprep.subr.bf16.mxu1 %v8283_v13  ;;  %v8346_v13 = vld [vmem:[%s9804_s23 + $0x26c] ss:$16 sps:$4 sm:$0xff]   ;;  %v8395_v50 = vld [vmem:[%s9804_s23 + $0x148] ss:$16 sps:$4 sm:$0xff]  }
 0x1e6   : > { %v8398_v51 = vld [vmem:[%s9804_s23 + $0x348] ss:$16 sps:$4 sm:$0xff]  }
 0x1e7   : > { %1769 = vmatpush2.bf16.msra.mxu0 %v8285_v14  ;;  %v8341_v14 = vld [vmem:[%s9804_s23 + $0x68] ss:$16 sps:$4 sm:$0xff]  }
 0x1e8   : > { %1822 = vmatpush2.bf16.msra.mxu1 %v8286_v15  ;;  %1770 = vmatprep.subr.bf16.mxu0 %v8287_v16  ;;  %v8344_v15 = vld [vmem:[%s9804_s23 + $0x268] ss:$16 sps:$4 sm:$0xff]   ;;  %v8349_v16 = vld [vmem:[%s9804_s23 + $0x4c] ss:$16 sps:$4 sm:$0xff]  }
 0x1e9   : > { %1823 = vmatprep.subr.bf16.mxu1 %v8289_v17  ;;  %v8352_v17 = vld [vmem:[%s9804_s23 + $0x24c] ss:$16 sps:$4 sm:$0xff]   ;;  %v8407_v62 = vld [vmem:[%s9804_s23 + $0x108] ss:$16 sps:$4 sm:$0xff]  }
 0x1ea   : > { %v8410_v63 = vld [vmem:[%s9804_s23 + $0x308] ss:$16 sps:$4 sm:$0xff]  }
 0x1eb   : > { %1771 = vmatpush2.bf16.msra.mxu0 %v8291_v22  ;;  %v8353_v22 = vld [vmem:[%s9804_s23 + $0x28] ss:$16 sps:$4 sm:$0xff]  }
 0x1ec   : > { %1824 = vmatpush2.bf16.msra.mxu1 %v8292_v23  ;;  %1772 = vmatprep.subr.bf16.mxu0 %v8293_v24  ;;  %v8356_v23 = vld [vmem:[%s9804_s23 + $0x228] ss:$16 sps:$4 sm:$0xff]   ;;  %v8361_v24 = vld [vmem:[%s9804_s23 + $0xc] ss:$16 sps:$4 sm:$0xff]  }
 0x1ed   : > { %1825 = vmatprep.subr.bf16.mxu1 %v8295_v27  ;;  %v8362_v27 = vld [vmem:[%s9804_s23 + $0x208] ss:$16 sps:$4 sm:$0xff]  }
 0x1ef   : > { %1773 = vmatpush2.bf16.msra.mxu0 %v8297_v28  ;;  %v8367_v28 = vld [vmem:[%s9804_s23 + $0x1ec] ss:$16 sps:$4 sm:$0xff]  }
 0x1f0   : > { %1826 = vmatpush2.bf16.msra.mxu1 %v8298_v29  ;;  %1774 = vmatprep.subr.bf16.mxu0 %v8299_v30  ;;  %v8370_v29 = vld [vmem:[%s9804_s23 + $0x3ec] ss:$16 sps:$4 sm:$0xff]   ;;  %v8365_v30 = vld [vmem:[%s9804_s23 + $0x1e8] ss:$16 sps:$4 sm:$0xff]  }
 0x1f1   : > { %1827 = vmatprep.subr.bf16.mxu1 %v8301_v31  ;;  %v8368_v31 = vld [vmem:[%s9804_s23 + $0x3e8] ss:$16 sps:$4 sm:$0xff]  }
 0x1f3   : > { %1775 = vmatpush2.bf16.msra.mxu0 %v8303_v32  ;;  %v8373_v32 = vld [vmem:[%s9804_s23 + $0x1cc] ss:$16 sps:$4 sm:$0xff]  }
 0x1f4   : > { %1828 = vmatpush2.bf16.msra.mxu1 %v8304_v33  ;;  %1776 = vmatprep.subr.bf16.mxu0 %v8305_v34  ;;  %v8376_v33 = vld [vmem:[%s9804_s23 + $0x3cc] ss:$16 sps:$4 sm:$0xff]   ;;  %v8371_v34 = vld [vmem:[%s9804_s23 + $0x1c8] ss:$16 sps:$4 sm:$0xff]  }
 0x1f5   : > { %1829 = vmatprep.subr.bf16.mxu1 %v8307_v35  ;;  %v8374_v35 = vld [vmem:[%s9804_s23 + $0x3c8] ss:$16 sps:$4 sm:$0xff]  }
 0x1f7   : > { %1777 = vmatpush2.bf16.msra.mxu0 %v8309_v36  ;;  %v8379_v36 = vld [vmem:[%s9804_s23 + $0x1ac] ss:$16 sps:$4 sm:$0xff]  }
 0x1f8   : > { %1830 = vmatpush2.bf16.msra.mxu1 %v8310_v37  ;;  %1778 = vmatprep.subr.bf16.mxu0 %v8311_v38  ;;  %v8382_v37 = vld [vmem:[%s9804_s23 + $0x3ac] ss:$16 sps:$4 sm:$0xff]   ;;  %v8377_v38 = vld [vmem:[%s9804_s23 + $0x1a8] ss:$16 sps:$4 sm:$0xff]  }
 0x1f9   : > { %1831 = vmatprep.subr.bf16.mxu1 %v8313_v39  ;;  %v8380_v39 = vld [vmem:[%s9804_s23 + $0x3a8] ss:$16 sps:$4 sm:$0xff]  }
 0x1fb   : > { %1779 = vmatpush2.bf16.msra.mxu0 %v8315_v40  ;;  %v8385_v40 = vld [vmem:[%s9804_s23 + $0x18c] ss:$16 sps:$4 sm:$0xff]  }
 0x1fc   : > { %1832 = vmatpush2.bf16.msra.mxu1 %v8316_v41  ;;  %1854 = vmatprep.subr.bf16.mxu0 %v8319_v46  ;;  %v8388_v41 = vld [vmem:[%s9804_s23 + $0x38c] ss:$16 sps:$4 sm:$0xff]   ;;  %v8389_v46 = vld [vmem:[%s9804_s23 + $0x168] ss:$16 sps:$4 sm:$0xff]  }
 0x1fd   : > { %1907 = vmatprep.subr.bf16.mxu1 %v8322_v47  ;;  %v8392_v47 = vld [vmem:[%s9804_s23 + $0x368] ss:$16 sps:$4 sm:$0xff]  }
 0x1fe   : > { %1781 = vmatmul.mubr.bf16.vlgmr.msra.gmra.mxu0 %v9914_v52 }
 0x1ff   : > { %1834 = vmatmul.mubr.bf16.vlgmr.msra.gmra.mxu1 %v9916_v53  ;;  %1855 = vmatpush1.bf16.msra.mxu0 %v8317_v48  ;;  %v8397_v48 = vld [vmem:[%s9804_s23 + $0x14c] ss:$16 sps:$4 sm:$0xff]  }
 0x200   : > { %1908 = vmatpush1.bf16.msra.mxu1 %v8320_v49  ;;  %1856 = vmatprep.subr.bf16.mxu0 %v8325_v56  ;;  %v8400_v49 = vld [vmem:[%s9804_s23 + $0x34c] ss:$16 sps:$4 sm:$0xff]   ;;  %v8401_v56 = vld [vmem:[%s9804_s23 + $0x128] ss:$16 sps:$4 sm:$0xff]  }
 0x201   : > { %1909 = vmatprep.subr.bf16.mxu1 %v8328_v57  ;;  %1790 = vmatprep.mubr.bf16.mxu0 %v9922_v60  ;;  %v8404_v57 = vld [vmem:[%s9804_s23 + $0x328] ss:$16 sps:$4 sm:$0xff]  }
 0x202   : > { %1843 = vmatprep.mubr.bf16.mxu1 %v9924_v61 }
 0x203   : > { %1857 = vmatpush1.bf16.msra.mxu0 %v8323_v58  ;;  %v8409_v58 = vld [vmem:[%s9804_s23 + $0x10c] ss:$16 sps:$4 sm:$0xff]  }
 0x204   : > { %1910 = vmatpush1.bf16.msra.mxu1 %v8326_v59  ;;  %1858 = vmatprep.subr.bf16.mxu0 %v8331_v2  ;;  %v8412_v59 = vld [vmem:[%s9804_s23 + $0x30c] ss:$16 sps:$4 sm:$0xff]   ;;  %v8418_v2 = vld [vmem:[%s9810_s15 + $0xc4] ss:$16 sps:$4 sm:$0xff]  }
 0x205   : > { %1911 = vmatprep.subr.bf16.mxu1 %v8334_v3  ;;  %v8416_v3 = vld [vmem:[%s9810_s15 + $0xc0] ss:$16 sps:$4 sm:$0xff]  }
 0x206   : > { %1791 = vmatmul.mubr.bf16.gmra.mxu0 %v9932_v4 }
 0x207   : > { %1844 = vmatmul.mubr.bf16.gmra.mxu1 %v9934_v5  ;;  %1859 = vmatpush1.bf16.msra.mxu0 %v8329_v6  ;;  %v8421_v6 = vld [vmem:[%s9810_s15 + $0xa4] ss:$16 sps:$4 sm:$0xff]  }
 0x208   : > { %1912 = vmatpush1.bf16.msra.mxu1 %v8332_v7  ;;  %1860 = vmatprep.subr.bf16.mxu0 %v8337_v8  ;;  %v8419_v7 = vld [vmem:[%s9810_s15 + $0xa0] ss:$16 sps:$4 sm:$0xff]   ;;  %v8430_v8 = vld [vmem:[%s9810_s15 + $0x44] ss:$16 sps:$4 sm:$0xff]  }
 0x209   : > { %1913 = vmatprep.subr.bf16.mxu1 %v8340_v9  ;;  %1886 = vmatprep.mubr.bf16.mxu0 %v9889_v25  ;;  %v8364_v25 = vld [vmem:[%s9804_s23 + $0x20c] ss:$16 sps:$4 sm:$0xff]   ;;  %v8428_v9 = vld [vmem:[%s9810_s15 + $0x40] ss:$16 sps:$4 sm:$0xff]  }
 0x20a   : > { %1939 = vmatprep.mubr.bf16.mxu1 %v9891_v26  ;;  %v8359_v26 = vld [vmem:[%s9804_s23 + $0x8] ss:$16 sps:$4 sm:$0xff]  }
 0x20b   : > { %1861 = vmatpush1.bf16.msra.mxu0 %v8335_v10  ;;  %v8436_v10 = vld [vmem:[%s9810_s15 + $0x4] ss:$16 sps:$4 sm:$0xff]  }
 0x20c   : > { %1914 = vmatpush1.bf16.msra.mxu1 %v8338_v11  ;;  %1862 = vmatprep.subr.bf16.mxu0 %v8343_v12  ;;  %v8463_v11 = vld [vmem:[%s9810_s15 + $0x2e4] ss:$16 sps:$4 sm:$0xff]   ;;  %v8461_v12 = vld [vmem:[%s9810_s15 + $0x2e0] ss:$16 sps:$4 sm:$0xff]  }
 0x20d   : > { %1915 = vmatprep.subr.bf16.mxu1 %v8346_v13  ;;  %v8434_v13 = vld [vmem:[%s9810_s15] ss:$16 sps:$4 sm:$0xff]  }
 0x20f   : > { %1863 = vmatpush1.bf16.msra.mxu0 %v8341_v14  ;;  %v8467_v14 = vld [vmem:[%s9810_s15 + $0x2c0] ss:$16 sps:$4 sm:$0xff]  }
 0x210   : > { %1916 = vmatpush1.bf16.msra.mxu1 %v8344_v15  ;;  %1864 = vmatprep.subr.bf16.mxu0 %v8349_v16  ;;  %v8469_v15 = vld [vmem:[%s9810_s15 + $0x2c4] ss:$16 sps:$4 sm:$0xff]  }
 0x211   : > { %1917 = vmatprep.subr.bf16.mxu1 %v8352_v17  ;;  %v8439_v16 = vld [vmem:[%s9810_s15 + $0x1e4] ss:$16 sps:$4 sm:$0xff]   ;;  %v8437_v17 = vld [vmem:[%s9810_s15 + $0x1e0] ss:$16 sps:$4 sm:$0xff]  }
 0x213   : > { %1865 = vmatpush1.bf16.msra.mxu0 %v8347_v18  ;;  %v8473_v18 = vld [vmem:[%s9810_s15 + $0x2a0] ss:$16 sps:$4 sm:$0xff]  }
 0x214   : > { %1918 = vmatpush1.bf16.msra.mxu1 %v8350_v19  ;;  %1866 = vmatprep.subr.bf16.mxu0 %v8355_v20  ;;  %v8475_v19 = vld [vmem:[%s9810_s15 + $0x2a4] ss:$16 sps:$4 sm:$0xff]  }
 0x215   : > { %1919 = vmatprep.subr.bf16.mxu1 %v8358_v21  ;;  %v8442_v20 = vld [vmem:[%s9810_s15 + $0x1c4] ss:$16 sps:$4 sm:$0xff]   ;;  %v8440_v21 = vld [vmem:[%s9810_s15 + $0x1c0] ss:$16 sps:$4 sm:$0xff]  }
 0x217   : > { %1867 = vmatpush1.bf16.msra.mxu0 %v8353_v22  ;;  %v8479_v22 = vld [vmem:[%s9810_s15 + $0x280] ss:$16 sps:$4 sm:$0xff]  }
 0x218   : > { %1920 = vmatpush1.bf16.msra.mxu1 %v8356_v23  ;;  %1868 = vmatprep.subr.bf16.mxu0 %v8361_v24  ;;  %v8481_v23 = vld [vmem:[%s9810_s15 + $0x284] ss:$16 sps:$4 sm:$0xff]  }
 0x219   : > { %1921 = vmatprep.subr.bf16.mxu1 %v8364_v25  ;;  %v8445_v24 = vld [vmem:[%s9810_s15 + $0x1a4] ss:$16 sps:$4 sm:$0xff]   ;;  %v8443_v25 = vld [vmem:[%s9810_s15 + $0x1a0] ss:$16 sps:$4 sm:$0xff]  }
 0x21b   : > { %1869 = vmatpush1.bf16.msra.mxu0 %v8359_v26  ;;  %v8485_v26 = vld [vmem:[%s9810_s15 + $0x260] ss:$16 sps:$4 sm:$0xff]  }
 0x21c   : > { %1922 = vmatpush1.bf16.msra.mxu1 %v8362_v27  ;;  %1870 = vmatprep.subr.bf16.mxu0 %v8367_v28  ;;  %v8487_v27 = vld [vmem:[%s9810_s15 + $0x264] ss:$16 sps:$4 sm:$0xff]  }
 0x21d   : > { %1923 = vmatprep.subr.bf16.mxu1 %v8370_v29  ;;  %v8448_v28 = vld [vmem:[%s9810_s15 + $0x184] ss:$16 sps:$4 sm:$0xff]   ;;  %v8446_v29 = vld [vmem:[%s9810_s15 + $0x180] ss:$16 sps:$4 sm:$0xff]  }
 0x21f   : > { %1871 = vmatpush2.bf16.msra.mxu0 %v8365_v30  ;;  %v8491_v30 = vld [vmem:[%s9810_s15 + $0x240] ss:$16 sps:$4 sm:$0xff]  }
 0x220   : > { %1924 = vmatpush2.bf16.msra.mxu1 %v8368_v31  ;;  %1872 = vmatprep.subr.bf16.mxu0 %v8373_v32  ;;  %v8493_v31 = vld [vmem:[%s9810_s15 + $0x244] ss:$16 sps:$4 sm:$0xff]  }
 0x221   : > { %1925 = vmatprep.subr.bf16.mxu1 %v8376_v33  ;;  %v8451_v32 = vld [vmem:[%s9810_s15 + $0x164] ss:$16 sps:$4 sm:$0xff]   ;;  %v8449_v33 = vld [vmem:[%s9810_s15 + $0x160] ss:$16 sps:$4 sm:$0xff]  }
 0x223   : > { %1873 = vmatpush2.bf16.msra.mxu0 %v8371_v34  ;;  %v8497_v34 = vld [vmem:[%s9810_s15 + $0x220] ss:$16 sps:$4 sm:$0xff]  }
 0x224   : > { %1926 = vmatpush2.bf16.msra.mxu1 %v8374_v35  ;;  %1874 = vmatprep.subr.bf16.mxu0 %v8379_v36  ;;  %v8499_v35 = vld [vmem:[%s9810_s15 + $0x224] ss:$16 sps:$4 sm:$0xff]  }
 0x225   : > { %1927 = vmatprep.subr.bf16.mxu1 %v8382_v37  ;;  %v8454_v36 = vld [vmem:[%s9810_s15 + $0x144] ss:$16 sps:$4 sm:$0xff]   ;;  %v8452_v37 = vld [vmem:[%s9810_s15 + $0x140] ss:$16 sps:$4 sm:$0xff]  }
 0x227   : > { %1875 = vmatpush2.bf16.msra.mxu0 %v8377_v38  ;;  %v8503_v38 = vld [vmem:[%s9810_s15 + $0x200] ss:$16 sps:$4 sm:$0xff]  }
 0x228   : > { %1928 = vmatpush2.bf16.msra.mxu1 %v8380_v39  ;;  %1876 = vmatprep.subr.bf16.mxu0 %v8385_v40  ;;  %v8505_v39 = vld [vmem:[%s9810_s15 + $0x204] ss:$16 sps:$4 sm:$0xff]  }
 0x229   : > { %1929 = vmatprep.subr.bf16.mxu1 %v8388_v41  ;;  %v8457_v40 = vld [vmem:[%s9810_s15 + $0x124] ss:$16 sps:$4 sm:$0xff]   ;;  %v8455_v41 = vld [vmem:[%s9810_s15 + $0x120] ss:$16 sps:$4 sm:$0xff]  }
 0x22b   : > { %1877 = vmatpush2.bf16.msra.mxu0 %v8383_v42  ;;  %v8509_v42 = vld [vmem:[%s9810_s15 + $0x3e0] ss:$16 sps:$4 sm:$0xff]  }
 0x22c   : > { %1930 = vmatpush2.bf16.msra.mxu1 %v8386_v43  ;;  %1878 = vmatprep.subr.bf16.mxu0 %v8391_v44  ;;  %v8511_v43 = vld [vmem:[%s9810_s15 + $0x3e4] ss:$16 sps:$4 sm:$0xff]  }
 0x22d   : > { %1931 = vmatprep.subr.bf16.mxu1 %v8394_v45  ;;  %v8460_v44 = vld [vmem:[%s9810_s15 + $0x104] ss:$16 sps:$4 sm:$0xff]   ;;  %v8458_v45 = vld [vmem:[%s9810_s15 + $0x100] ss:$16 sps:$4 sm:$0xff]  }
 0x22f   : > { %1879 = vmatpush2.bf16.msra.mxu0 %v8389_v46  ;;  %v8515_v46 = vld [vmem:[%s9810_s15 + $0x3c0] ss:$16 sps:$4 sm:$0xff]  }
 0x230   : > { %1932 = vmatpush2.bf16.msra.mxu1 %v8392_v47  ;;  %1880 = vmatprep.subr.bf16.mxu0 %v8397_v48  ;;  %v8517_v47 = vld [vmem:[%s9810_s15 + $0x3c4] ss:$16 sps:$4 sm:$0xff]  }
 0x231   : > { %1933 = vmatprep.subr.bf16.mxu1 %v8400_v49  ;;  %v8466_v48 = vld [vmem:[%s9810_s15 + $0x4e4] ss:$16 sps:$4 sm:$0xff]  }
 0x232   : > { %v8523_v49 = vld [vmem:[%s9810_s15 + $0x3a4] ss:$16 sps:$4 sm:$0xff]  }
 0x233   : > { %1881 = vmatpush2.bf16.msra.mxu0 %v8395_v50  ;;  %v8521_v50 = vld [vmem:[%s9810_s15 + $0x3a0] ss:$16 sps:$4 sm:$0xff]  }
 0x234   : > { %1934 = vmatpush2.bf16.msra.mxu1 %v8398_v51  ;;  %1882 = vmatprep.subr.bf16.mxu0 %v8403_v54  ;;  %v8529_v51 = vld [vmem:[%s9810_s15 + $0x384] ss:$16 sps:$4 sm:$0xff]   ;;  %v8527_v54 = vld [vmem:[%s9810_s15 + $0x380] ss:$16 sps:$4 sm:$0xff]  }
 0x235   : > { %1935 = vmatprep.subr.bf16.mxu1 %v8406_v55  ;;  %v8535_v55 = vld [vmem:[%s9810_s15 + $0x364] ss:$16 sps:$4 sm:$0xff]  }
 0x237   : > { %1883 = vmatpush2.bf16.msra.mxu0 %v8401_v56  ;;  %v8533_v56 = vld [vmem:[%s9810_s15 + $0x360] ss:$16 sps:$4 sm:$0xff]  }
 0x238   : > { %1936 = vmatpush2.bf16.msra.mxu1 %v8404_v57  ;;  %1884 = vmatprep.subr.bf16.mxu0 %v8409_v58  ;;  %v8541_v57 = vld [vmem:[%s9810_s15 + $0x344] ss:$16 sps:$4 sm:$0xff]   ;;  %v8539_v58 = vld [vmem:[%s9810_s15 + $0x340] ss:$16 sps:$4 sm:$0xff]  }
 0x239   : > { %1937 = vmatprep.subr.bf16.mxu1 %v8412_v59  ;;  %v8547_v59 = vld [vmem:[%s9810_s15 + $0x324] ss:$16 sps:$4 sm:$0xff]  }
 0x23b   : > { %1885 = vmatpush2.bf16.msra.mxu0 %v8407_v62  ;;  %v8545_v62 = vld [vmem:[%s9810_s15 + $0x320] ss:$16 sps:$4 sm:$0xff]  }
 0x23c   : > { %1938 = vmatpush2.bf16.msra.mxu1 %v8410_v63  ;;  %3634 = vmatprep.subr.bf16.mxu0 %v8415_v0  ;;  %v8553_v63 = vld [vmem:[%s9810_s15 + $0x304] ss:$16 sps:$4 sm:$0xff]   ;;  %v8551_v0 = vld [vmem:[%s9810_s15 + $0x300] ss:$16 sps:$4 sm:$0xff]  }
 0x23d   : > { %3687 = vmatprep.subr.bf16.mxu1 %v8463_v11 }
 0x23e   : > { %1887 = vmatmul.mubr.bf16.vlgmr.msra.gmra.mxu0 %v9914_v52  ;;  %v8424_v52 = vld [vmem:[%s9810_s15 + $0x84] ss:$16 sps:$4 sm:$0xff]  }
 0x23f   : > { %1940 = vmatmul.mubr.bf16.vlgmr.msra.gmra.mxu1 %v9916_v53  ;;  %1896 = vmatprep.mubr.bf16.mxu0 %v9922_v60  ;;  %v8422_v53 = vld [vmem:[%s9810_s15 + $0x80] ss:$16 sps:$4 sm:$0xff]   ;;  %v8427_v60 = vld [vmem:[%s9810_s15 + $0x64] ss:$16 sps:$4 sm:$0xff]  }
 0x240   : > { %1949 = vmatprep.mubr.bf16.mxu1 %v9924_v61  ;;  %3635 = vmatpush1.bf16.msra.mxu0 %v8413_v1  ;;  %v8425_v61 = vld [vmem:[%s9810_s15 + $0x60] ss:$16 sps:$4 sm:$0xff]   ;;  %v8559_v1 = vld [vmem:[%s9810_s15 + $0x6e4] ss:$16 sps:$4 sm:$0xff]  }
 0x241   : > { %3636 = vmatprep.subr.bf16.mxu0 %v8418_v2  ;;  %3688 = vmatpush1.bf16.msra.mxu1 %v8461_v12 }
 0x242   : > { %3689 = vmatprep.subr.bf16.mxu1 %v8469_v15 }
 0x244   : > { %3637 = vmatpush1.bf16.msra.mxu0 %v8416_v3 }
 0x245   : > { %3638 = vmatprep.subr.bf16.mxu0 %v8421_v6  ;;  %3690 = vmatpush1.bf16.msra.mxu1 %v8467_v14 }
 0x246   : > { %1897 = vmatmul.mubr.bf16.gmra.mxu0 %v9932_v4  ;;  %v8433_v4 = vld [vmem:[%s9810_s15 + $0x24] ss:$16 sps:$4 sm:$0xff]   ;;  %3691 = vmatprep.subr.bf16.mxu1 %v8475_v19 }
 0x247   : > { %1950 = vmatmul.mubr.bf16.gmra.mxu1 %v9934_v5  ;;  %v8431_v5 = vld [vmem:[%s9810_s15 + $0x20] ss:$16 sps:$4 sm:$0xff]  }
 0x248   : > { %3639 = vmatpush1.bf16.msra.mxu0 %v8419_v7 }
 0x249   : > { %3640 = vmatprep.subr.bf16.mxu0 %v8424_v52  ;;  %3692 = vmatpush1.bf16.msra.mxu1 %v8473_v18 }
 0x24a   : > { %3693 = vmatprep.subr.bf16.mxu1 %v8481_v23 }
 0x24c   : > { %3641 = vmatpush1.bf16.msra.mxu0 %v8422_v53 }
 0x24d   : > { %3642 = vmatprep.subr.bf16.mxu0 %v8427_v60  ;;  %3694 = vmatpush1.bf16.msra.mxu1 %v8479_v22 }
 0x24e   : > { %3695 = vmatprep.subr.bf16.mxu1 %v8487_v27 }
 0x250   : > { %3643 = vmatpush1.bf16.msra.mxu0 %v8425_v61 }
 0x251   : > { %3644 = vmatprep.subr.bf16.mxu0 %v8430_v8  ;;  %3696 = vmatpush1.bf16.msra.mxu1 %v8485_v26  ;;  %v1976_v8 = vlaneseq }
 0x252   : > { %3697 = vmatprep.subr.bf16.mxu1 %v8493_v31 }
 0x254   : > { %3645 = vmatpush1.bf16.msra.mxu0 %v8428_v9 }
 0x255   : > { %3646 = vmatprep.subr.bf16.mxu0 %v8433_v4  ;;  %3698 = vmatpush1.bf16.msra.mxu1 %v8491_v30 }
 0x256   : > { %3699 = vmatprep.subr.bf16.mxu1 %v8499_v35 }
 0x258   : > { %3647 = vmatpush1.bf16.msra.mxu0 %v8431_v5 }
 0x259   : > { %3648 = vmatprep.subr.bf16.mxu0 %v8436_v10  ;;  %3700 = vmatpush1.bf16.msra.mxu1 %v8497_v34 }
 0x25a   : > { %3701 = vmatprep.subr.bf16.mxu1 %v8505_v39 }
 0x25c   : > { %3649 = vmatpush1.bf16.msra.mxu0 %v8434_v13 }
 0x25d   : > { %3650 = vmatprep.subr.bf16.mxu0 %v8439_v16  ;;  %3702 = vmatpush1.bf16.msra.mxu1 %v8503_v38  ;;  %v10072_v16 = vshrl.u32 %v1976_v8, 7  ;;  %v8496_v8 = vld [vmem:[%s9810_s15 + $0x444] ss:$16 sps:$4 sm:$0xff]  }
 0x25e   : > { %3703 = vmatprep.subr.bf16.mxu1 %v8511_v43 }
 0x25f   : > { %v1979_v23 = vadd.s32 16, %v10072_v16  ;;  %vm2049_vm0 = vcmp.lt.s32.totalorder %v10072_v16, 1 }
 0x260   : > { %3651 = vmatpush2.bf16.msra.mxu0 %v8437_v17 }
 0x261   : > { %3652 = vmatprep.subr.bf16.mxu0 %v8442_v20  ;;  %3704 = vmatpush2.bf16.msra.mxu1 %v8509_v42  ;;  %v1999_v34 = vand.u32 15, %v1979_v23 }
 0x262   : > { %3705 = vmatprep.subr.bf16.mxu1 %v8517_v47 }
 0x263   : > { %vm7977_vm2 = vcmp.ne.s32.totalorder %v1999_v34, 0 }
 0x264   : > { %3653 = vmatpush2.bf16.msra.mxu0 %v8440_v21  ;;  %vm10104_vm5 = vmpackc.low %vm9549_vm3, %vm7977_vm2 }
 0x265   : > { %3654 = vmatprep.subr.bf16.mxu0 %v8445_v24  ;;  %3706 = vmatpush2.bf16.msra.mxu1 %v8515_v46 }
 0x266   : > { %3707 = vmatprep.subr.bf16.mxu1 %v8523_v49  ;;  %v8800_v49 = vld [vmem:[%s9812_s20 + $0xc0] ss:$16 sps:$4 sm:$0xff]  }
 0x268   : > { %3655 = vmatpush2.bf16.msra.mxu0 %v8443_v25 }
 0x269   : > { %3656 = vmatprep.subr.bf16.mxu0 %v8448_v28  ;;  %3708 = vmatpush2.bf16.msra.mxu1 %v8521_v50 }
 0x26a   : > { %3709 = vmatprep.subr.bf16.mxu1 %v8529_v51 }
 0x26c   : > { %3657 = vmatpush2.bf16.msra.mxu0 %v8446_v29  ;;  %v1985_v29 = vand.u32 15, %v10072_v16  ;;  %v8575_v16 = vld [vmem:[%s9810_s15 + $0x680] ss:$16 sps:$4 sm:$0xff]  }
 0x26d   : > { %3658 = vmatprep.subr.bf16.mxu0 %v8451_v32  ;;  %3710 = vmatpush2.bf16.msra.mxu1 %v8527_v54  ;;  %v8464_v54 = vld [vmem:[%s9810_s15 + $0x4e0] ss:$16 sps:$4 sm:$0xff]  }
 0x26e   : > { %3711 = vmatprep.subr.bf16.mxu1 %v8535_v55  ;;  %vm7976_vm1 = vcmp.ne.s32.totalorder %v1985_v29, 0 }
 0x26f   : > { %vm10091_vm4 = vmpackc.low %vm9549_vm3, %vm7976_vm1 }
 0x270   : > { %3659 = vmatpush2.bf16.msra.mxu0 %v8449_v33 }
 0x271   : > { %3660 = vmatprep.subr.bf16.mxu0 %v8454_v36  ;;  %3712 = vmatpush2.bf16.msra.mxu1 %v8533_v56 }
 0x272   : > { %3713 = vmatprep.subr.bf16.mxu1 %v8541_v57  ;;  %v8811_v57 = vld [vmem:[%s9812_s20 + $0x64] ss:$16 sps:$4 sm:$0xff]  }
 0x274   : > { %3661 = vmatpush2.bf16.msra.mxu0 %v8452_v37 }
 0x275   : > { %3662 = vmatprep.subr.bf16.mxu0 %v8457_v40  ;;  %3714 = vmatpush2.bf16.msra.mxu1 %v8539_v58  ;;  %v8472_v58 = vld [vmem:[%s9810_s15 + $0x4c4] ss:$16 sps:$4 sm:$0xff]  }
 0x276   : > { %3715 = vmatprep.subr.bf16.mxu1 %v8547_v59 }
 0x278   : > { %3663 = vmatpush2.bf16.msra.mxu0 %v8455_v41 }
 0x279   : > { %3664 = vmatprep.subr.bf16.mxu0 %v8460_v44  ;;  %3716 = vmatpush2.bf16.msra.mxu1 %v8545_v62 }
 0x27a   : > { %3717 = vmatprep.subr.bf16.mxu1 %v8553_v63  ;;  %v8470_v63 = vld [vmem:[%s9810_s15 + $0x4c0] ss:$16 sps:$4 sm:$0xff]  }
 0x27c   : > { %3665 = vmatpush2.bf16.msra.mxu0 %v8458_v45 }
 0x27d   : > { %3740 = vmatprep.subr.bf16.mxu0 %v8466_v48  ;;  %3718 = vmatpush2.bf16.msra.mxu1 %v8551_v0  ;;  %v8478_v0 = vld [vmem:[%s9810_s15 + $0x4a4] ss:$16 sps:$4 sm:$0xff]  }
 0x27e   : > { %3793 = vmatprep.subr.bf16.mxu1 %v8559_v1 }
 0x2be   : > { %v1782_v2 = vpop.f32.mrf.mxu0 }
 0x2bf   : > { %v1835_v3 = vpop.f32.mrf.mxu1 }
 0x2c0   : > { %v1784_v6 = vpop.f32.mrf.mxu0  ;;  %v1836_v52 = vadd.f32 %v1835_v3, %v1782_v2  ;;  %v8476_v3 = vld [vmem:[%s9810_s15 + $0x4a0] ss:$16 sps:$4 sm:$0xff]  }
 0x2c1   : > { %v1837_v7 = vpop.f32.mrf.mxu1 }
 0x2c2   : > { %v1786_v53 = vpop.f32.mrf.mxu0  ;;  %v1960_v5 = vmax.f32 %v1836_v52, 0.0  ;;  %v10070_v15 = vadd.f32 %v1837_v7, %v1784_v6  ;;  %v8484_v7 = vld [vmem:[%s9810_s15 + $0x484] ss:$16 sps:$4 sm:$0xff]  }
 0x2c3   : > { %v1839_v60 = vpop.f32.mrf.mxu1 }
 0x2c4   : > { %v1840_v61 = vadd.f32 %v1839_v60, %v1786_v53  ;;  %v1788_v9 = vpop.f32.mrf.mxu0  ;;  %v1961_v26 = vmax.f32 %v10070_v15, 0.0  ;;  %v2033_v39 = vrot.slane %v1960_v5, 7  ;;  %v8482_v53 = vld [vmem:[%s9810_s15 + $0x480] ss:$16 sps:$4 sm:$0xff]   ;;  %v8490_v60 = vld [vmem:[%s9810_s15 + $0x464] ss:$16 sps:$4 sm:$0xff]  }
 0x2c5   : > { %v1841_v4 = vpop.f32.mrf.mxu1  ;;  %v8520_v15 = vld [vmem:[%s9810_s15 + $0x5c4] ss:$16 sps:$4 sm:$0xff]  }
 0x2c6   : > { %v1964_v10 = vmax.f32 %v1840_v61, 0.0  ;;  %v1792_v11 = vpop.f32.mrf.mxu0  ;;  %v10068_v14 = vadd.f32 %v1841_v4, %v1788_v9  ;;  %v2034_v41 = vrot.slane %v1961_v26, 7  ;;  %v8488_v61 = vld [vmem:[%s9810_s15 + $0x460] ss:$16 sps:$4 sm:$0xff]   ;;  %v8502_v4 = vld [vmem:[%s9810_s15 + $0x424] ss:$16 sps:$4 sm:$0xff]  }
 0x2c7   : > { %v1845_v12 = vpop.f32.mrf.mxu1  ;;  %v8494_v9 = vld [vmem:[%s9810_s15 + $0x440] ss:$16 sps:$4 sm:$0xff]  }
 0x2c8   : > { %v10066_v13 = vpack.c.bf16 %v1964_v10, %v1960_v5  ;;  %v1794_v17 = vpop.f32.mrf.mxu0  ;;  %v1846_v19 = vadd.f32 %v1845_v12, %v1792_v11  ;;  %v1965_v24 = vmax.f32 %v10068_v14, 0.0  ;;  %v2037_v40 = vrot.slane %v1964_v10, 7  ;;  %v8500_v5 = vld [vmem:[%s9810_s15 + $0x420] ss:$16 sps:$4 sm:$0xff]   ;;  %v8508_v10 = vld [vmem:[%s9810_s15 + $0x404] ss:$16 sps:$4 sm:$0xff]  }
 0x2c9   : > { %v1847_v18 = vpop.f32.mrf.mxu1  ;;  %v8506_v11 = vld [vmem:[%s9810_s15 + $0x400] ss:$16 sps:$4 sm:$0xff]   ;;  %v8514_v12 = vld [vmem:[%s9810_s15 + $0x5e4] ss:$16 sps:$4 sm:$0xff]  }
 0x2ca   : > { %v1848_v20 = vadd.f32 %v1847_v18, %v1794_v17  ;;  %v1796_v21 = vpop.f32.mrf.mxu0  ;;  %v1968_v30 = vmax.f32 %v1846_v19, 0.0  ;;  %v2038_v35 = vrot.slane %v1965_v24, 7  ;;  %v2058_v50 = vsel %vm2049_vm0, %v2033_v39, %v2037_v40  ;;  %v8512_v14 = vld [vmem:[%s9810_s15 + $0x5e0] ss:$16 sps:$4 sm:$0xff]   ;;  %v8526_v18 = vld [vmem:[%s9810_s15 + $0x5a4] ss:$16 sps:$4 sm:$0xff]  }
 0x2cb   : > { %v1849_v22 = vpop.f32.mrf.mxu1  ;;  %v10130_v52 = vpack.c.bf16 %v1965_v24, %v1961_v26  ;;  %v8518_v17 = vld [vmem:[%s9810_s15 + $0x5c0] ss:$16 sps:$4 sm:$0xff]  }
 0x2cc   : > { %v1850_v25 = vadd.f32 %v1849_v22, %v1796_v21  ;;  %v1798_v27 = vpop.f32.mrf.mxu0  ;;  %v1969_v31 = vmax.f32 %v1848_v20, 0.0  ;;  %v2059_v46 = vsel %vm2049_vm0, %v2034_v41, %v2038_v35  ;;  %v2041_v62 = vrot.slane %v1968_v30, 7  ;;  %v8524_v19 = vld [vmem:[%s9810_s15 + $0x5a0] ss:$16 sps:$4 sm:$0xff]   ;;  %v8532_v20 = vld [vmem:[%s9810_s15 + $0x584] ss:$16 sps:$4 sm:$0xff]  }
 0x2cd   : > { %v1851_v28 = vpop.f32.mrf.mxu1 }
 0x2ce   : > { %v1972_v32 = vmax.f32 %v1850_v25, 0.0  ;;  %v1852_v33 = vadd.f32 %v1851_v28, %v1798_v27  ;;  %v2042_v42 = vrot.slane %v1969_v31, 7  ;;  %v2054_v2 = vsel %vm2049_vm0, %v2037_v40, %v2041_v62  ;;  %v8530_v25 = vld [vmem:[%s9810_s15 + $0x580] ss:$16 sps:$4 sm:$0xff]   ;;  %v8538_v27 = vld [vmem:[%s9810_s15 + $0x564] ss:$16 sps:$4 sm:$0xff]  }
 0x2d0   : > { %v2045_v36 = vrot.slane %v1972_v32, 7  ;;  %v10079_v37 = vpack.c.bf16 %v1972_v32, %v1968_v30  ;;  %v1973_v38 = vmax.f32 %v1852_v33, 0.0  ;;  %v2055_v55 = vsel %vm2049_vm0, %v2038_v35, %v2042_v42  ;;  %v8536_v33 = vld [vmem:[%s9810_s15 + $0x560] ss:$16 sps:$4 sm:$0xff]  }
 0x2d2   : > { %v2046_v43 = vrot.slane %v1973_v38, 7  ;;  %v10081_v44 = vpack.c.bf16 %v1973_v38, %v1969_v31  ;;  %v2062_v45 = vsel %vm2049_vm0, %v2045_v36, %v2033_v39  ;;  %v2050_v1 = vsel %vm2049_vm0, %v2041_v62, %v2045_v36  ;;  %v8544_v36 = vld [vmem:[%s9810_s15 + $0x544] ss:$16 sps:$4 sm:$0xff]  }
 0x2d3   : > { %v10102_v56 = vpack.c.bf16 %v2058_v50, %v2062_v45  ;;  %v10127_v6 = vpack.c.bf16 %v2050_v1, %v2054_v2  ;;  %v8542_v45 = vld [vmem:[%s9810_s15 + $0x540] ss:$16 sps:$4 sm:$0xff]  }
 0x2d4   : > { %v2051_v47 = vsel %vm2049_vm0, %v2042_v42, %v2046_v43  ;;  %v2063_v48 = vsel %vm2049_vm0, %v2046_v43, %v2034_v41  ;;  %v8548_v1 = vld [vmem:[%s9810_s15 + $0x520] ss:$16 sps:$4 sm:$0xff]  }
 0x2d5   : > { %v10097_v51 = vpack.c.bf16 %v2059_v46, %v2063_v48  ;;  %v10112_v59 = vpack.c.bf16 %v2051_v47, %v2055_v55  ;;  %v8550_v48 = vld [vmem:[%s9810_s15 + $0x524] ss:$16 sps:$4 sm:$0xff]  }
 0x2d7   : > { %7557 = vmatprep.mubr.msk.bf16.mxu0 %vm10091_vm4, %v10097_v51 }
 0x2d8   : > { %7561 = vmatmul.mubr.msk.bf16.vlgmr.msra.gmra.mxu0 %vm10091_vm4, %v10102_v56 }
 0x2d9   : > { %3741 = vmatpush1.bf16.msra.mxu0 %v8464_v54  ;;  %7565 = vmatprep.mubr.msk.bf16.mxu0 %vm10104_vm5, %v10112_v59 }
 0x2da   : > { %3742 = vmatprep.subr.bf16.mxu0 %v8472_v58 }
 0x2dd   : > { %3743 = vmatpush1.bf16.msra.mxu0 %v8470_v63 }
 0x2de   : > { %3744 = vmatprep.subr.bf16.mxu0 %v8478_v0 }
 0x2e0   : > { %7569 = vmatmul.mubr.msk.bf16.gmra.mxu0 %vm10104_vm5, %v10127_v6 }
 0x2e1   : > { %3745 = vmatpush1.bf16.msra.mxu0 %v8476_v3  ;;  %3772 = vmatprep.mubr.bf16.mxu0 %v10130_v52 }
 0x2e2   : > { %3746 = vmatprep.subr.bf16.mxu0 %v8484_v7 }
 0x2e5   : > { %3747 = vmatpush1.bf16.msra.mxu0 %v8482_v53 }
 0x2e6   : > { %3748 = vmatprep.subr.bf16.mxu0 %v8490_v60  ;;  %v8556_v60 = vld [vmem:[%s9810_s15 + $0x504] ss:$16 sps:$4 sm:$0xff]  }
 0x2e9   : > { %3749 = vmatpush1.bf16.msra.mxu0 %v8488_v61 }
 0x2ea   : > { %3750 = vmatprep.subr.bf16.mxu0 %v8496_v8 }
 0x2ed   : > { %3751 = vmatpush1.bf16.msra.mxu0 %v8494_v9 }
 0x2ee   : > { %3752 = vmatprep.subr.bf16.mxu0 %v8502_v4 }
 0x2f1   : > { %3753 = vmatpush1.bf16.msra.mxu0 %v8500_v5 }
 0x2f2   : > { %3754 = vmatprep.subr.bf16.mxu0 %v8508_v10 }
 0x2f5   : > { %3755 = vmatpush1.bf16.msra.mxu0 %v8506_v11 }
 0x2f6   : > { %3756 = vmatprep.subr.bf16.mxu0 %v8514_v12  ;;  %v8554_v12 = vld [vmem:[%s9810_s15 + $0x500] ss:$16 sps:$4 sm:$0xff]  }
 0x2f9   : > { %3757 = vmatpush2.bf16.msra.mxu0 %v8512_v14 }
 0x2fa   : > { %3758 = vmatprep.subr.bf16.mxu0 %v8520_v15 }
 0x2fd   : > { %3759 = vmatpush2.bf16.msra.mxu0 %v8518_v17 }
 0x2fe   : > { %3760 = vmatprep.subr.bf16.mxu0 %v8526_v18  ;;  %v1888_v21 = vpop.f32.mrf.mxu0  ;;  %v8562_v18 = vld [vmem:[%s9810_s15 + $0xec] ss:$16 sps:$4 sm:$0xff]  }
 0x2ff   : > { %v1941_v22 = vpop.f32.mrf.mxu1 }
 0x300   : > { %v1890_v23 = vpop.f32.mrf.mxu0  ;;  %v1942_v26 = vadd.f32 %v1941_v22, %v1888_v21 }
 0x301   : > { %3761 = vmatpush2.bf16.msra.mxu0 %v8524_v19  ;;  %v1943_v24 = vpop.f32.mrf.mxu1 }
 0x302   : > { %3762 = vmatprep.subr.bf16.mxu0 %v8532_v20  ;;  %v1892_v28 = vpop.f32.mrf.mxu0  ;;  %v1962_v34 = vmax.f32 %v1942_v26, 0.0  ;;  %v10161_v46 = vadd.f32 %v1943_v24, %v1890_v23  ;;  %v8557_v26 = vld [vmem:[%s9810_s15 + $0x6e0] ss:$16 sps:$4 sm:$0xff]  }
 0x303   : > { %v1945_v29 = vpop.f32.mrf.mxu1 }
 0x304   : > { %v1946_v30 = vadd.f32 %v1945_v29, %v1892_v28  ;;  %v1894_v31 = vpop.f32.mrf.mxu0  ;;  %v1963_v2 = vmax.f32 %v10161_v46, 0.0  ;;  %v2035_v10 = vrot.slane %v1962_v34, 7  ;;  %v8560_v28 = vld [vmem:[%s9810_s15 + $0xe8] ss:$16 sps:$4 sm:$0xff]  }
 0x305   : > { %3763 = vmatpush2.bf16.msra.mxu0 %v8530_v25  ;;  %v1947_v32 = vpop.f32.mrf.mxu1 }
 0x306   : > { %v1966_v35 = vmax.f32 %v1946_v30, 0.0  ;;  %3764 = vmatprep.subr.bf16.mxu0 %v8538_v27  ;;  %v1898_v38 = vpop.f32.mrf.mxu0  ;;  %v10158_v41 = vadd.f32 %v1947_v32, %v1894_v31  ;;  %v2036_v14 = vrot.slane %v1963_v2, 7  ;;  %v8565_v30 = vld [vmem:[%s9810_s15 + $0x6c4] ss:$16 sps:$4 sm:$0xff]   ;;  %v8568_v31 = vld [vmem:[%s9810_s15 + $0xcc] ss:$16 sps:$4 sm:$0xff]  }
 0x307   : > { %v1951_v39 = vpop.f32.mrf.mxu1 }
 0x308   : > { %v10156_v40 = vpack.c.bf16 %v1966_v35, %v1962_v34  ;;  %v1900_v42 = vpop.f32.mrf.mxu0  ;;  %v1952_v47 = vadd.f32 %v1951_v39, %v1898_v38  ;;  %v1967_v58 = vmax.f32 %v10158_v41, 0.0  ;;  %v2039_v11 = vrot.slane %v1966_v35, 7  ;;  %v8563_v34 = vld [vmem:[%s9810_s15 + $0x6c0] ss:$16 sps:$4 sm:$0xff]   ;;  %v8566_v35 = vld [vmem:[%s9810_s15 + $0xc8] ss:$16 sps:$4 sm:$0xff]  }
 0x309   : > { %3765 = vmatpush2.bf16.msra.mxu0 %v8536_v33  ;;  %v1953_v43 = vpop.f32.mrf.mxu1  ;;  %v8574_v39 = vld [vmem:[%s9810_s15 + $0xac] ss:$16 sps:$4 sm:$0xff]   ;;  %v8578_v41 = vld [vmem:[%s9810_s15 + $0x88] ss:$16 sps:$4 sm:$0xff]  }
 0x30a   : > { %3766 = vmatprep.subr.bf16.mxu0 %v8544_v36  ;;  %v1954_v50 = vadd.f32 %v1953_v43, %v1900_v42  ;;  %v1902_v54 = vpop.f32.mrf.mxu0  ;;  %v1970_v3 = vmax.f32 %v1952_v47, 0.0  ;;  %v2040_v8 = vrot.slane %v1967_v58, 7  ;;  %v2060_v23 = vsel %vm2049_vm0, %v2035_v10, %v2039_v11  ;;  %v8571_v36 = vld [vmem:[%s9810_s15 + $0x6a4] ss:$16 sps:$4 sm:$0xff]   ;;  %v8569_v43 = vld [vmem:[%s9810_s15 + $0x6a0] ss:$16 sps:$4 sm:$0xff]  }
 0x30b   : > { %v1955_v55 = vpop.f32.mrf.mxu1  ;;  %v8577_v47 = vld [vmem:[%s9810_s15 + $0x684] ss:$16 sps:$4 sm:$0xff]  }
 0x30c   : > { %v1956_v62 = vadd.f32 %v1955_v55, %v1902_v54  ;;  %v1904_v63 = vpop.f32.mrf.mxu0  ;;  %v1971_v61 = vmax.f32 %v1954_v50, 0.0  ;;  %v2061_v21 = vsel %vm2049_vm0, %v2036_v14, %v2040_v8  ;;  %v2043_v33 = vrot.slane %v1970_v3, 7  ;;  %v8583_v54 = vld [vmem:[%s9810_s15 + $0x664] ss:$16 sps:$4 sm:$0xff]   ;;  %v8586_v55 = vld [vmem:[%s9810_s15 + $0x6c] ss:$16 sps:$4 sm:$0xff]  }
 0x30d   : > { %3767 = vmatpush2.bf16.msra.mxu0 %v8542_v45  ;;  %v1957_v0 = vpop.f32.mrf.mxu1  ;;  %v8572_v45 = vld [vmem:[%s9810_s15 + $0xa8] ss:$16 sps:$4 sm:$0xff]   ;;  %v10225_v50 = vpack.c.bf16 %v1967_v58, %v1963_v2  ;;  %v8581_v58 = vld [vmem:[%s9810_s15 + $0x660] ss:$16 sps:$4 sm:$0xff]   ;;  %v8595_v2 = vld [vmem:[%s9810_s15 + $0x624] ss:$16 sps:$4 sm:$0xff]  }
 0x30e   : > { %v1974_v7 = vmax.f32 %v1956_v62, 0.0  ;;  %v1958_v53 = vadd.f32 %v1957_v0, %v1904_v63  ;;  %3768 = vmatprep.subr.bf16.mxu0 %v8550_v48  ;;  %v2044_v19 = vrot.slane %v1971_v61, 7  ;;  %v2056_v42 = vsel %vm2049_vm0, %v2039_v11, %v2043_v33  ;;  %v8580_v48 = vld [vmem:[%s9810_s15 + $0x8c] ss:$16 sps:$4 sm:$0xff]   ;;  %v8589_v62 = vld [vmem:[%s9810_s15 + $0x644] ss:$16 sps:$4 sm:$0xff]  }
 0x30f   : > { %v8592_v63 = vld [vmem:[%s9810_s15 + $0x4c] ss:$16 sps:$4 sm:$0xff]   ;;  %v8587_v0 = vld [vmem:[%s9810_s15 + $0x640] ss:$16 sps:$4 sm:$0xff]  }
 0x310   : > { %v2047_v9 = vrot.slane %v1974_v7, 7  ;;  %v10170_v4 = vpack.c.bf16 %v1974_v7, %v1970_v3  ;;  %v1975_v5 = vmax.f32 %v1958_v53, 0.0  ;;  %v2057_v29 = vsel %vm2049_vm0, %v2040_v8, %v2044_v19  ;;  %v8598_v3 = vld [vmem:[%s9810_s15 + $0x2c] ss:$16 sps:$4 sm:$0xff]   ;;  %v8593_v7 = vld [vmem:[%s9810_s15 + $0x620] ss:$16 sps:$4 sm:$0xff]  }
 0x311   : > { %3769 = vmatpush2.bf16.msra.mxu0 %v8548_v1  ;;  %v8590_v1 = vld [vmem:[%s9810_s15 + $0x48] ss:$16 sps:$4 sm:$0xff]   ;;  %v8599_v8 = vld [vmem:[%s9810_s15 + $0x600] ss:$16 sps:$4 sm:$0xff]  }
 0x312   : > { %v2048_v15 = vrot.slane %v1975_v5, 7  ;;  %v10173_v17 = vpack.c.bf16 %v1975_v5, %v1971_v61  ;;  %3770 = vmatprep.subr.bf16.mxu0 %v8556_v60  ;;  %v2064_v20 = vsel %vm2049_vm0, %v2047_v9, %v2035_v10  ;;  %v2052_v38 = vsel %vm2049_vm0, %v2043_v33, %v2047_v9  ;;  %v8596_v53 = vld [vmem:[%s9810_s15 + $0x28] ss:$16 sps:$4 sm:$0xff]   ;;  %v8601_v60 = vld [vmem:[%s9810_s15 + $0x604] ss:$16 sps:$4 sm:$0xff]  }
 0x313   : > { %v10189_v27 = vpack.c.bf16 %v2060_v23, %v2064_v20  ;;  %v10219_v46 = vpack.c.bf16 %v2052_v38, %v2056_v42  ;;  %v8604_v61 = vld [vmem:[%s9810_s15 + $0xc] ss:$16 sps:$4 sm:$0xff]   ;;  %v8602_v9 = vld [vmem:[%s9810_s15 + $0x8] ss:$16 sps:$4 sm:$0xff]   ;;  %v8607_v5 = vld [vmem:[%s9810_s15 + $0x7e4] ss:$16 sps:$4 sm:$0xff]  }
 0x314   : > { %v2065_v22 = vsel %vm2049_vm0, %v2048_v15, %v2036_v14  ;;  %v2053_v24 = vsel %vm2049_vm0, %v2044_v19, %v2048_v15  ;;  %v8610_v10 = vld [vmem:[%s9810_s15 + $0x1ec] ss:$16 sps:$4 sm:$0xff]   ;;  %v8605_v11 = vld [vmem:[%s9810_s15 + $0x7e0] ss:$16 sps:$4 sm:$0xff]   ;;  %v8613_v14 = vld [vmem:[%s9810_s15 + $0x7c4] ss:$16 sps:$4 sm:$0xff]  }
 0x315   : > { %3771 = vmatpush2.bf16.msra.mxu0 %v8554_v12  ;;  %v10186_v25 = vpack.c.bf16 %v2061_v21, %v2065_v22  ;;  %v10203_v32 = vpack.c.bf16 %v2053_v24, %v2057_v29  ;;  %v8608_v12 = vld [vmem:[%s9810_s15 + $0x1e8] ss:$16 sps:$4 sm:$0xff]   ;;  %v8616_v15 = vld [vmem:[%s9810_s15 + $0x1cc] ss:$16 sps:$4 sm:$0xff]   ;;  %v8619_v20 = vld [vmem:[%s9810_s15 + $0x7a4] ss:$16 sps:$4 sm:$0xff]  }
 0x316   : > { %3846 = vmatprep.subr.bf16.mxu0 %v8562_v18  ;;  %v8611_v18 = vld [vmem:[%s9810_s15 + $0x7c0] ss:$16 sps:$4 sm:$0xff]   ;;  %v8614_v19 = vld [vmem:[%s9810_s15 + $0x1c8] ss:$16 sps:$4 sm:$0xff]   ;;  %v8622_v21 = vld [vmem:[%s9810_s15 + $0x1ac] ss:$16 sps:$4 sm:$0xff]  }
 0x317   : > { %7573 = vmatprep.mubr.msk.bf16.mxu1 %vm10091_vm4, %v10186_v25  ;;  %v8617_v22 = vld [vmem:[%s9810_s15 + $0x7a0] ss:$16 sps:$4 sm:$0xff]   ;;  %v8620_v23 = vld [vmem:[%s9810_s15 + $0x1a8] ss:$16 sps:$4 sm:$0xff]   ;;  %v8625_v24 = vld [vmem:[%s9810_s15 + $0x784] ss:$16 sps:$4 sm:$0xff]  }
 0x318   : > { %3773 = vmatmul.mubr.bf16.vlgmr.msra.gmra.mxu0 %v10066_v13  ;;  %7577 = vmatmul.mubr.msk.bf16.vlgmr.msra.gmra.mxu1 %vm10091_vm4, %v10189_v27  ;;  %v8626_v29 = vld [vmem:[%s9810_s15 + $0x188] ss:$16 sps:$4 sm:$0xff]   ;;  %v8629_v33 = vld [vmem:[%s9810_s15 + $0x760] ss:$16 sps:$4 sm:$0xff]   ;;  %v8643_v42 = vld [vmem:[%s9810_s15 + $0x724] ss:$16 sps:$4 sm:$0xff]  }
 0x319   : > { %3782 = vmatprep.mubr.bf16.mxu0 %v10081_v44  ;;  %3794 = vmatpush1.bf16.msra.mxu1 %v8557_v26  ;;  %v8628_v26 = vld [vmem:[%s9810_s15 + $0x18c] ss:$16 sps:$4 sm:$0xff]   ;;  %v8635_v38 = vld [vmem:[%s9810_s15 + $0x740] ss:$16 sps:$4 sm:$0xff]  }
 0x31a   : > { %3847 = vmatpush1.bf16.msra.mxu0 %v8560_v28  ;;  %7581 = vmatprep.mubr.msk.bf16.mxu1 %vm10104_vm5, %v10203_v32  ;;  %v8623_v28 = vld [vmem:[%s9810_s15 + $0x780] ss:$16 sps:$4 sm:$0xff]  }
 0x31b   : > { %3795 = vmatprep.subr.bf16.mxu1 %v8565_v30  ;;  %3848 = vmatprep.subr.bf16.mxu0 %v8568_v31  ;;  %v8631_v30 = vld [vmem:[%s9810_s15 + $0x764] ss:$16 sps:$4 sm:$0xff]   ;;  %v8634_v31 = vld [vmem:[%s9810_s15 + $0x16c] ss:$16 sps:$4 sm:$0xff]  }
 0x31d   : > { %3796 = vmatpush1.bf16.msra.mxu1 %v8563_v34  ;;  %v8632_v34 = vld [vmem:[%s9810_s15 + $0x168] ss:$16 sps:$4 sm:$0xff]  }
 0x31e   : > { %3849 = vmatpush1.bf16.msra.mxu0 %v8566_v35  ;;  %3797 = vmatprep.subr.bf16.mxu1 %v8571_v36  ;;  %v8637_v35 = vld [vmem:[%s9810_s15 + $0x744] ss:$16 sps:$4 sm:$0xff]   ;;  %v8640_v36 = vld [vmem:[%s9810_s15 + $0x14c] ss:$16 sps:$4 sm:$0xff]  }
 0x31f   : > { %3850 = vmatprep.subr.bf16.mxu0 %v8574_v39  ;;  %v8638_v39 = vld [vmem:[%s9810_s15 + $0x148] ss:$16 sps:$4 sm:$0xff]  }
 0x320   : > { %3783 = vmatmul.mubr.bf16.gmra.mxu0 %v10079_v37  ;;  %7585 = vmatmul.mubr.msk.bf16.gmra.mxu1 %vm10104_vm5, %v10219_v46 }
 0x321   : > { %3798 = vmatpush1.bf16.msra.mxu1 %v8569_v43  ;;  %7589 = vmatprep.mubr.msk.bf16.mxu0 %vm10091_vm4, %v10097_v51  ;;  %v8584_v51 = vld [vmem:[%s9810_s15 + $0x68] ss:$16 sps:$4 sm:$0xff]   ;;  %v8646_v43 = vld [vmem:[%s9810_s15 + $0x12c] ss:$16 sps:$4 sm:$0xff]  }
 0x322   : > { %3851 = vmatpush1.bf16.msra.mxu0 %v8572_v45  ;;  %3825 = vmatprep.mubr.bf16.mxu1 %v10225_v50  ;;  %v8641_v45 = vld [vmem:[%s9810_s15 + $0x720] ss:$16 sps:$4 sm:$0xff]  }
 0x323   : > { %3799 = vmatprep.subr.bf16.mxu1 %v8577_v47  ;;  %3852 = vmatprep.subr.bf16.mxu0 %v8580_v48  ;;  %v8644_v47 = vld [vmem:[%s9810_s15 + $0x128] ss:$16 sps:$4 sm:$0xff]   ;;  %v8649_v48 = vld [vmem:[%s9810_s15 + $0x704] ss:$16 sps:$4 sm:$0xff]  }
 0x325   : > { %3800 = vmatpush1.bf16.msra.mxu1 %v8575_v16  ;;  %v8652_v16 = vld [vmem:[%s9810_s15 + $0x10c] ss:$16 sps:$4 sm:$0xff]  }
 0x326   : > { %3853 = vmatpush1.bf16.msra.mxu0 %v8578_v41  ;;  %3801 = vmatprep.subr.bf16.mxu1 %v8583_v54  ;;  %v8647_v41 = vld [vmem:[%s9810_s15 + $0x700] ss:$16 sps:$4 sm:$0xff]   ;;  %v8650_v54 = vld [vmem:[%s9810_s15 + $0x108] ss:$16 sps:$4 sm:$0xff]  }
 0x327   : > { %3854 = vmatprep.subr.bf16.mxu0 %v8586_v55  ;;  %v8655_v55 = vld [vmem:[%s9810_s15 + $0x2ec] ss:$16 sps:$4 sm:$0xff]  }
 0x329   : > { %3802 = vmatpush1.bf16.msra.mxu1 %v8581_v58  ;;  %v8658_v58 = vld [vmem:[%s9810_s15 + $0x4ec] ss:$16 sps:$4 sm:$0xff]  }
 0x32a   : > { %3855 = vmatpush1.bf16.msra.mxu0 %v8584_v51  ;;  %3803 = vmatprep.subr.bf16.mxu1 %v8589_v62  ;;  %v8653_v51 = vld [vmem:[%s9810_s15 + $0x2e8] ss:$16 sps:$4 sm:$0xff]  }
 0x32b   : > { %3856 = vmatprep.subr.bf16.mxu0 %v8592_v63  ;;  %v8656_v62 = vld [vmem:[%s9810_s15 + $0x4e8] ss:$16 sps:$4 sm:$0xff]   ;;  %v8661_v63 = vld [vmem:[%s9810_s15 + $0x2cc] ss:$16 sps:$4 sm:$0xff]  }
 0x32d   : > { %3804 = vmatpush1.bf16.msra.mxu1 %v8587_v0  ;;  %v8664_v0 = vld [vmem:[%s9810_s15 + $0x4cc] ss:$16 sps:$4 sm:$0xff]  }
 0x32e   : > { %3857 = vmatpush1.bf16.msra.mxu0 %v8590_v1  ;;  %3805 = vmatprep.subr.bf16.mxu1 %v8595_v2  ;;  %v8659_v1 = vld [vmem:[%s9810_s15 + $0x2c8] ss:$16 sps:$4 sm:$0xff]  }
 0x32f   : > { %3858 = vmatprep.subr.bf16.mxu0 %v8598_v3  ;;  %v8662_v2 = vld [vmem:[%s9810_s15 + $0x4c8] ss:$16 sps:$4 sm:$0xff]   ;;  %v8667_v3 = vld [vmem:[%s9810_s15 + $0x2ac] ss:$16 sps:$4 sm:$0xff]  }
 0x331   : > { %3806 = vmatpush1.bf16.msra.mxu1 %v8593_v7  ;;  %v8670_v7 = vld [vmem:[%s9810_s15 + $0x4ac] ss:$16 sps:$4 sm:$0xff]  }
 0x332   : > { %3859 = vmatpush1.bf16.msra.mxu0 %v8596_v53  ;;  %3807 = vmatprep.subr.bf16.mxu1 %v8601_v60  ;;  %v8668_v53 = vld [vmem:[%s9810_s15 + $0x4a8] ss:$16 sps:$4 sm:$0xff]   ;;  %v8673_v60 = vld [vmem:[%s9810_s15 + $0x28c] ss:$16 sps:$4 sm:$0xff]  }
 0x333   : > { %3860 = vmatprep.subr.bf16.mxu0 %v8604_v61  ;;  %v8671_v61 = vld [vmem:[%s9810_s15 + $0x288] ss:$16 sps:$4 sm:$0xff]  }
 0x335   : > { %3808 = vmatpush1.bf16.msra.mxu1 %v8599_v8  ;;  %v8674_v8 = vld [vmem:[%s9810_s15 + $0x488] ss:$16 sps:$4 sm:$0xff]  }
 0x336   : > { %3861 = vmatpush1.bf16.msra.mxu0 %v8602_v9  ;;  %3809 = vmatprep.subr.bf16.mxu1 %v8607_v5  ;;  %v8679_v9 = vld [vmem:[%s9810_s15 + $0x26c] ss:$16 sps:$4 sm:$0xff]  }
 0x337   : > { %3862 = vmatprep.subr.bf16.mxu0 %v8610_v10  ;;  %v8682_v5 = vld [vmem:[%s9810_s15 + $0x46c] ss:$16 sps:$4 sm:$0xff]  }
 0x338   : > { %v8685_v10 = vld [vmem:[%s9810_s15 + $0x24c] ss:$16 sps:$4 sm:$0xff]  }
 0x339   : > { %3810 = vmatpush2.bf16.msra.mxu1 %v8605_v11  ;;  %v8683_v11 = vld [vmem:[%s9810_s15 + $0x248] ss:$16 sps:$4 sm:$0xff]  }
 0x33a   : > { %3863 = vmatpush2.bf16.msra.mxu0 %v8608_v12  ;;  %3811 = vmatprep.subr.bf16.mxu1 %v8613_v14  ;;  %v8686_v12 = vld [vmem:[%s9810_s15 + $0x448] ss:$16 sps:$4 sm:$0xff]   ;;  %v8691_v14 = vld [vmem:[%s9810_s15 + $0x22c] ss:$16 sps:$4 sm:$0xff]  }
 0x33b   : > { %3864 = vmatprep.subr.bf16.mxu0 %v8616_v15  ;;  %v8694_v15 = vld [vmem:[%s9810_s15 + $0x42c] ss:$16 sps:$4 sm:$0xff]  }
 0x33d   : > { %3812 = vmatpush2.bf16.msra.mxu1 %v8611_v18  ;;  %v8689_v18 = vld [vmem:[%s9810_s15 + $0x228] ss:$16 sps:$4 sm:$0xff]  }
 0x33e   : > { %3865 = vmatpush2.bf16.msra.mxu0 %v8614_v19  ;;  %3813 = vmatprep.subr.bf16.mxu1 %v8619_v20  ;;  %v8692_v19 = vld [vmem:[%s9810_s15 + $0x428] ss:$16 sps:$4 sm:$0xff]   ;;  %v8697_v20 = vld [vmem:[%s9810_s15 + $0x20c] ss:$16 sps:$4 sm:$0xff]  }
 0x33f   : > { %3866 = vmatprep.subr.bf16.mxu0 %v8622_v21  ;;  %v8700_v21 = vld [vmem:[%s9810_s15 + $0x40c] ss:$16 sps:$4 sm:$0xff]  }
 0x341   : > { %3814 = vmatpush2.bf16.msra.mxu1 %v8617_v22  ;;  %v8695_v22 = vld [vmem:[%s9810_s15 + $0x208] ss:$16 sps:$4 sm:$0xff]  }
 0x342   : > { %3867 = vmatpush2.bf16.msra.mxu0 %v8620_v23  ;;  %3815 = vmatprep.subr.bf16.mxu1 %v8625_v24  ;;  %v8698_v23 = vld [vmem:[%s9810_s15 + $0x408] ss:$16 sps:$4 sm:$0xff]   ;;  %v8703_v24 = vld [vmem:[%s9810_s15 + $0x3ec] ss:$16 sps:$4 sm:$0xff]  }
 0x343   : > { %3868 = vmatprep.subr.bf16.mxu0 %v8628_v26  ;;  %v8706_v26 = vld [vmem:[%s9810_s15 + $0x5ec] ss:$16 sps:$4 sm:$0xff]  }
 0x345   : > { %3816 = vmatpush2.bf16.msra.mxu1 %v8623_v28  ;;  %v8701_v28 = vld [vmem:[%s9810_s15 + $0x3e8] ss:$16 sps:$4 sm:$0xff]  }
 0x346   : > { %3869 = vmatpush2.bf16.msra.mxu0 %v8626_v29  ;;  %3817 = vmatprep.subr.bf16.mxu1 %v8631_v30  ;;  %v8704_v29 = vld [vmem:[%s9810_s15 + $0x5e8] ss:$16 sps:$4 sm:$0xff]   ;;  %v8709_v30 = vld [vmem:[%s9810_s15 + $0x3cc] ss:$16 sps:$4 sm:$0xff]  }
 0x347   : > { %3870 = vmatprep.subr.bf16.mxu0 %v8634_v31  ;;  %v8712_v31 = vld [vmem:[%s9810_s15 + $0x5cc] ss:$16 sps:$4 sm:$0xff]  }
 0x349   : > { %3818 = vmatpush2.bf16.msra.mxu1 %v8629_v33  ;;  %v8707_v33 = vld [vmem:[%s9810_s15 + $0x3c8] ss:$16 sps:$4 sm:$0xff]  }
 0x34a   : > { %3871 = vmatpush2.bf16.msra.mxu0 %v8632_v34  ;;  %3819 = vmatprep.subr.bf16.mxu1 %v8637_v35  ;;  %v8710_v34 = vld [vmem:[%s9810_s15 + $0x5c8] ss:$16 sps:$4 sm:$0xff]   ;;  %v8715_v35 = vld [vmem:[%s9810_s15 + $0x3ac] ss:$16 sps:$4 sm:$0xff]  }
 0x34b   : > { %3872 = vmatprep.subr.bf16.mxu0 %v8640_v36  ;;  %v8718_v36 = vld [vmem:[%s9810_s15 + $0x5ac] ss:$16 sps:$4 sm:$0xff]  }
 0x34d   : > { %3820 = vmatpush2.bf16.msra.mxu1 %v8635_v38  ;;  %v8713_v38 = vld [vmem:[%s9810_s15 + $0x3a8] ss:$16 sps:$4 sm:$0xff]  }
 0x34e   : > { %3873 = vmatpush2.bf16.msra.mxu0 %v8638_v39  ;;  %3821 = vmatprep.subr.bf16.mxu1 %v8643_v42  ;;  %v8716_v39 = vld [vmem:[%s9810_s15 + $0x5a8] ss:$16 sps:$4 sm:$0xff]   ;;  %v8721_v42 = vld [vmem:[%s9810_s15 + $0x38c] ss:$16 sps:$4 sm:$0xff]  }
 0x34f   : > { %3874 = vmatprep.subr.bf16.mxu0 %v8646_v43  ;;  %v8724_v43 = vld [vmem:[%s9810_s15 + $0x58c] ss:$16 sps:$4 sm:$0xff]  }
 0x351   : > { %3822 = vmatpush2.bf16.msra.mxu1 %v8641_v45  ;;  %v8719_v45 = vld [vmem:[%s9810_s15 + $0x388] ss:$16 sps:$4 sm:$0xff]  }
 0x352   : > { %3875 = vmatpush2.bf16.msra.mxu0 %v8644_v47  ;;  %3823 = vmatprep.subr.bf16.mxu1 %v8649_v48  ;;  %v8722_v47 = vld [vmem:[%s9810_s15 + $0x588] ss:$16 sps:$4 sm:$0xff]   ;;  %v8727_v48 = vld [vmem:[%s9810_s15 + $0x36c] ss:$16 sps:$4 sm:$0xff]  }
 0x353   : > { %3876 = vmatprep.subr.bf16.mxu0 %v8652_v16  ;;  %v8730_v16 = vld [vmem:[%s9810_s15 + $0x56c] ss:$16 sps:$4 sm:$0xff]  }
 0x355   : > { %3824 = vmatpush2.bf16.msra.mxu1 %v8647_v41  ;;  %v8725_v41 = vld [vmem:[%s9810_s15 + $0x368] ss:$16 sps:$4 sm:$0xff]  }
 0x356   : > { %3877 = vmatpush2.bf16.msra.mxu0 %v8650_v54  ;;  %3899 = vmatprep.subr.bf16.mxu1 %v8655_v55  ;;  %v8728_v54 = vld [vmem:[%s9810_s15 + $0x568] ss:$16 sps:$4 sm:$0xff]   ;;  %v8733_v55 = vld [vmem:[%s9810_s15 + $0x34c] ss:$16 sps:$4 sm:$0xff]  }
 0x357   : > { %3952 = vmatprep.subr.bf16.mxu0 %v8658_v58  ;;  %v8736_v58 = vld [vmem:[%s9810_s15 + $0x54c] ss:$16 sps:$4 sm:$0xff]  }
 0x358   : > { %3826 = vmatmul.mubr.bf16.vlgmr.msra.gmra.mxu1 %v10156_v40 }
 0x359   : > { %7593 = vmatmul.mubr.msk.bf16.vlgmr.msra.gmra.mxu0 %vm10091_vm4, %v10102_v56  ;;  %3835 = vmatprep.mubr.bf16.mxu1 %v10173_v17  ;;  %v8665_v56 = vld [vmem:[%s9810_s15 + $0x2a8] ss:$16 sps:$4 sm:$0xff]  }
 0x35a   : > { %7597 = vmatprep.mubr.msk.bf16.mxu0 %vm10104_vm5, %v10112_v59  ;;  %3900 = vmatpush1.bf16.msra.mxu1 %v8653_v51  ;;  %v8676_v59 = vld [vmem:[%s9810_s15 + $0x48c] ss:$16 sps:$4 sm:$0xff]   ;;  %v8731_v51 = vld [vmem:[%s9810_s15 + $0x348] ss:$16 sps:$4 sm:$0xff]  }
 0x35b   : > { %3953 = vmatpush1.bf16.msra.mxu0 %v8656_v62  ;;  %3901 = vmatprep.subr.bf16.mxu1 %v8661_v63  ;;  %v8734_v62 = vld [vmem:[%s9810_s15 + $0x548] ss:$16 sps:$4 sm:$0xff]   ;;  %v8739_v63 = vld [vmem:[%s9810_s15 + $0x32c] ss:$16 sps:$4 sm:$0xff]  }
 0x35c   : > { %3954 = vmatprep.subr.bf16.mxu0 %v8664_v0  ;;  %v8742_v0 = vld [vmem:[%s9810_s15 + $0x52c] ss:$16 sps:$4 sm:$0xff]  }
 0x35e   : > { %3902 = vmatpush1.bf16.msra.mxu1 %v8659_v1  ;;  %v8737_v1 = vld [vmem:[%s9810_s15 + $0x328] ss:$16 sps:$4 sm:$0xff]  }
 0x35f   : > { %3955 = vmatpush1.bf16.msra.mxu0 %v8662_v2  ;;  %3903 = vmatprep.subr.bf16.mxu1 %v8667_v3  ;;  %v8740_v2 = vld [vmem:[%s9810_s15 + $0x528] ss:$16 sps:$4 sm:$0xff]   ;;  %v8745_v3 = vld [vmem:[%s9810_s15 + $0x30c] ss:$16 sps:$4 sm:$0xff]  }
 0x360   : > { %3836 = vmatmul.mubr.bf16.gmra.mxu1 %v10170_v4  ;;  %3956 = vmatprep.subr.bf16.mxu0 %v8670_v7  ;;  %v8748_v7 = vld [vmem:[%s9810_s15 + $0x50c] ss:$16 sps:$4 sm:$0xff]  }
 0x361   : > { %7601 = vmatmul.mubr.msk.bf16.gmra.mxu0 %vm10104_vm5, %v10127_v6  ;;  %7605 = vmatprep.mubr.msk.bf16.mxu1 %vm10091_vm4, %v10186_v25  ;;  %v8677_v6 = vld [vmem:[%s9810_s15 + $0x268] ss:$16 sps:$4 sm:$0xff]  }
 0x362   : > { %3904 = vmatpush1.bf16.msra.mxu1 %v8665_v56  ;;  %3984 = vmatprep.mubr.bf16.mxu0 %v10130_v52  ;;  %v8680_v25 = vld [vmem:[%s9810_s15 + $0x468] ss:$16 sps:$4 sm:$0xff]   ;;  %v8688_v52 = vld [vmem:[%s9810_s15 + $0x44c] ss:$16 sps:$4 sm:$0xff]  }
 0x363   : > { %3957 = vmatpush1.bf16.msra.mxu0 %v8668_v53  ;;  %3905 = vmatprep.subr.bf16.mxu1 %v8673_v60  ;;  %v8743_v56 = vld [vmem:[%s9810_s15 + $0x308] ss:$16 sps:$4 sm:$0xff]   ;;  %v8751_v60 = vld [vmem:[%s9810_s15 + $0x6ec] ss:$16 sps:$4 sm:$0xff]  }
 0x364   : > { %3958 = vmatprep.subr.bf16.mxu0 %v8676_v59  ;;  %v8746_v53 = vld [vmem:[%s9810_s15 + $0x508] ss:$16 sps:$4 sm:$0xff]   ;;  %v8799_v59 = vld [vmem:[%s9812_s20 + $0xe4] ss:$16 sps:$4 sm:$0xff]  }
 0x366   : > { %3906 = vmatpush1.bf16.msra.mxu1 %v8671_v61  ;;  %v8749_v61 = vld [vmem:[%s9810_s15 + $0x6e8] ss:$16 sps:$4 sm:$0xff]  }
 0x367   : > { %3959 = vmatpush1.bf16.msra.mxu0 %v8674_v8  ;;  %3907 = vmatprep.subr.bf16.mxu1 %v8679_v9  ;;  %v8754_v8 = vld [vmem:[%s9810_s15 + $0x6cc] ss:$16 sps:$4 sm:$0xff]   ;;  %v8797_v9 = vld [vmem:[%s9812_s20 + $0xe0] ss:$16 sps:$4 sm:$0xff]  }
 0x368   : > { %3960 = vmatprep.subr.bf16.mxu0 %v8682_v5  ;;  %v8802_v5 = vld [vmem:[%s9812_s20 + $0xc4] ss:$16 sps:$4 sm:$0xff]  }
 0x36a   : > { %3908 = vmatpush1.bf16.msra.mxu1 %v8677_v6  ;;  %v8752_v6 = vld [vmem:[%s9810_s15 + $0x6c8] ss:$16 sps:$4 sm:$0xff]  }
 0x36b   : > { %3961 = vmatpush1.bf16.msra.mxu0 %v8680_v25  ;;  %3909 = vmatprep.subr.bf16.mxu1 %v8685_v10  ;;  %v8757_v25 = vld [vmem:[%s9810_s15 + $0x6ac] ss:$16 sps:$4 sm:$0xff]  }
 0x36c   : > { %3962 = vmatprep.subr.bf16.mxu0 %v8688_v52  ;;  %v8760_v10 = vld [vmem:[%s9810_s15 + $0x68c] ss:$16 sps:$4 sm:$0xff]   ;;  %v8758_v52 = vld [vmem:[%s9810_s15 + $0x688] ss:$16 sps:$4 sm:$0xff]  }
 0x36e   : > { %3910 = vmatpush1.bf16.msra.mxu1 %v8683_v11  ;;  %v8763_v11 = vld [vmem:[%s9810_s15 + $0x66c] ss:$16 sps:$4 sm:$0xff]  }
 0x36f   : > { %3963 = vmatpush1.bf16.msra.mxu0 %v8686_v12  ;;  %3911 = vmatprep.subr.bf16.mxu1 %v8691_v14  ;;  %v8806_v12 = vld [vmem:[%s9812_s20 + $0x80] ss:$16 sps:$4 sm:$0xff]   ;;  %v8814_v14 = vld [vmem:[%s9812_s20 + $0x44] ss:$16 sps:$4 sm:$0xff]  }
 0x370   : > { %3964 = vmatprep.subr.bf16.mxu0 %v8694_v15  ;;  %v8764_v15 = vld [vmem:[%s9810_s15 + $0x648] ss:$16 sps:$4 sm:$0xff]  }
 0x372   : > { %3912 = vmatpush1.bf16.msra.mxu1 %v8689_v18  ;;  %v8769_v18 = vld [vmem:[%s9810_s15 + $0x62c] ss:$16 sps:$4 sm:$0xff]  }
 0x373   : > { %3965 = vmatpush1.bf16.msra.mxu0 %v8692_v19  ;;  %3913 = vmatprep.subr.bf16.mxu1 %v8697_v20  ;;  %v8812_v19 = vld [vmem:[%s9812_s20 + $0x40] ss:$16 sps:$4 sm:$0xff]   ;;  %v8817_v20 = vld [vmem:[%s9812_s20 + $0x24] ss:$16 sps:$4 sm:$0xff]  }
 0x374   : > { %3966 = vmatprep.subr.bf16.mxu0 %v8700_v21  ;;  %v8767_v21 = vld [vmem:[%s9810_s15 + $0x628] ss:$16 sps:$4 sm:$0xff]  }
 0x376   : > { %3914 = vmatpush1.bf16.msra.mxu1 %v8695_v22  ;;  %v8772_v22 = vld [vmem:[%s9810_s15 + $0x60c] ss:$16 sps:$4 sm:$0xff]  }
 0x377   : > { %3967 = vmatpush1.bf16.msra.mxu0 %v8698_v23  ;;  %3915 = vmatprep.subr.bf16.mxu1 %v8703_v24  ;;  %v8815_v23 = vld [vmem:[%s9812_s20 + $0x20] ss:$16 sps:$4 sm:$0xff]   ;;  %v8820_v24 = vld [vmem:[%s9812_s20 + $0x4] ss:$16 sps:$4 sm:$0xff]  }
 0x378   : > { %3968 = vmatprep.subr.bf16.mxu0 %v8706_v26  ;;  %v8770_v26 = vld [vmem:[%s9810_s15 + $0x608] ss:$16 sps:$4 sm:$0xff]  }
 0x37a   : > { %3916 = vmatpush2.bf16.msra.mxu1 %v8701_v28  ;;  %v8775_v28 = vld [vmem:[%s9810_s15 + $0x7ec] ss:$16 sps:$4 sm:$0xff]  }
 0x37b   : > { %3969 = vmatpush2.bf16.msra.mxu0 %v8704_v29  ;;  %3917 = vmatprep.subr.bf16.mxu1 %v8709_v30  ;;  %v8818_v29 = vld [vmem:[%s9812_s20] ss:$16 sps:$4 sm:$0xff]   ;;  %v8823_v30 = vld [vmem:[%s9812_s20 + $0x1e4] ss:$16 sps:$4 sm:$0xff]  }
 0x37c   : > { %3970 = vmatprep.subr.bf16.mxu0 %v8712_v31  ;;  %v8773_v31 = vld [vmem:[%s9810_s15 + $0x7e8] ss:$16 sps:$4 sm:$0xff]  }
 0x37e   : > { %3918 = vmatpush2.bf16.msra.mxu1 %v8707_v33  ;;  %v8778_v33 = vld [vmem:[%s9810_s15 + $0x7cc] ss:$16 sps:$4 sm:$0xff]  }
 0x37f   : > { %3971 = vmatpush2.bf16.msra.mxu0 %v8710_v34  ;;  %3919 = vmatprep.subr.bf16.mxu1 %v8715_v35  ;;  %v8821_v34 = vld [vmem:[%s9812_s20 + $0x1e0] ss:$16 sps:$4 sm:$0xff]   ;;  %v8826_v35 = vld [vmem:[%s9812_s20 + $0x1c4] ss:$16 sps:$4 sm:$0xff]  }
 0x380   : > { %3972 = vmatprep.subr.bf16.mxu0 %v8718_v36  ;;  %v8776_v36 = vld [vmem:[%s9810_s15 + $0x7c8] ss:$16 sps:$4 sm:$0xff]  }
 0x382   : > { %3920 = vmatpush2.bf16.msra.mxu1 %v8713_v38  ;;  %v8781_v38 = vld [vmem:[%s9810_s15 + $0x7ac] ss:$16 sps:$4 sm:$0xff]  }
 0x383   : > { %3973 = vmatpush2.bf16.msra.mxu0 %v8716_v39  ;;  %3921 = vmatprep.subr.bf16.mxu1 %v8721_v42  ;;  %v8824_v39 = vld [vmem:[%s9812_s20 + $0x1c0] ss:$16 sps:$4 sm:$0xff]   ;;  %v8829_v42 = vld [vmem:[%s9812_s20 + $0x1a4] ss:$16 sps:$4 sm:$0xff]  }
 0x384   : > { %3974 = vmatprep.subr.bf16.mxu0 %v8724_v43  ;;  %v8779_v43 = vld [vmem:[%s9810_s15 + $0x7a8] ss:$16 sps:$4 sm:$0xff]  }
 0x386   : > { %3922 = vmatpush2.bf16.msra.mxu1 %v8719_v45  ;;  %v8784_v45 = vld [vmem:[%s9810_s15 + $0x78c] ss:$16 sps:$4 sm:$0xff]  }
 0x387   : > { %3975 = vmatpush2.bf16.msra.mxu0 %v8722_v47  ;;  %3923 = vmatprep.subr.bf16.mxu1 %v8727_v48  ;;  %v8827_v47 = vld [vmem:[%s9812_s20 + $0x1a0] ss:$16 sps:$4 sm:$0xff]   ;;  %v8832_v48 = vld [vmem:[%s9812_s20 + $0x184] ss:$16 sps:$4 sm:$0xff]  }
 0x388   : > { %3976 = vmatprep.subr.bf16.mxu0 %v8730_v16  ;;  %v8782_v16 = vld [vmem:[%s9810_s15 + $0x788] ss:$16 sps:$4 sm:$0xff]  }
 0x38a   : > { %3924 = vmatpush2.bf16.msra.mxu1 %v8725_v41  ;;  %v8787_v41 = vld [vmem:[%s9810_s15 + $0x76c] ss:$16 sps:$4 sm:$0xff]  }
 0x38b   : > { %3977 = vmatpush2.bf16.msra.mxu0 %v8728_v54  ;;  %3925 = vmatprep.subr.bf16.mxu1 %v8733_v55  ;;  %v8830_v54 = vld [vmem:[%s9812_s20 + $0x180] ss:$16 sps:$4 sm:$0xff]   ;;  %v8835_v55 = vld [vmem:[%s9812_s20 + $0x164] ss:$16 sps:$4 sm:$0xff]  }
 0x38c   : > { %3978 = vmatprep.subr.bf16.mxu0 %v8736_v58  ;;  %v8785_v58 = vld [vmem:[%s9810_s15 + $0x768] ss:$16 sps:$4 sm:$0xff]  }
 0x38e   : > { %3926 = vmatpush2.bf16.msra.mxu1 %v8731_v51  ;;  %v8790_v51 = vld [vmem:[%s9810_s15 + $0x74c] ss:$16 sps:$4 sm:$0xff]  }
 0x38f   : > { %3979 = vmatpush2.bf16.msra.mxu0 %v8734_v62  ;;  %3927 = vmatprep.subr.bf16.mxu1 %v8739_v63  ;;  %v8833_v62 = vld [vmem:[%s9812_s20 + $0x160] ss:$16 sps:$4 sm:$0xff]   ;;  %v8838_v63 = vld [vmem:[%s9812_s20 + $0x144] ss:$16 sps:$4 sm:$0xff]  }
 0x390   : > { %3980 = vmatprep.subr.bf16.mxu0 %v8742_v0  ;;  %v8788_v0 = vld [vmem:[%s9810_s15 + $0x748] ss:$16 sps:$4 sm:$0xff]  }
 0x392   : > { %3928 = vmatpush2.bf16.msra.mxu1 %v8737_v1  ;;  %v8793_v1 = vld [vmem:[%s9810_s15 + $0x72c] ss:$16 sps:$4 sm:$0xff]  }
 0x393   : > { %3981 = vmatpush2.bf16.msra.mxu0 %v8740_v2  ;;  %3929 = vmatprep.subr.bf16.mxu1 %v8745_v3  ;;  %v8836_v2 = vld [vmem:[%s9812_s20 + $0x140] ss:$16 sps:$4 sm:$0xff]   ;;  %v8841_v3 = vld [vmem:[%s9812_s20 + $0x124] ss:$16 sps:$4 sm:$0xff]  }
 0x394   : > { %3982 = vmatprep.subr.bf16.mxu0 %v8748_v7  ;;  %v8791_v7 = vld [vmem:[%s9810_s15 + $0x728] ss:$16 sps:$4 sm:$0xff]  }
 0x396   : > { %3930 = vmatpush2.bf16.msra.mxu1 %v8743_v56  ;;  %v8796_v56 = vld [vmem:[%s9810_s15 + $0x70c] ss:$16 sps:$4 sm:$0xff]  }
 0x397   : > { %3983 = vmatpush2.bf16.msra.mxu0 %v8746_v53  ;;  %4005 = vmatprep.subr.bf16.mxu1 %v8751_v60  ;;  %v8839_v53 = vld [vmem:[%s9812_s20 + $0x120] ss:$16 sps:$4 sm:$0xff]   ;;  %v8844_v60 = vld [vmem:[%s9812_s20 + $0x104] ss:$16 sps:$4 sm:$0xff]  }
 0x398   : > { %4850 = vmatprep.subr.bf16.mxu0 %v8799_v59  ;;  %v8794_v59 = vld [vmem:[%s9810_s15 + $0x708] ss:$16 sps:$4 sm:$0xff]  }
 0x399   : > { %7609 = vmatmul.mubr.msk.bf16.vlgmr.msra.gmra.mxu1 %vm10091_vm4, %v10189_v27  ;;  %v8805_v27 = vld [vmem:[%s9812_s20 + $0xa4] ss:$16 sps:$4 sm:$0xff]  }
 0x39a   : > { %3985 = vmatmul.mubr.bf16.vlgmr.msra.gmra.mxu0 %v10066_v13  ;;  %7613 = vmatprep.mubr.msk.bf16.mxu1 %vm10104_vm5, %v10203_v32  ;;  %v8755_v13 = vld [vmem:[%s9810_s15 + $0x6a8] ss:$16 sps:$4 sm:$0xff]   ;;  %v8808_v32 = vld [vmem:[%s9812_s20 + $0x84] ss:$16 sps:$4 sm:$0xff]  }
 0x39b   : > { %3994 = vmatprep.mubr.bf16.mxu0 %v10081_v44  ;;  %4006 = vmatpush1.bf16.msra.mxu1 %v8749_v61  ;;  %v8803_v44 = vld [vmem:[%s9812_s20 + $0xa0] ss:$16 sps:$4 sm:$0xff]  }
 0x39c   : > { %4007 = vmatprep.subr.bf16.mxu1 %v8754_v8  ;;  %4851 = vmatpush1.bf16.msra.mxu0 %v8797_v9  ;;  %v8842_v61 = vld [vmem:[%s9812_s20 + $0x100] ss:$16 sps:$4 sm:$0xff]   ;;  %v8847_v8 = vld [vmem:[%s9812_s20 + $0xec] ss:$16 sps:$4 sm:$0xff]   ;;  %v8895_v9 = vld [vmem:[%s9812_s20 + $0x2e4] ss:$16 sps:$4 sm:$0xff]  }
 0x39d   : > { %4852 = vmatprep.subr.bf16.mxu0 %v8802_v5  ;;  %v8893_v5 = vld [vmem:[%s9812_s20 + $0x2e0] ss:$16 sps:$4 sm:$0xff]  }
 0x39f   : > { %4008 = vmatpush1.bf16.msra.mxu1 %v8752_v6  ;;  %v8898_v6 = vld [vmem:[%s9812_s20 + $0x2c4] ss:$16 sps:$4 sm:$0xff]  }
 0x3a0   : > { %4009 = vmatprep.subr.bf16.mxu1 %v8757_v25  ;;  %4853 = vmatpush1.bf16.msra.mxu0 %v8800_v49  ;;  %v10449_v25 = vpop.f32.mrf.mxu0  ;;  %v8896_v49 = vld [vmem:[%s9812_s20 + $0x2c0] ss:$16 sps:$4 sm:$0xff]  }
 0x3a1   : > { %7617 = vmatmul.mubr.msk.bf16.gmra.mxu1 %vm10104_vm5, %v10219_v46  ;;  %4854 = vmatprep.subr.bf16.mxu0 %v8805_v27  ;;  %v8761_v46 = vld [vmem:[%s9810_s15 + $0x668] ss:$16 sps:$4 sm:$0xff]   ;;  %v8901_v27 = vld [vmem:[%s9812_s20 + $0x2a4] ss:$16 sps:$4 sm:$0xff]  }
 0x3a2   : > { %3995 = vmatmul.mubr.bf16.gmra.mxu0 %v10079_v37  ;;  %4037 = vmatprep.mubr.bf16.mxu1 %v10225_v50  ;;  %v8766_v37 = vld [vmem:[%s9810_s15 + $0x64c] ss:$16 sps:$4 sm:$0xff]   ;;  %v8809_v50 = vld [vmem:[%s9812_s20 + $0x60] ss:$16 sps:$4 sm:$0xff]  }
 0x3a3   : > { %4010 = vmatpush1.bf16.msra.mxu1 %v8755_v13  ;;  %v8902_v13 = vld [vmem:[%s9812_s20 + $0x280] ss:$16 sps:$4 sm:$0xff]  }
 0x3a4   : > { %4011 = vmatprep.subr.bf16.mxu1 %v8760_v10  ;;  %4855 = vmatpush1.bf16.msra.mxu0 %v8803_v44  ;;  %v8907_v10 = vld [vmem:[%s9812_s20 + $0x264] ss:$16 sps:$4 sm:$0xff]  }
 0x3a5   : > { %4856 = vmatprep.subr.bf16.mxu0 %v8808_v32  ;;  %v8905_v32 = vld [vmem:[%s9812_s20 + $0x260] ss:$16 sps:$4 sm:$0xff]  }
 0x3a7   : > { %4012 = vmatpush1.bf16.msra.mxu1 %v8758_v52  ;;  %v8910_v52 = vld [vmem:[%s9812_s20 + $0x244] ss:$16 sps:$4 sm:$0xff]  }
 0x3a8   : > { %4013 = vmatprep.subr.bf16.mxu1 %v8763_v11  ;;  %4857 = vmatpush1.bf16.msra.mxu0 %v8806_v12  ;;  %v8908_v12 = vld [vmem:[%s9812_s20 + $0x240] ss:$16 sps:$4 sm:$0xff]  }
 0x3a9   : > { %4858 = vmatprep.subr.bf16.mxu0 %v8811_v57  ;;  %v8913_v57 = vld [vmem:[%s9812_s20 + $0x224] ss:$16 sps:$4 sm:$0xff]  }
 0x3ab   : > { %4014 = vmatpush1.bf16.msra.mxu1 %v8761_v46 }
 0x3ac   : > { %4015 = vmatprep.subr.bf16.mxu1 %v8766_v37  ;;  %4859 = vmatpush1.bf16.msra.mxu0 %v8809_v50  ;;  %v8911_v50 = vld [vmem:[%s9812_s20 + $0x220] ss:$16 sps:$4 sm:$0xff]  }
 0x3ad   : > { %4860 = vmatprep.subr.bf16.mxu0 %v8814_v14  ;;  %v8916_v14 = vld [vmem:[%s9812_s20 + $0x204] ss:$16 sps:$4 sm:$0xff]  }
 0x3af   : > { %4016 = vmatpush1.bf16.msra.mxu1 %v8764_v15 }
 0x3b0   : > { %4017 = vmatprep.subr.bf16.mxu1 %v8769_v18  ;;  %4861 = vmatpush1.bf16.msra.mxu0 %v8812_v19  ;;  %v8914_v19 = vld [vmem:[%s9812_s20 + $0x200] ss:$16 sps:$4 sm:$0xff]  }
 0x3b1   : > { %4862 = vmatprep.subr.bf16.mxu0 %v8817_v20  ;;  %v8919_v20 = vld [vmem:[%s9812_s20 + $0x3e4] ss:$16 sps:$4 sm:$0xff]  }
 0x3b3   : > { %4018 = vmatpush1.bf16.msra.mxu1 %v8767_v21 }
 0x3b4   : > { %4019 = vmatprep.subr.bf16.mxu1 %v8772_v22  ;;  %4863 = vmatpush1.bf16.msra.mxu0 %v8815_v23  ;;  %v8917_v23 = vld [vmem:[%s9812_s20 + $0x3e0] ss:$16 sps:$4 sm:$0xff]  }
 0x3b5   : > { %4864 = vmatprep.subr.bf16.mxu0 %v8820_v24  ;;  %v8922_v24 = vld [vmem:[%s9812_s20 + $0x3c4] ss:$16 sps:$4 sm:$0xff]  }
 0x3b7   : > { %4020 = vmatpush1.bf16.msra.mxu1 %v8770_v26 }
 0x3b8   : > { %4021 = vmatprep.subr.bf16.mxu1 %v8775_v28  ;;  %4865 = vmatpush1.bf16.msra.mxu0 %v8818_v29 }
 0x3b9   : > { %4866 = vmatprep.subr.bf16.mxu0 %v8823_v30  ;;  %v8920_v30 = vld [vmem:[%s9812_s20 + $0x3c0] ss:$16 sps:$4 sm:$0xff]  }
 0x3bb   : > { %4022 = vmatpush2.bf16.msra.mxu1 %v8773_v31  ;;  %v8925_v31 = vld [vmem:[%s9812_s20 + $0x3a4] ss:$16 sps:$4 sm:$0xff]  }
 0x3bc   : > { %4023 = vmatprep.subr.bf16.mxu1 %v8778_v33  ;;  %4867 = vmatpush2.bf16.msra.mxu0 %v8821_v34 }
 0x3bd   : > { %4868 = vmatprep.subr.bf16.mxu0 %v8826_v35  ;;  %v8923_v35 = vld [vmem:[%s9812_s20 + $0x3a0] ss:$16 sps:$4 sm:$0xff]  }
 0x3bf   : > { %4024 = vmatpush2.bf16.msra.mxu1 %v8776_v36  ;;  %v8928_v36 = vld [vmem:[%s9812_s20 + $0x384] ss:$16 sps:$4 sm:$0xff]  }
 0x3c0   : > { %4025 = vmatprep.subr.bf16.mxu1 %v8781_v38  ;;  %4869 = vmatpush2.bf16.msra.mxu0 %v8824_v39 }
 0x3c1   : > { %4870 = vmatprep.subr.bf16.mxu0 %v8829_v42  ;;  %v8926_v42 = vld [vmem:[%s9812_s20 + $0x380] ss:$16 sps:$4 sm:$0xff]  }
 0x3c3   : > { %4026 = vmatpush2.bf16.msra.mxu1 %v8779_v43  ;;  %v8931_v43 = vld [vmem:[%s9812_s20 + $0x364] ss:$16 sps:$4 sm:$0xff]  }
 0x3c4   : > { %4027 = vmatprep.subr.bf16.mxu1 %v8784_v45  ;;  %4871 = vmatpush2.bf16.msra.mxu0 %v8827_v47 }
 0x3c5   : > { %4872 = vmatprep.subr.bf16.mxu0 %v8832_v48  ;;  %v8929_v48 = vld [vmem:[%s9812_s20 + $0x360] ss:$16 sps:$4 sm:$0xff]  }
 0x3c7   : > { %4028 = vmatpush2.bf16.msra.mxu1 %v8782_v16 }
 0x3c8   : > { %4029 = vmatprep.subr.bf16.mxu1 %v8787_v41  ;;  %4873 = vmatpush2.bf16.msra.mxu0 %v8830_v54 }
 0x3c9   : > { %4874 = vmatprep.subr.bf16.mxu0 %v8835_v55 }
 0x3cb   : > { %4030 = vmatpush2.bf16.msra.mxu1 %v8785_v58 }
 0x3cc   : > { %4031 = vmatprep.subr.bf16.mxu1 %v8790_v51  ;;  %4875 = vmatpush2.bf16.msra.mxu0 %v8833_v62 }
 0x3cd   : > { %4876 = vmatprep.subr.bf16.mxu0 %v8838_v63  ;;  %v8934_v63 = vld [vmem:[%s9812_s20 + $0x344] ss:$16 sps:$4 sm:$0xff]  }
 0x3cf   : > { %4032 = vmatpush2.bf16.msra.mxu1 %v8788_v0 }
 0x3d0   : > { %4033 = vmatprep.subr.bf16.mxu1 %v8793_v1  ;;  %4877 = vmatpush2.bf16.msra.mxu0 %v8836_v2  ;;  %v8932_v1 = vld [vmem:[%s9812_s20 + $0x340] ss:$16 sps:$4 sm:$0xff]  }
 0x3d1   : > { %4878 = vmatprep.subr.bf16.mxu0 %v8841_v3 }
 0x3d3   : > { %4034 = vmatpush2.bf16.msra.mxu1 %v8791_v7 }
 0x3d4   : > { %4035 = vmatprep.subr.bf16.mxu1 %v8796_v56  ;;  %4879 = vmatpush2.bf16.msra.mxu0 %v8839_v53 }
 0x3d5   : > { %4880 = vmatprep.subr.bf16.mxu0 %v8844_v60 }
 0x3d7   : > { %4036 = vmatpush2.bf16.msra.mxu1 %v8794_v59 }
 0x3d8   : > { %4881 = vmatpush2.bf16.msra.mxu0 %v8842_v61  ;;  %4903 = vmatprep.subr.bf16.mxu1 %v8895_v9  ;;  %v3721_v37 = vpop.f32.mrf.mxu1 }
 0x3d9   : > { %4956 = vmatprep.subr.bf16.mxu0 %v8847_v8  ;;  %v3722_v55 = vadd.f32 %v3721_v37, %v10449_v25  ;;  %v8937_v8 = vld [vmem:[%s9812_s20 + $0x324] ss:$16 sps:$4 sm:$0xff]  }
 0x3da   : > { %4038 = vmatmul.mubr.bf16.vlgmr.msra.gmra.mxu1 %v10156_v40  ;;  %v8899_v40 = vld [vmem:[%s9812_s20 + $0x2a0] ss:$16 sps:$4 sm:$0xff]   ;;  %v3723_v18 = vpop.f32.mrf.mxu1 }
 0x3db   : > { %4047 = vmatprep.mubr.bf16.mxu1 %v10173_v17  ;;  %4904 = vmatpush1.bf16.msra.mxu1 %v8893_v5  ;;  %v8904_v17 = vld [vmem:[%s9812_s20 + $0x284] ss:$16 sps:$4 sm:$0xff]  }
 0x3dc   : > { %4905 = vmatprep.subr.bf16.mxu1 %v8898_v6  ;;  %v3725_v22 = vpop.f32.mrf.mxu1  ;;  %v8935_v6 = vld [vmem:[%s9812_s20 + $0x320] ss:$16 sps:$4 sm:$0xff]  }
 0x3de   : > { %v3727_v28 = vpop.f32.mrf.mxu1 }
 0x3df   : > { %4906 = vmatpush1.bf16.msra.mxu1 %v8896_v49 }
 0x3e0   : > { %4907 = vmatprep.subr.bf16.mxu1 %v8901_v27  ;;  %v3731_v33 = vpop.f32.mrf.mxu1 }
 0x3e2   : > { %4048 = vmatmul.mubr.bf16.gmra.mxu1 %v10170_v4  ;;  %v3670_v4 = vpop.f32.mrf.mxu0  ;;  %v3733_v38 = vpop.f32.mrf.mxu1 }
 0x3e3   : > { %4908 = vmatpush1.bf16.msra.mxu1 %v8899_v40  ;;  %v3724_v41 = vadd.f32 %v3723_v18, %v3670_v4 }
 0x3e4   : > { %4909 = vmatprep.subr.bf16.mxu1 %v8904_v17  ;;  %v3672_v44 = vpop.f32.mrf.mxu0  ;;  %v3735_v45 = vpop.f32.mrf.mxu1 }
 0x3e5   : > { %v3726_v54 = vadd.f32 %v3725_v22, %v3672_v44 }
 0x3e6   : > { %v3674_v11 = vpop.f32.mrf.mxu0  ;;  %v3737_v16 = vpop.f32.mrf.mxu1 }
 0x3e7   : > { %4910 = vmatpush1.bf16.msra.mxu1 %v8902_v13  ;;  %v3728_v62 = vadd.f32 %v3727_v28, %v3674_v11 }
 0x3e8   : > { %4911 = vmatprep.subr.bf16.mxu1 %v8907_v10  ;;  %v10461_v46 = vpop.f32.mrf.mxu0 }
 0x3e9   : > { %v3732_v40 = vadd.f32 %v3731_v33, %v10461_v46 }
 0x3ea   : > { %v3680_v15 = vpop.f32.mrf.mxu0 }
 0x3eb   : > { %4912 = vmatpush1.bf16.msra.mxu1 %v8905_v32  ;;  %v3734_v25 = vadd.f32 %v3733_v38, %v3680_v15  ;;  %v8845_v15 = vld [vmem:[%s9812_s20 + $0xe8] ss:$16 sps:$4 sm:$0xff]  }
 0x3ec   : > { %4913 = vmatprep.subr.bf16.mxu1 %v8910_v52  ;;  %v3682_v21 = vpop.f32.mrf.mxu0  ;;  %v8940_v52 = vld [vmem:[%s9812_s20 + $0x304] ss:$16 sps:$4 sm:$0xff]  }
 0x3ed   : > { %v3736_v49 = vadd.f32 %v3735_v45, %v3682_v21  ;;  %v8850_v21 = vld [vmem:[%s9812_s20 + $0xcc] ss:$16 sps:$4 sm:$0xff]  }
 0x3ee   : > { %v3684_v26 = vpop.f32.mrf.mxu0  ;;  %v8856_v45 = vld [vmem:[%s9812_s20 + $0x8c] ss:$16 sps:$4 sm:$0xff]  }
 0x3ef   : > { %4914 = vmatpush1.bf16.msra.mxu1 %v8908_v12  ;;  %v3738_v10 = vadd.f32 %v3737_v16, %v3684_v26  ;;  %v8943_v26 = vld [vmem:[%s9812_s20 + $0x2ec] ss:$16 sps:$4 sm:$0xff]   ;;  %v8857_v16 = vld [vmem:[%s9812_s20 + $0x68] ss:$16 sps:$4 sm:$0xff]  }
 0x3f0   : > { %4915 = vmatprep.subr.bf16.mxu1 %v8913_v57  ;;  %v3774_v29 = vpop.f32.mrf.mxu0  ;;  %v8938_v57 = vld [vmem:[%s9812_s20 + $0x300] ss:$16 sps:$4 sm:$0xff]  }
 0x3f1   : > { %v3775_v56 = vadd.f32 %v3774_v29, %v3722_v55  ;;  %v8865_v55 = vld [vmem:[%s9812_s20 + $0x2c] ss:$16 sps:$4 sm:$0xff]  }
 0x3f2   : > { %v3776_v34 = vpop.f32.mrf.mxu0 }
 0x3f3   : > { %4916 = vmatpush1.bf16.msra.mxu1 %v8911_v50  ;;  %v3777_v2 = vadd.f32 %v3776_v34, %v3724_v41  ;;  %v8853_v34 = vld [vmem:[%s9812_s20 + $0xac] ss:$16 sps:$4 sm:$0xff]  }
 0x3f4   : > { %4917 = vmatprep.subr.bf16.mxu1 %v8916_v14  ;;  %v3778_v39 = vpop.f32.mrf.mxu0  ;;  %v8862_v41 = vld [vmem:[%s9812_s20 + $0x4c] ss:$16 sps:$4 sm:$0xff]  }
 0x3f5   : > { %v3779_v3 = vadd.f32 %v3778_v39, %v3726_v54  ;;  %v8860_v54 = vld [vmem:[%s9812_s20 + $0x48] ss:$16 sps:$4 sm:$0xff]  }
 0x3f6   : > { %v3780_v47 = vpop.f32.mrf.mxu0 }
 0x3f7   : > { %4918 = vmatpush1.bf16.msra.mxu1 %v8914_v19  ;;  %v3781_v61 = vadd.f32 %v3780_v47, %v3728_v62  ;;  %v8854_v47 = vld [vmem:[%s9812_s20 + $0x88] ss:$16 sps:$4 sm:$0xff]  }
 0x3f8   : > { %4919 = vmatprep.subr.bf16.mxu1 %v8919_v20  ;;  %v3784_v58 = vpop.f32.mrf.mxu0  ;;  %v8866_v62 = vld [vmem:[%s9812_s20 + $0x8] ss:$16 sps:$4 sm:$0xff]  }
 0x3f9   : > { %v3785_v19 = vadd.f32 %v3784_v58, %v3732_v40  ;;  %v8863_v58 = vld [vmem:[%s9812_s20 + $0x28] ss:$16 sps:$4 sm:$0xff]  }
 0x3fa   : > { %v3786_v7 = vpop.f32.mrf.mxu0 }
 0x3fb   : > { %4920 = vmatpush2.bf16.msra.mxu1 %v8917_v23  ;;  %v3787_v50 = vadd.f32 %v3786_v7, %v3734_v25  ;;  %v8875_v7 = vld [vmem:[%s9812_s20 + $0x1a8] ss:$16 sps:$4 sm:$0xff]  }
 0x3fc   : > { %4921 = vmatprep.subr.bf16.mxu1 %v8922_v24  ;;  %v3788_v4 = vpop.f32.mrf.mxu0  ;;  %v8890_v25 = vld [vmem:[%s9812_s20 + $0x108] ss:$16 sps:$4 sm:$0xff]  }
 0x3fd   : > { %v3789_v14 = vadd.f32 %v3788_v4, %v3736_v49 }
 0x3fe   : > { %v3790_v18 = vpop.f32.mrf.mxu0 }
 0x3ff   : > { %4922 = vmatpush2.bf16.msra.mxu1 %v8920_v30  ;;  %v3791_v24 = vadd.f32 %v3790_v18, %v3738_v10 }
 0x400   : > { %4923 = vmatprep.subr.bf16.mxu1 %v8925_v31  ;;  %v8848_v31 = vld [vmem:[%s9812_s20 + $0xc8] ss:$16 sps:$4 sm:$0xff]  }
 0x403   : > { %4924 = vmatpush2.bf16.msra.mxu1 %v8923_v35 }
 0x404   : > { %4925 = vmatprep.subr.bf16.mxu1 %v8928_v36 }
 0x407   : > { %4926 = vmatpush2.bf16.msra.mxu1 %v8926_v42  ;;  %v8851_v42 = vld [vmem:[%s9812_s20 + $0xa8] ss:$16 sps:$4 sm:$0xff]  }
 0x408   : > { %4927 = vmatprep.subr.bf16.mxu1 %v8931_v43 }
 0x40b   : > { %4928 = vmatpush2.bf16.msra.mxu1 %v8929_v48  ;;  %v8859_v48 = vld [vmem:[%s9812_s20 + $0x6c] ss:$16 sps:$4 sm:$0xff]  }
 0x40c   : > { %4929 = vmatprep.subr.bf16.mxu1 %v8934_v63  ;;  %v8871_v63 = vld [vmem:[%s9812_s20 + $0x1ec] ss:$16 sps:$4 sm:$0xff]  }
 0x40f   : > { %4930 = vmatpush2.bf16.msra.mxu1 %v8932_v1  ;;  %v8874_v1 = vld [vmem:[%s9812_s20 + $0x1cc] ss:$16 sps:$4 sm:$0xff]  }
 0x410   : > { %4931 = vmatprep.subr.bf16.mxu1 %v8937_v8  ;;  %v8884_v8 = vld [vmem:[%s9812_s20 + $0x148] ss:$16 sps:$4 sm:$0xff]  }
 0x413   : > { %4932 = vmatpush2.bf16.msra.mxu1 %v8935_v6  ;;  %v8892_v6 = vld [vmem:[%s9812_s20 + $0x10c] ss:$16 sps:$4 sm:$0xff]  }
 0x414   : > { %4933 = vmatprep.subr.bf16.mxu1 %v8940_v52 }
 0x417   : > { %4934 = vmatpush2.bf16.msra.mxu1 %v8938_v57 }
 0x418   : > { %v3827_v51 = vpop.f32.mrf.mxu1  ;;  %5009 = vmatprep.subr.bf16.mxu1 %v8943_v26 }
 0x419   : > { %v3828_v9 = vadd.f32 %v3827_v51, %v3775_v56  ;;  %v8868_v51 = vld [vmem:[%s9812_s20 + $0xc] ss:$16 sps:$4 sm:$0xff]   ;;  %v3880_v49 = vpop.f32.mrf.mxu0 }
 0x41a   : > { %v3829_v0 = vpop.f32.mrf.mxu1  ;;  %v8880_v56 = vld [vmem:[%s9812_s20 + $0x18c] ss:$16 sps:$4 sm:$0xff]  }
 0x41b   : > { %v3830_v60 = vadd.f32 %v3829_v0, %v3777_v2  ;;  %v4058_v11 = vmax.f32 %v3828_v9, 0.0  ;;  %v8869_v0 = vld [vmem:[%s9812_s20 + $0x1e8] ss:$16 sps:$4 sm:$0xff]   ;;  %v8889_v9 = vld [vmem:[%s9812_s20 + $0x12c] ss:$16 sps:$4 sm:$0xff]  }
 0x41c   : > { %v3831_v53 = vpop.f32.mrf.mxu1  ;;  %v8872_v2 = vld [vmem:[%s9812_s20 + $0x1c8] ss:$16 sps:$4 sm:$0xff]  }
 0x41d   : > { %v3832_v59 = vadd.f32 %v3831_v53, %v3779_v3  ;;  %v4059_v44 = vmax.f32 %v3830_v60, 0.0  ;;  %v8877_v3 = vld [vmem:[%s9812_s20 + $0x1ac] ss:$16 sps:$4 sm:$0xff]   ;;  %v8878_v53 = vld [vmem:[%s9812_s20 + $0x188] ss:$16 sps:$4 sm:$0xff]  }
 0x41e   : > { %v3833_v5 = vpop.f32.mrf.mxu1  ;;  %v8883_v60 = vld [vmem:[%s9812_s20 + $0x16c] ss:$16 sps:$4 sm:$0xff]  }
 0x41f   : > { %v3834_v27 = vadd.f32 %v3833_v5, %v3781_v61  ;;  %v4062_v17 = vmax.f32 %v3832_v59, 0.0  ;;  %v8881_v59 = vld [vmem:[%s9812_s20 + $0x168] ss:$16 sps:$4 sm:$0xff]   ;;  %v8886_v61 = vld [vmem:[%s9812_s20 + $0x14c] ss:$16 sps:$4 sm:$0xff]  }
 0x420   : > { %v3837_v13 = vpop.f32.mrf.mxu1  ;;  %v8887_v5 = vld [vmem:[%s9812_s20 + $0x128] ss:$16 sps:$4 sm:$0xff]  }
 0x421   : > { %v4063_v32 = vmax.f32 %v3834_v27, 0.0  ;;  %v10485_v46 = vpack.c.bf16 %v4062_v17, %v4058_v11  ;;  %v3838_v28 = vadd.f32 %v3837_v13, %v3785_v19  ;;  %v3882_v27 = vpop.f32.mrf.mxu0 }
 0x422   : > { %v3839_v12 = vpop.f32.mrf.mxu1 }
 0x423   : > { %v4075_v37 = vpack.c.bf16 %v4063_v32, %v4059_v44  ;;  %v3840_v22 = vadd.f32 %v3839_v12, %v3787_v50  ;;  %v4066_v38 = vmax.f32 %v3838_v28, 0.0  ;;  %v3884_v40 = vpop.f32.mrf.mxu0 }
 0x424   : > { %v3841_v20 = vpop.f32.mrf.mxu1 }
 0x425   : > { %v3842_v23 = vadd.f32 %v3841_v20, %v3789_v14  ;;  %4882 = vmatprep.mubr.bf16.mxu0 %v4075_v37  ;;  %v4067_v35 = vmax.f32 %v3840_v22, 0.0  ;;  %v3886_v4 = vpop.f32.mrf.mxu0 }
 0x426   : > { %v3843_v29 = vpop.f32.mrf.mxu1  ;;  %4883 = vmatmul.mubr.bf16.vlgmr.msra.gmra.mxu0 %v10485_v46 }
 0x427   : > { %v3844_v30 = vadd.f32 %v3843_v29, %v3791_v24  ;;  %4957 = vmatpush1.bf16.msra.mxu0 %v8845_v15  ;;  %v4070_v33 = vmax.f32 %v3842_v23, 0.0  ;;  %v3890_v17 = vpop.f32.mrf.mxu0 }
 0x428   : > { %4958 = vmatprep.subr.bf16.mxu0 %v8850_v21 }
 0x429   : > { %v4071_v36 = vmax.f32 %v3844_v30, 0.0  ;;  %v4078_v43 = vpack.c.bf16 %v4070_v33, %v4066_v38  ;;  %v3892_v10 = vpop.f32.mrf.mxu0 }
 0x42b   : > { %v4079_v39 = vpack.c.bf16 %v4071_v36, %v4067_v35  ;;  %4959 = vmatpush1.bf16.msra.mxu0 %v8848_v31  ;;  %v3894_v32 = vpop.f32.mrf.mxu0 }
 0x42c   : > { %4960 = vmatprep.subr.bf16.mxu0 %v8853_v34 }
 0x42d   : > { %4892 = vmatprep.mubr.bf16.mxu0 %v4079_v39  ;;  %v3896_v11 = vpop.f32.mrf.mxu0 }
 0x42e   : > { %4893 = vmatmul.mubr.bf16.gmra.mxu0 %v4078_v43 }
 0x42f   : > { %4961 = vmatpush1.bf16.msra.mxu0 %v8851_v42  ;;  %4988 = vmatprep.mubr.bf16.mxu0 %v4075_v37 }
 0x430   : > { %4962 = vmatprep.subr.bf16.mxu0 %v8856_v45 }
 0x433   : > { %4963 = vmatpush1.bf16.msra.mxu0 %v8854_v47 }
 0x434   : > { %4964 = vmatprep.subr.bf16.mxu0 %v8859_v48 }
 0x437   : > { %4965 = vmatpush1.bf16.msra.mxu0 %v8857_v16 }
 0x438   : > { %4966 = vmatprep.subr.bf16.mxu0 %v8862_v41 }
 0x43b   : > { %4967 = vmatpush1.bf16.msra.mxu0 %v8860_v54 }
 0x43c   : > { %4968 = vmatprep.subr.bf16.mxu0 %v8865_v55 }
 0x43f   : > { %4969 = vmatpush1.bf16.msra.mxu0 %v8863_v58 }
 0x440   : > { %4970 = vmatprep.subr.bf16.mxu0 %v8868_v51 }
 0x443   : > { %4971 = vmatpush1.bf16.msra.mxu0 %v8866_v62 }
 0x444   : > { %4972 = vmatprep.subr.bf16.mxu0 %v8871_v63 }
 0x447   : > { %4973 = vmatpush2.bf16.msra.mxu0 %v8869_v0 }
 0x448   : > { %4974 = vmatprep.subr.bf16.mxu0 %v8874_v1 }
 0x44b   : > { %4975 = vmatpush2.bf16.msra.mxu0 %v8872_v2 }
 0x44c   : > { %4976 = vmatprep.subr.bf16.mxu0 %v8877_v3  ;;  %v8941_v3 = vld [vmem:[%s9812_s20 + $0x2e8] ss:$16 sps:$4 sm:$0xff]  }
 0x44f   : > { %4977 = vmatpush2.bf16.msra.mxu0 %v8875_v7 }
 0x450   : > { %4978 = vmatprep.subr.bf16.mxu0 %v8880_v56 }
 0x453   : > { %4979 = vmatpush2.bf16.msra.mxu0 %v8878_v53 }
 0x454   : > { %4980 = vmatprep.subr.bf16.mxu0 %v8883_v60 }
 0x457   : > { %4981 = vmatpush2.bf16.msra.mxu0 %v8881_v59  ;;  %v8946_v59 = vld [vmem:[%s9812_s20 + $0x2cc] ss:$16 sps:$4 sm:$0xff]  }
 0x458   : > { %4982 = vmatprep.subr.bf16.mxu0 %v8886_v61 }
 0x459   : > { %v3933_v13 = vpop.f32.mrf.mxu1 }
 0x45a   : > { %v3986_v57 = vpop.f32.mrf.mxu0  ;;  %v3934_v22 = vadd.f32 %v3933_v13, %v3880_v49  ;;  %v8944_v49 = vld [vmem:[%s9812_s20 + $0x2c8] ss:$16 sps:$4 sm:$0xff]  }
 0x45b   : > { %4983 = vmatpush2.bf16.msra.mxu0 %v8884_v8  ;;  %v3935_v44 = vpop.f32.mrf.mxu1 }
 0x45c   : > { %4984 = vmatprep.subr.bf16.mxu0 %v8889_v9  ;;  %v3988_v50 = vpop.f32.mrf.mxu0  ;;  %v3936_v20 = vadd.f32 %v3935_v44, %v3882_v27  ;;  %v3987_v31 = vadd.f32 %v3986_v57, %v3934_v22  ;;  %v8947_v44 = vld [vmem:[%s9812_s20 + $0x2a8] ss:$16 sps:$4 sm:$0xff]  }
 0x45d   : > { %v3937_v52 = vpop.f32.mrf.mxu1  ;;  %v8953_v57 = vld [vmem:[%s9812_s20 + $0x268] ss:$16 sps:$4 sm:$0xff]  }
 0x45e   : > { %v3990_v15 = vpop.f32.mrf.mxu0  ;;  %v3938_v21 = vadd.f32 %v3937_v52, %v3884_v40  ;;  %v3989_v29 = vadd.f32 %v3988_v50, %v3936_v20  ;;  %v8949_v40 = vld [vmem:[%s9812_s20 + $0x2ac] ss:$16 sps:$4 sm:$0xff]   ;;  %v8956_v50 = vld [vmem:[%s9812_s20 + $0x248] ss:$16 sps:$4 sm:$0xff]  }
 0x45f   : > { %4985 = vmatpush2.bf16.msra.mxu0 %v8887_v5  ;;  %v3939_v12 = vpop.f32.mrf.mxu1  ;;  %v8952_v52 = vld [vmem:[%s9812_s20 + $0x28c] ss:$16 sps:$4 sm:$0xff]   ;;  %v8965_v20 = vld [vmem:[%s9812_s20 + $0x3e8] ss:$16 sps:$4 sm:$0xff]  }
 0x460   : > { %4986 = vmatprep.subr.bf16.mxu0 %v8892_v6  ;;  %v3940_v26 = vadd.f32 %v3939_v12, %v3886_v4  ;;  %v3991_v30 = vadd.f32 %v3990_v15, %v3938_v21  ;;  %v8955_v12 = vld [vmem:[%s9812_s20 + $0x26c] ss:$16 sps:$4 sm:$0xff]   ;;  %v8959_v15 = vld [vmem:[%s9812_s20 + $0x228] ss:$16 sps:$4 sm:$0xff]  }
 0x461   : > { %v3943_v37 = vpop.f32.mrf.mxu1  ;;  %v8970_v21 = vld [vmem:[%s9812_s20 + $0x3cc] ss:$16 sps:$4 sm:$0xff]   ;;  %v8968_v22 = vld [vmem:[%s9812_s20 + $0x3c8] ss:$16 sps:$4 sm:$0xff]  }
 0x462   : > { %v3944_v48 = vadd.f32 %v3943_v37, %v3890_v17  ;;  %v8958_v37 = vld [vmem:[%s9812_s20 + $0x24c] ss:$16 sps:$4 sm:$0xff]  }
 0x463   : > { %4987 = vmatpush2.bf16.msra.mxu0 %v8890_v25  ;;  %v3945_v14 = vpop.f32.mrf.mxu1 }
 0x465   : > { %v3947_v18 = vpop.f32.mrf.mxu1 }
 0x466   : > { %4989 = vmatmul.mubr.bf16.vlgmr.msra.gmra.mxu0 %v10485_v46  ;;  %v3992_v46 = vpop.f32.mrf.mxu0  ;;  %v3948_v45 = vadd.f32 %v3947_v18, %v3894_v32  ;;  %v8964_v18 = vld [vmem:[%s9812_s20 + $0x20c] ss:$16 sps:$4 sm:$0xff]  }
 0x467   : > { %4998 = vmatprep.mubr.bf16.mxu0 %v4079_v39  ;;  %v3949_v19 = vpop.f32.mrf.mxu1  ;;  %v3993_v35 = vadd.f32 %v3992_v46, %v3940_v26  ;;  %v8962_v46 = vld [vmem:[%s9812_s20 + $0x208] ss:$16 sps:$4 sm:$0xff]   ;;  %v8976_v26 = vld [vmem:[%s9812_s20 + $0x38c] ss:$16 sps:$4 sm:$0xff]  }
 0x468   : > { %v3996_v23 = vpop.f32.mrf.mxu0  ;;  %v3950_v55 = vadd.f32 %v3949_v19, %v3896_v11  ;;  %v8950_v11 = vld [vmem:[%s9812_s20 + $0x288] ss:$16 sps:$4 sm:$0xff]   ;;  %v8967_v19 = vld [vmem:[%s9812_s20 + $0x3ec] ss:$16 sps:$4 sm:$0xff]  }
 0x469   : > { %v3997_v7 = vadd.f32 %v3996_v23, %v3944_v48  ;;  %v8973_v23 = vld [vmem:[%s9812_s20 + $0x3ac] ss:$16 sps:$4 sm:$0xff]   ;;  %v8989_v48 = vld [vmem:[#allocation2 + $0x30] sm:$0xff] }
 0x46a   : > { %v3998_v33 = vpop.f32.mrf.mxu0 }
 0x46c   : > { %v4000_v16 = vpop.f32.mrf.mxu0 }
 0x46d   : > { %v4001_v1 = vadd.f32 %v4000_v16, %v3948_v45 }
 0x46e   : > { %4999 = vmatmul.mubr.bf16.gmra.mxu0 %v4078_v43  ;;  %v3946_v43 = vadd.f32 %v3945_v14, %v3892_v10  ;;  %v4002_v56 = vpop.f32.mrf.mxu0  ;;  %v8961_v14 = vld [vmem:[%s9812_s20 + $0x22c] ss:$16 sps:$4 sm:$0xff]  }
 0x46f   : > { %v4003_v61 = vadd.f32 %v4002_v56, %v3950_v55 }
 0x470   : > { %v3999_v0 = vadd.f32 %v3998_v33, %v3946_v43  ;;  %v8980_v33 = vld [vmem:[%s9812_s20 + $0x348] ss:$16 sps:$4 sm:$0xff]  }
 0x49a   : > { %v4039_v24 = vpop.f32.mrf.mxu1 }
 0x49b   : > { %v4040_v39 = vadd.f32 %v4039_v24, %v3987_v31  ;;  %v8971_v24 = vld [vmem:[%s9812_s20 + $0x3a8] ss:$16 sps:$4 sm:$0xff]   ;;  %v8982_v31 = vld [vmem:[%s9812_s20 + $0x34c] ss:$16 sps:$4 sm:$0xff]  }
 0x49c   : > { %v4041_v28 = vpop.f32.mrf.mxu1 }
 0x49d   : > { %v4042_v36 = vadd.f32 %v4041_v28, %v3989_v29  ;;  %v4060_v62 = vmax.f32 %v4040_v39, 0.0  ;;  %v8974_v28 = vld [vmem:[%s9812_s20 + $0x388] ss:$16 sps:$4 sm:$0xff]   ;;  %v8979_v29 = vld [vmem:[%s9812_s20 + $0x36c] ss:$16 sps:$4 sm:$0xff]  }
 0x49e   : > { %v4043_v34 = vpop.f32.mrf.mxu1 }
 0x49f   : > { %v4044_v38 = vadd.f32 %v4043_v34, %v3991_v30  ;;  %v4061_v58 = vmax.f32 %v4042_v36, 0.0  ;;  %v8977_v30 = vld [vmem:[%s9812_s20 + $0x368] ss:$16 sps:$4 sm:$0xff]   ;;  %v8985_v34 = vld [vmem:[%s9812_s20 + $0x32c] ss:$16 sps:$4 sm:$0xff]  }
 0x4a0   : > { %v4045_v42 = vpop.f32.mrf.mxu1  ;;  %v8988_v36 = vld [vmem:[%s9812_s20 + $0x30c] ss:$16 sps:$4 sm:$0xff]  }
 0x4a1   : > { %v4046_v47 = vadd.f32 %v4045_v42, %v3993_v35  ;;  %v4064_v41 = vmax.f32 %v4044_v38, 0.0  ;;  %v8983_v35 = vld [vmem:[%s9812_s20 + $0x328] ss:$16 sps:$4 sm:$0xff]  }
 0x4a2   : > { %v4049_v54 = vpop.f32.mrf.mxu1  ;;  %v8986_v38 = vld [vmem:[%s9812_s20 + $0x308] ss:$16 sps:$4 sm:$0xff]  }
 0x4a3   : > { %v4065_v51 = vmax.f32 %v4046_v47, 0.0  ;;  %v10521_v53 = vpack.c.bf16 %v4064_v41, %v4060_v62  ;;  %v4050_v5 = vadd.f32 %v4049_v54, %v3997_v7  ;;  %v8990_v54 = vld [vmem:[#allocation2] sm:$0xff] }
 0x4a4   : > { %v4051_v63 = vpop.f32.mrf.mxu1 }
 0x4a5   : > { %v4077_v2 = vpack.c.bf16 %v4065_v51, %v4061_v58  ;;  %v4052_v8 = vadd.f32 %v4051_v63, %v3999_v0  ;;  %v4068_v13 = vmax.f32 %v4050_v5, 0.0  ;;  %v8991_v63 = vld [vmem:[#allocation2 + $0x50] sm:$0xff]  ;;  %v8994_v5 = vld [vmem:[#allocation2 + $0x20] sm:$0xff] }
 0x4a6   : > { %v4053_v60 = vpop.f32.mrf.mxu1 }
 0x4a7   : > { %v4054_v9 = vadd.f32 %v4053_v60, %v4001_v1  ;;  %4935 = vmatprep.mubr.bf16.mxu1 %v4077_v2  ;;  %v4069_v4 = vmax.f32 %v4052_v8, 0.0 }
 0x4a8   : > { %v4055_v6 = vpop.f32.mrf.mxu1  ;;  %4936 = vmatmul.mubr.bf16.vlgmr.msra.gmra.mxu1 %v10521_v53 }
 0x4a9   : > { %v4056_v25 = vadd.f32 %v4055_v6, %v4003_v61  ;;  %5010 = vmatpush1.bf16.msra.mxu1 %v8941_v3  ;;  %v4072_v27 = vmax.f32 %v4054_v9, 0.0  ;;  %v8992_v3 = vld [vmem:[#allocation2 + $0x68] sm:$0xff] }
 0x4aa   : > { %5011 = vmatprep.subr.bf16.mxu1 %v8946_v59  ;;  %v8993_v59 = vld [vmem:[#allocation2 + $0x40] sm:$0xff] }
 0x4ab   : > { %v4073_v17 = vmax.f32 %v4056_v25, 0.0  ;;  %v4080_v32 = vpack.c.bf16 %v4072_v27, %v4068_v13 }
 0x4ad   : > { %v4081_v10 = vpack.c.bf16 %v4073_v17, %v4069_v4  ;;  %5012 = vmatpush1.bf16.msra.mxu1 %v8944_v49 }
 0x4ae   : > { %5013 = vmatprep.subr.bf16.mxu1 %v8949_v40  ;;  %v8995_v40 = vld [vmem:[#allocation2 + $0x60] sm:$0xff] }
 0x4af   : > { %4945 = vmatprep.mubr.bf16.mxu1 %v4081_v10 }
 0x4b0   : > { %4946 = vmatmul.mubr.bf16.gmra.mxu1 %v4080_v32 }
 0x4b1   : > { %5014 = vmatpush1.bf16.msra.mxu1 %v8947_v44  ;;  %5041 = vmatprep.mubr.bf16.mxu1 %v4077_v2 }
 0x4b2   : > { %5015 = vmatprep.subr.bf16.mxu1 %v8952_v52 }
 0x4b5   : > { %5016 = vmatpush1.bf16.msra.mxu1 %v8950_v11 }
 0x4b6   : > { %5017 = vmatprep.subr.bf16.mxu1 %v8955_v12 }
 0x4b9   : > { %5018 = vmatpush1.bf16.msra.mxu1 %v8953_v57 }
 0x4ba   : > { %5019 = vmatprep.subr.bf16.mxu1 %v8958_v37 }
 0x4bd   : > { %5020 = vmatpush1.bf16.msra.mxu1 %v8956_v50 }
 0x4be   : > { %5021 = vmatprep.subr.bf16.mxu1 %v8961_v14 }
 0x4c1   : > { %5022 = vmatpush1.bf16.msra.mxu1 %v8959_v15  ;;  %v8997_v15 = vld [vmem:[#allocation2 + $0x58] sm:$0xff] }
 0x4c2   : > { %5023 = vmatprep.subr.bf16.mxu1 %v8964_v18 }
 0x4c5   : > { %5024 = vmatpush1.bf16.msra.mxu1 %v8962_v46 }
 0x4c6   : > { %5025 = vmatprep.subr.bf16.mxu1 %v8967_v19  ;;  %v8998_v19 = vld [vmem:[#allocation2 + $0x18] sm:$0xff] }
 0x4c9   : > { %5026 = vmatpush2.bf16.msra.mxu1 %v8965_v20 }
 0x4ca   : > { %5027 = vmatprep.subr.bf16.mxu1 %v8970_v21 }
 0x4cd   : > { %5028 = vmatpush2.bf16.msra.mxu1 %v8968_v22 }
 0x4ce   : > { %5029 = vmatprep.subr.bf16.mxu1 %v8973_v23 }
 0x4d1   : > { %5030 = vmatpush2.bf16.msra.mxu1 %v8971_v24  ;;  %v8999_v24 = vld [vmem:[#allocation2 + $0x8] sm:$0xff] }
 0x4d2   : > { %5031 = vmatprep.subr.bf16.mxu1 %v8976_v26 }
 0x4d5   : > { %5032 = vmatpush2.bf16.msra.mxu1 %v8974_v28 }
 0x4d6   : > { %5033 = vmatprep.subr.bf16.mxu1 %v8979_v29 }
 0x4d9   : > { %5034 = vmatpush2.bf16.msra.mxu1 %v8977_v30  ;;  %v9000_v30 = vld [vmem:[#allocation2 + $0x48] sm:$0xff] }
 0x4da   : > { %5035 = vmatprep.subr.bf16.mxu1 %v8982_v31 }
 0x4dd   : > { %5036 = vmatpush2.bf16.msra.mxu1 %v8980_v33 }
 0x4de   : > { %5037 = vmatprep.subr.bf16.mxu1 %v8985_v34 }
 0x4e1   : > { %5038 = vmatpush2.bf16.msra.mxu1 %v8983_v35 }
 0x4e2   : > { %5039 = vmatprep.subr.bf16.mxu1 %v8988_v36  ;;  %v9001_v36 = vld [vmem:[#allocation2 + $0x10] sm:$0xff] }
 0x4e5   : > { %5040 = vmatpush2.bf16.msra.mxu1 %v8986_v38 }
 0x4e6   : > { %v4884_v39 = vpop.f32.mrf.mxu0 }
 0x4e7   : > { %v4885_v16 = vadd.f32 %v8989_v48, %v4884_v39 }
 0x4e8   : > { %5042 = vmatmul.mubr.bf16.vlgmr.msra.gmra.mxu1 %v10521_v53  ;;  %v4886_v42 = vpop.f32.mrf.mxu0 }
 0x4e9   : > { %5051 = vmatprep.mubr.bf16.mxu1 %v4081_v10  ;;  %v4887_v55 = vadd.f32 %v8990_v54, %v4886_v42  ;;  %v8996_v10 = vld [vmem:[#allocation2 + $0x70] sm:$0xff] }
 0x4ea   : > { %v4888_v43 = vpop.f32.mrf.mxu0 }
 0x4eb   : > { %v4889_v0 = vadd.f32 %v8991_v63, %v4888_v43  ;;  %v9002_v43 = vld [vmem:[#allocation2 + $0x38] sm:$0xff] }
 0x4ec   : > { %v4890_v45 = vpop.f32.mrf.mxu0 }
 0x4ed   : > { %v4891_v7 = vadd.f32 %v8992_v3, %v4890_v45 }
 0x4ee   : > { %v4894_v47 = vpop.f32.mrf.mxu0 }
 0x4ef   : > { %v4895_v61 = vadd.f32 %v8993_v59, %v4894_v47 }
 0x4f0   : > { %5052 = vmatmul.mubr.bf16.gmra.mxu1 %v4080_v32  ;;  %v4896_v51 = vpop.f32.mrf.mxu0 }
 0x4f1   : > { %v4897_v6 = vadd.f32 %v8994_v5, %v4896_v51 }
 0x4f2   : > { %v4898_v53 = vpop.f32.mrf.mxu0 }
 0x4f3   : > { %v4899_v4 = vadd.f32 %v8995_v40, %v4898_v53 }
 0x4f4   : > { %v4900_v49 = vpop.f32.mrf.mxu0 }
 0x4f5   : > { %v4901_v44 = vadd.f32 %v8996_v10, %v4900_v49 }
 0x526   : > { %v4990_v12 = vpop.f32.mrf.mxu0 }
 0x527   : > { %v4991_v18 = vadd.f32 %v8997_v15, %v4990_v12 }
 0x528   : > { %v4992_v57 = vpop.f32.mrf.mxu0 }
 0x529   : > { %v4993_v20 = vadd.f32 %v8998_v19, %v4992_v57 }
 0x52a   : > { %v4994_v37 = vpop.f32.mrf.mxu0 }
 0x52b   : > { %v4995_v26 = vadd.f32 %v8999_v24, %v4994_v37 }
 0x52c   : > { %v4996_v50 = vpop.f32.mrf.mxu0 }
 0x52d   : > { %v4997_v31 = vadd.f32 %v9000_v30, %v4996_v50 }
 0x52e   : > { %v5000_v14 = vpop.f32.mrf.mxu0 }
 0x52f   : > { %v5001_v38 = vadd.f32 %v9001_v36, %v5000_v14 }
 0x530   : > { %v5002_v22 = vpop.f32.mrf.mxu0 }
 0x531   : > { %v5003_v45 = vadd.f32 %v9002_v43, %v5002_v22 }
 0x532   : > { %v5004_v34 = vpop.f32.mrf.mxu0 }
 0x534   : > { %v5006_v48 = vpop.f32.mrf.mxu0 }
 0x568   : > { %v4937_v41 = vpop.f32.mrf.mxu1 }
 0x569   : > { %v10555_v58 = vadd.f32 %v4937_v41, %v4885_v16  ;;  %v9003_v41 = vld [vmem:[#allocation2 + $0x78] sm:$0xff] }
 0x56a   : > { %v4939_v62 = vpop.f32.mrf.mxu1  ;;  %v5005_v54 = vadd.f32 %v9003_v41, %v5004_v34 }
 0x56b   : > { %5062 = vst [vmem:[#allocation2 + $0x30] sm:$0xff] %v10555_v58  ;;  %v10558_v1 = vadd.f32 %v4939_v62, %v4887_v55  ;;  %v9004_v62 = vld [vmem:[#allocation2 + $0x28] sm:$0xff] }
 0x56c   : > { %v4941_v2 = vpop.f32.mrf.mxu1  ;;  %v5007_v63 = vadd.f32 %v9004_v62, %v5006_v48 }
 0x56d   : > { %5063 = vst [vmem:[#allocation2] sm:$0xff] %v10558_v1  ;;  %v10561_v56 = vadd.f32 %v4941_v2, %v4889_v0 }
 0x56e   : > { %v4943_v60 = vpop.f32.mrf.mxu1 }
 0x56f   : > { %5066 = vst [vmem:[#allocation2 + $0x50] sm:$0xff] %v10561_v56  ;;  %v10564_v8 = vadd.f32 %v4943_v60, %v4891_v7 }
 0x570   : > { %v4947_v9 = vpop.f32.mrf.mxu1 }
 0x571   : > { %5067 = vst [vmem:[#allocation2 + $0x68] sm:$0xff] %v10564_v8  ;;  %v10567_v25 = vadd.f32 %v4947_v9, %v4895_v61 }
 0x572   : > { %v4949_v27 = vpop.f32.mrf.mxu1 }
 0x573   : > { %5070 = vst [vmem:[#allocation2 + $0x40] sm:$0xff] %v10567_v25  ;;  %v10570_v17 = vadd.f32 %v4949_v27, %v4897_v6 }
 0x574   : > { %v4951_v13 = vpop.f32.mrf.mxu1 }
 0x575   : > { %5071 = vst [vmem:[#allocation2 + $0x20] sm:$0xff] %v10570_v17  ;;  %v10573_v32 = vadd.f32 %v4951_v13, %v4899_v4 }
 0x576   : > { %v4953_v52 = vpop.f32.mrf.mxu1 }
 0x577   : > { %5074 = vst [vmem:[#allocation2 + $0x60] sm:$0xff] %v10573_v32  ;;  %v10576_v11 = vadd.f32 %v4953_v52, %v4901_v44 }
 0x579   : > { %5075 = vst [vmem:[#allocation2 + $0x70] sm:$0xff] %v10576_v11 }
 0x5a8   : > { %v5043_v46 = vpop.f32.mrf.mxu1 }
 0x5a9   : > { %v10579_v21 = vadd.f32 %v5043_v46, %v4991_v18 }
 0x5aa   : > { %v5045_v23 = vpop.f32.mrf.mxu1 }
 0x5ab   : > { %5064 = vst [vmem:[#allocation2 + $0x58] sm:$0xff] %v10579_v21  ;;  %v5046_v28 = vadd.f32 %v5045_v23, %v4993_v20 }
 0x5ac   : > { %v5047_v29 = vpop.f32.mrf.mxu1 }
 0x5ad   : > { %5065 = vst [vmem:[#allocation2 + $0x18] sm:$0xff] %v5046_v28  ;;  %v10582_v33 = vadd.f32 %v5047_v29, %v4995_v26 }
 0x5ae   : > { %v5049_v35 = vpop.f32.mrf.mxu1 }
 0x5af   : > { %5068 = vst [vmem:[#allocation2 + $0x8] sm:$0xff] %v10582_v33  ;;  %v5050_v39 = vadd.f32 %v5049_v35, %v4997_v31 }
 0x5b0   : > { %v5053_v42 = vpop.f32.mrf.mxu1 }
 0x5b1   : > { %5069 = vst [vmem:[#allocation2 + $0x48] sm:$0xff] %v5050_v39  ;;  %v10585_v47 = vadd.f32 %v5053_v42, %v5001_v38 }
 0x5b2   : > { %v5055_v16 = vpop.f32.mrf.mxu1 }
 0x5b3   : > { %5072 = vst [vmem:[#allocation2 + $0x10] sm:$0xff] %v10585_v47  ;;  %v10588_v55 = vadd.f32 %v5055_v16, %v5003_v45 }
 0x5b4   : > { %v5057_v51 = vpop.f32.mrf.mxu1 }
 0x5b5   : > { %5073 = vst [vmem:[#allocation2 + $0x38] sm:$0xff] %v10588_v55  ;;  %v10591_v0 = vadd.f32 %v5057_v51, %v5005_v54  ;;  %5081 = sbr.rel (%p7746_p9) target bundleno = 2046 (0x7fe), region = 80 }
 0x5b6   : > { %v5059_v2 = vpop.f32.mrf.mxu1 }
 0x5b7   : > { %5076 = vst [vmem:[#allocation2 + $0x78] sm:$0xff] %v10591_v0  ;;  %v10594_v3 = vadd.f32 %v5059_v2, %v5007_v63 }
 0x5b9   : > { %5077 = vst [vmem:[#allocation2 + $0x28] sm:$0xff] %v10594_v3 }
 0x5ba   : > { %v9005_v7 = vld [vmem:[#allocation10 + $0xe4] ss:$16 sps:$4 sm:$0xff]   ;;  %v5083_v53 = vmax.f32 %v10558_v1, 0.0  ;;  %v5087_v60 = vmax.f32 %v10564_v8, 0.0  ;;  %v5085_v61 = vmax.f32 %v5046_v28, 0.0  ;;  %v5089_v9 = vmax.f32 %v5050_v39, 0.0 }
 0x5bb   : > { %v9007_v59 = vld [vmem:[#allocation10 + $0x2e4] ss:$16 sps:$4 sm:$0xff]   ;;  %5874 = vmatprep.subr.bf16.mxu0 %v9005_v7  ;;  %v9009_v5 = vld [vmem:[#allocation10 + $0xe0] ss:$16 sps:$4 sm:$0xff]  }
 0x5bc   : > { %v9010_v6 = vld [vmem:[#allocation10 + $0x2e0] ss:$16 sps:$4 sm:$0xff]   ;;  %v10600_v49 = vpack.c.bf16 %v5087_v60, %v5083_v53  ;;  %5927 = vmatprep.subr.bf16.mxu1 %v9007_v59  ;;  %v9011_v27 = vld [vmem:[#allocation10 + $0xc4] ss:$16 sps:$4 sm:$0xff]   ;;  %v10602_v40 = vpack.c.bf16 %v5089_v9, %v5085_v61  ;;  %5875 = vmatpush1.bf16.msra.mxu0 %v9009_v5 }
 0x5bd   : > { %5928 = vmatpush1.bf16.msra.mxu1 %v9010_v6  ;;  %v9013_v4 = vld [vmem:[#allocation10 + $0x2c4] ss:$16 sps:$4 sm:$0xff]   ;;  %v9015_v13 = vld [vmem:[#allocation10 + $0xc0] ss:$16 sps:$4 sm:$0xff]   ;;  %5876 = vmatprep.subr.bf16.mxu0 %v9011_v27 }
 0x5be   : > { %v9016_v1 = vld [vmem:[#allocation10 + $0x2c0] ss:$16 sps:$4 sm:$0xff]   ;;  %5906 = vmatprep.mubr.bf16.mxu0 %v10600_v49  ;;  %5929 = vmatprep.subr.bf16.mxu1 %v9013_v4  ;;  %v9017_v8 = vld [vmem:[#allocation10 + $0xa4] ss:$16 sps:$4 sm:$0xff]  }
 0x5bf   : > { %5959 = vmatprep.mubr.bf16.mxu1 %v10602_v40  ;;  %v9019_v10 = vld [vmem:[#allocation10 + $0x2a4] ss:$16 sps:$4 sm:$0xff]   ;;  %v9021_v44 = vld [vmem:[#allocation10 + $0xa0] ss:$16 sps:$4 sm:$0xff]  }
 0x5c0   : > { %v9022_v52 = vld [vmem:[#allocation10 + $0x2a0] ss:$16 sps:$4 sm:$0xff]   ;;  %5877 = vmatpush1.bf16.msra.mxu0 %v9015_v13  ;;  %v9023_v12 = vld [vmem:[#allocation10 + $0x84] ss:$16 sps:$4 sm:$0xff]  }
 0x5c1   : > { %5930 = vmatpush1.bf16.msra.mxu1 %v9016_v1  ;;  %5878 = vmatprep.subr.bf16.mxu0 %v9017_v8  ;;  %v9025_v57 = vld [vmem:[#allocation10 + $0x284] ss:$16 sps:$4 sm:$0xff]   ;;  %v9027_v37 = vld [vmem:[#allocation10 + $0x80] ss:$16 sps:$4 sm:$0xff]  }
 0x5c2   : > { %5931 = vmatprep.subr.bf16.mxu1 %v9019_v10  ;;  %v9028_v50 = vld [vmem:[#allocation10 + $0x280] ss:$16 sps:$4 sm:$0xff]   ;;  %v9029_v14 = vld [vmem:[#allocation10 + $0x64] ss:$16 sps:$4 sm:$0xff]  }
 0x5c3   : > { %v9031_v15 = vld [vmem:[#allocation10 + $0x264] ss:$16 sps:$4 sm:$0xff]   ;;  %v9033_v18 = vld [vmem:[#allocation10 + $0x60] ss:$16 sps:$4 sm:$0xff]  }
 0x5c4   : > { %5879 = vmatpush1.bf16.msra.mxu0 %v9021_v44  ;;  %v9034_v46 = vld [vmem:[#allocation10 + $0x260] ss:$16 sps:$4 sm:$0xff]   ;;  %v9035_v19 = vld [vmem:[#allocation10 + $0x44] ss:$16 sps:$4 sm:$0xff]  }
 0x5c5   : > { %5932 = vmatpush1.bf16.msra.mxu1 %v9022_v52  ;;  %5880 = vmatprep.subr.bf16.mxu0 %v9023_v12  ;;  %v9037_v20 = vld [vmem:[#allocation10 + $0x244] ss:$16 sps:$4 sm:$0xff]   ;;  %v9039_v22 = vld [vmem:[#allocation10 + $0x40] ss:$16 sps:$4 sm:$0xff]   ;;  %v5082_v12 = vmax.f32 %v10555_v58, 0.0  ;;  %v5093_v58 = vmax.f32 %v10588_v55, 0.0 }
 0x5c6   : > { %5933 = vmatprep.subr.bf16.mxu1 %v9025_v57  ;;  %v9040_v23 = vld [vmem:[#allocation10 + $0x240] ss:$16 sps:$4 sm:$0xff]   ;;  %v9041_v24 = vld [vmem:[#allocation10 + $0x24] ss:$16 sps:$4 sm:$0xff]   ;;  %v5086_v57 = vmax.f32 %v10561_v56, 0.0  ;;  %v5097_v56 = vmax.f32 %v10594_v3, 0.0 }
 0x5c7   : > { %v9043_v26 = vld [vmem:[#allocation10 + $0x224] ss:$16 sps:$4 sm:$0xff]   ;;  %v9045_v28 = vld [vmem:[#allocation10 + $0x20] ss:$16 sps:$4 sm:$0xff]   ;;  %v5094_v55 = vmax.f32 %v10573_v32, 0.0  ;;  %v5092_v3 = vmax.f32 %v10585_v47, 0.0 }
 0x5c8   : > { %5881 = vmatpush1.bf16.msra.mxu0 %v9027_v37  ;;  %v9046_v29 = vld [vmem:[#allocation10 + $0x220] ss:$16 sps:$4 sm:$0xff]   ;;  %v9047_v30 = vld [vmem:[#allocation10 + $0x4] ss:$16 sps:$4 sm:$0xff]   ;;  %v5084_v37 = vmax.f32 %v10579_v21, 0.0 }
 0x5c9   : > { %5934 = vmatpush1.bf16.msra.mxu1 %v9028_v50  ;;  %5882 = vmatprep.subr.bf16.mxu0 %v9029_v14  ;;  %v9049_v31 = vld [vmem:[#allocation10 + $0x204] ss:$16 sps:$4 sm:$0xff]   ;;  %v9051_v34 = vld [vmem:[#allocation10] ss:$16 sps:$4 sm:$0xff]   ;;  %v9113_v47 = vld [vmem:[#allocation10 + $0xa8] ss:$16 sps:$4 sm:$0xff]  }
 0x5ca   : > { %5935 = vmatprep.subr.bf16.mxu1 %v9031_v15  ;;  %v9052_v35 = vld [vmem:[#allocation10 + $0x200] ss:$16 sps:$4 sm:$0xff]   ;;  %v9053_v36 = vld [vmem:[#allocation10 + $0x1e4] ss:$16 sps:$4 sm:$0xff]   ;;  %v5088_v15 = vmax.f32 %v10582_v33, 0.0 }
 0x5cb   : > { %v9055_v38 = vld [vmem:[#allocation10 + $0x3e4] ss:$16 sps:$4 sm:$0xff]   ;;  %v9057_v39 = vld [vmem:[#allocation10 + $0x1e0] ss:$16 sps:$4 sm:$0xff]   ;;  %v9104_v33 = vld [vmem:[#allocation10 + $0x2e8] ss:$16 sps:$4 sm:$0xff]  }
 0x5cc   : > { %5883 = vmatpush1.bf16.msra.mxu0 %v9033_v18  ;;  %v9058_v42 = vld [vmem:[#allocation10 + $0x3e0] ss:$16 sps:$4 sm:$0xff]   ;;  %v9059_v43 = vld [vmem:[#allocation10 + $0x1c4] ss:$16 sps:$4 sm:$0xff]   ;;  %v9103_v18 = vld [vmem:[#allocation10 + $0xec] ss:$16 sps:$4 sm:$0xff]   ;;  %v10616_v21 = vpack.c.bf16 %v5088_v15, %v5084_v37 }
 0x5cd   : > { %5936 = vmatpush1.bf16.msra.mxu1 %v9034_v46  ;;  %5884 = vmatprep.subr.bf16.mxu0 %v9035_v19  ;;  %v9061_v45 = vld [vmem:[#allocation10 + $0x3c4] ss:$16 sps:$4 sm:$0xff]   ;;  %v9063_v48 = vld [vmem:[#allocation10 + $0x1c0] ss:$16 sps:$4 sm:$0xff]   ;;  %v9106_v46 = vld [vmem:[#allocation10 + $0x2ec] ss:$16 sps:$4 sm:$0xff]  }
 0x5ce   : > { %5937 = vmatprep.subr.bf16.mxu1 %v9037_v20  ;;  %v9064_v16 = vld [vmem:[#allocation10 + $0x3c0] ss:$16 sps:$4 sm:$0xff]   ;;  %v9065_v41 = vld [vmem:[#allocation10 + $0x1a4] ss:$16 sps:$4 sm:$0xff]   ;;  %v5091_v19 = vmax.f32 %v10570_v17, 0.0  ;;  %v5095_v20 = vmax.f32 %v10576_v11, 0.0  ;;  %v10620_v17 = vpack.c.bf16 %v5097_v56, %v5093_v58 }
 0x5cf   : > { %v9067_v54 = vld [vmem:[#allocation10 + $0x3a4] ss:$16 sps:$4 sm:$0xff]   ;;  %v9069_v51 = vld [vmem:[#allocation10 + $0x1a0] ss:$16 sps:$4 sm:$0xff]   ;;  %v5090_v11 = vmax.f32 %v10567_v25, 0.0 }
 0x5d0   : > { %5885 = vmatpush1.bf16.msra.mxu0 %v9039_v22  ;;  %v9070_v62 = vld [vmem:[#allocation10 + $0x3a0] ss:$16 sps:$4 sm:$0xff]   ;;  %v9071_v63 = vld [vmem:[#allocation10 + $0x184] ss:$16 sps:$4 sm:$0xff]   ;;  %v10614_v22 = vpack.c.bf16 %v5086_v57, %v5082_v12  ;;  %v9169_v12 = vld [vmem:[#allocation10 + $0x18c] ss:$16 sps:$4 sm:$0xff]  }
 0x5d1   : > { %5938 = vmatpush1.bf16.msra.mxu1 %v9040_v23  ;;  %5886 = vmatprep.subr.bf16.mxu0 %v9041_v24  ;;  %v9073_v2 = vld [vmem:[#allocation10 + $0x384] ss:$16 sps:$4 sm:$0xff]   ;;  %v9075_v7 = vld [vmem:[#allocation10 + $0x180] ss:$16 sps:$4 sm:$0xff]   ;;  %v9101_v23 = vld [vmem:[#allocation10 + $0xe8] ss:$16 sps:$4 sm:$0xff]   ;;  %v10630_v25 = vpack.c.bf16 %v5094_v55, %v5090_v11 }
 0x5d2   : > { %5939 = vmatprep.subr.bf16.mxu1 %v9043_v26  ;;  %v9076_v53 = vld [vmem:[#allocation10 + $0x380] ss:$16 sps:$4 sm:$0xff]   ;;  %v9077_v60 = vld [vmem:[#allocation10 + $0x164] ss:$16 sps:$4 sm:$0xff]   ;;  %v9109_v24 = vld [vmem:[#allocation10 + $0xcc] ss:$16 sps:$4 sm:$0xff]  }
 0x5d3   : > { %v9079_v59 = vld [vmem:[#allocation10 + $0x364] ss:$16 sps:$4 sm:$0xff]   ;;  %v9081_v61 = vld [vmem:[#allocation10 + $0x160] ss:$16 sps:$4 sm:$0xff]   ;;  %v9112_v26 = vld [vmem:[#allocation10 + $0x2cc] ss:$16 sps:$4 sm:$0xff]  }
 0x5d4   : > { %5887 = vmatpush1.bf16.msra.mxu0 %v9045_v28  ;;  %v9082_v9 = vld [vmem:[#allocation10 + $0x360] ss:$16 sps:$4 sm:$0xff]   ;;  %v9083_v5 = vld [vmem:[#allocation10 + $0x144] ss:$16 sps:$4 sm:$0xff]   ;;  %v10618_v28 = vpack.c.bf16 %v5095_v20, %v5091_v19  ;;  %v9172_v57 = vld [vmem:[#allocation10 + $0x38c] ss:$16 sps:$4 sm:$0xff]  }
 0x5d5   : > { %5940 = vmatpush1.bf16.msra.mxu1 %v9046_v29  ;;  %5888 = vmatprep.subr.bf16.mxu0 %v9047_v30  ;;  %v9085_v6 = vld [vmem:[#allocation10 + $0x344] ss:$16 sps:$4 sm:$0xff]   ;;  %v9087_v27 = vld [vmem:[#allocation10 + $0x140] ss:$16 sps:$4 sm:$0xff]   ;;  %v9107_v29 = vld [vmem:[#allocation10 + $0xc8] ss:$16 sps:$4 sm:$0xff]  }
 0x5d6   : > { %5941 = vmatprep.subr.bf16.mxu1 %v9049_v31  ;;  %v9088_v4 = vld [vmem:[#allocation10 + $0x340] ss:$16 sps:$4 sm:$0xff]   ;;  %v9089_v13 = vld [vmem:[#allocation10 + $0x124] ss:$16 sps:$4 sm:$0xff]   ;;  %v9110_v30 = vld [vmem:[#allocation10 + $0x2c8] ss:$16 sps:$4 sm:$0xff]  }
 0x5d7   : > { %v9091_v1 = vld [vmem:[#allocation10 + $0x324] ss:$16 sps:$4 sm:$0xff]   ;;  %v9093_v8 = vld [vmem:[#allocation10 + $0x120] ss:$16 sps:$4 sm:$0xff]   ;;  %v5096_v31 = vmax.f32 %v10591_v0, 0.0 }
 0x5d8   : > { %5889 = vmatpush1.bf16.msra.mxu0 %v9051_v34  ;;  %v9094_v10 = vld [vmem:[#allocation10 + $0x320] ss:$16 sps:$4 sm:$0xff]   ;;  %v9095_v44 = vld [vmem:[#allocation10 + $0x104] ss:$16 sps:$4 sm:$0xff]   ;;  %v9115_v34 = vld [vmem:[#allocation10 + $0xac] ss:$16 sps:$4 sm:$0xff]  }
 0x5d9   : > { %5942 = vmatpush1.bf16.msra.mxu1 %v9052_v35  ;;  %5890 = vmatprep.subr.bf16.mxu0 %v9053_v36  ;;  %v9097_v52 = vld [vmem:[#allocation10 + $0x304] ss:$16 sps:$4 sm:$0xff]   ;;  %v9099_v50 = vld [vmem:[#allocation10 + $0x100] ss:$16 sps:$4 sm:$0xff]   ;;  %v9118_v35 = vld [vmem:[#allocation10 + $0x2ac] ss:$16 sps:$4 sm:$0xff]   ;;  %v10632_v32 = vpack.c.bf16 %v5096_v31, %v5092_v3 }
 0x5da   : > { %5943 = vmatprep.subr.bf16.mxu1 %v9055_v38  ;;  %v9100_v14 = vld [vmem:[#allocation10 + $0x300] ss:$16 sps:$4 sm:$0xff]   ;;  %v9116_v36 = vld [vmem:[#allocation10 + $0x2a8] ss:$16 sps:$4 sm:$0xff]   ;;  %v9121_v38 = vld [vmem:[#allocation10 + $0x8c] ss:$16 sps:$4 sm:$0xff]  }
 0x5db   : > { %v9124_v0 = vld [vmem:[#allocation10 + $0x28c] ss:$16 sps:$4 sm:$0xff]   ;;  %v9167_v37 = vld [vmem:[#allocation10 + $0x188] ss:$16 sps:$4 sm:$0xff]  }
 0x5dc   : > { %5891 = vmatpush2.bf16.msra.mxu0 %v9057_v39  ;;  %v9119_v39 = vld [vmem:[#allocation10 + $0x88] ss:$16 sps:$4 sm:$0xff]   ;;  %v9178_v15 = vld [vmem:[#allocation10 + $0x36c] ss:$16 sps:$4 sm:$0xff]  }
 0x5dd   : > { %5944 = vmatpush2.bf16.msra.mxu1 %v9058_v42  ;;  %5892 = vmatprep.subr.bf16.mxu0 %v9059_v43  ;;  %v9122_v42 = vld [vmem:[#allocation10 + $0x288] ss:$16 sps:$4 sm:$0xff]   ;;  %v9127_v43 = vld [vmem:[#allocation10 + $0x6c] ss:$16 sps:$4 sm:$0xff]  }
 0x5de   : > { %5945 = vmatprep.subr.bf16.mxu1 %v9061_v45  ;;  %v9130_v45 = vld [vmem:[#allocation10 + $0x26c] ss:$16 sps:$4 sm:$0xff]   ;;  %v9179_v58 = vld [vmem:[#allocation10 + $0x148] ss:$16 sps:$4 sm:$0xff]  }
 0x5df   : > { %v9181_v19 = vld [vmem:[#allocation10 + $0x14c] ss:$16 sps:$4 sm:$0xff]   ;;  %v9182_v56 = vld [vmem:[#allocation10 + $0x348] ss:$16 sps:$4 sm:$0xff]  }
 0x5e0   : > { %5893 = vmatpush2.bf16.msra.mxu0 %v9063_v48  ;;  %v9125_v48 = vld [vmem:[#allocation10 + $0x68] ss:$16 sps:$4 sm:$0xff]   ;;  %v9184_v20 = vld [vmem:[#allocation10 + $0x34c] ss:$16 sps:$4 sm:$0xff]  }
 0x5e1   : > { %5946 = vmatpush2.bf16.msra.mxu1 %v9064_v16  ;;  %5894 = vmatprep.subr.bf16.mxu0 %v9065_v41  ;;  %v9128_v16 = vld [vmem:[#allocation10 + $0x268] ss:$16 sps:$4 sm:$0xff]   ;;  %v9133_v41 = vld [vmem:[#allocation10 + $0x4c] ss:$16 sps:$4 sm:$0xff]  }
 0x5e2   : > { %5947 = vmatprep.subr.bf16.mxu1 %v9067_v54  ;;  %v9136_v54 = vld [vmem:[#allocation10 + $0x24c] ss:$16 sps:$4 sm:$0xff]   ;;  %v9191_v3 = vld [vmem:[#allocation10 + $0x108] ss:$16 sps:$4 sm:$0xff]  }
 0x5e3   : > { %v9193_v11 = vld [vmem:[#allocation10 + $0x10c] ss:$16 sps:$4 sm:$0xff]   ;;  %v9197_v31 = vld [vmem:[#allocation11 + $0xa8] ss:$12 sps:$4 sm:$0xff]  }
 0x5e4   : > { %5895 = vmatpush2.bf16.msra.mxu0 %v9069_v51  ;;  %v9131_v51 = vld [vmem:[#allocation10 + $0x48] ss:$16 sps:$4 sm:$0xff]   ;;  %v9196_v55 = vld [vmem:[#allocation10 + $0x30c] ss:$16 sps:$4 sm:$0xff]  }
 0x5e5   : > { %5948 = vmatpush2.bf16.msra.mxu1 %v9070_v62  ;;  %5896 = vmatprep.subr.bf16.mxu0 %v9071_v63  ;;  %v9134_v62 = vld [vmem:[#allocation10 + $0x248] ss:$16 sps:$4 sm:$0xff]   ;;  %v9139_v63 = vld [vmem:[#allocation10 + $0x2c] ss:$16 sps:$4 sm:$0xff]  }
 0x5e6   : > { %5949 = vmatprep.subr.bf16.mxu1 %v9073_v2  ;;  %v9142_v2 = vld [vmem:[#allocation10 + $0x22c] ss:$16 sps:$4 sm:$0xff]  }
 0x5e8   : > { %5897 = vmatpush2.bf16.msra.mxu0 %v9075_v7  ;;  %v9137_v7 = vld [vmem:[#allocation10 + $0x28] ss:$16 sps:$4 sm:$0xff]  }
 0x5e9   : > { %5950 = vmatpush2.bf16.msra.mxu1 %v9076_v53  ;;  %5898 = vmatprep.subr.bf16.mxu0 %v9077_v60  ;;  %v9148_v53 = vld [vmem:[#allocation10 + $0x20c] ss:$16 sps:$4 sm:$0xff]   ;;  %v9143_v60 = vld [vmem:[#allocation10 + $0x8] ss:$16 sps:$4 sm:$0xff]  }
 0x5ea   : > { %5951 = vmatprep.subr.bf16.mxu1 %v9079_v59  ;;  %v9146_v59 = vld [vmem:[#allocation10 + $0x208] ss:$16 sps:$4 sm:$0xff]  }
 0x5ec   : > { %5899 = vmatpush2.bf16.msra.mxu0 %v9081_v61  ;;  %v9151_v61 = vld [vmem:[#allocation10 + $0x1ec] ss:$16 sps:$4 sm:$0xff]  }
 0x5ed   : > { %5952 = vmatpush2.bf16.msra.mxu1 %v9082_v9  ;;  %5900 = vmatprep.subr.bf16.mxu0 %v9083_v5  ;;  %v9154_v9 = vld [vmem:[#allocation10 + $0x3ec] ss:$16 sps:$4 sm:$0xff]   ;;  %v9149_v5 = vld [vmem:[#allocation10 + $0x1e8] ss:$16 sps:$4 sm:$0xff]  }
 0x5ee   : > { %5953 = vmatprep.subr.bf16.mxu1 %v9085_v6  ;;  %v9152_v6 = vld [vmem:[#allocation10 + $0x3e8] ss:$16 sps:$4 sm:$0xff]  }
 0x5f0   : > { %5901 = vmatpush2.bf16.msra.mxu0 %v9087_v27  ;;  %v9157_v27 = vld [vmem:[#allocation10 + $0x1cc] ss:$16 sps:$4 sm:$0xff]  }
 0x5f1   : > { %5954 = vmatpush2.bf16.msra.mxu1 %v9088_v4  ;;  %5902 = vmatprep.subr.bf16.mxu0 %v9089_v13  ;;  %v9160_v4 = vld [vmem:[#allocation10 + $0x3cc] ss:$16 sps:$4 sm:$0xff]   ;;  %v9155_v13 = vld [vmem:[#allocation10 + $0x1c8] ss:$16 sps:$4 sm:$0xff]  }
 0x5f2   : > { %5955 = vmatprep.subr.bf16.mxu1 %v9091_v1  ;;  %v9158_v1 = vld [vmem:[#allocation10 + $0x3c8] ss:$16 sps:$4 sm:$0xff]  }
 0x5f4   : > { %5903 = vmatpush2.bf16.msra.mxu0 %v9093_v8  ;;  %v9163_v8 = vld [vmem:[#allocation10 + $0x1ac] ss:$16 sps:$4 sm:$0xff]  }
 0x5f5   : > { %5956 = vmatpush2.bf16.msra.mxu1 %v9094_v10  ;;  %5904 = vmatprep.subr.bf16.mxu0 %v9095_v44  ;;  %v9166_v10 = vld [vmem:[#allocation10 + $0x3ac] ss:$16 sps:$4 sm:$0xff]   ;;  %v9161_v44 = vld [vmem:[#allocation10 + $0x1a8] ss:$16 sps:$4 sm:$0xff]  }
 0x5f6   : > { %5957 = vmatprep.subr.bf16.mxu1 %v9097_v52  ;;  %v9164_v52 = vld [vmem:[#allocation10 + $0x3a8] ss:$16 sps:$4 sm:$0xff]  }
 0x5f8   : > { %5905 = vmatpush2.bf16.msra.mxu0 %v9099_v50  ;;  %v9170_v50 = vld [vmem:[#allocation10 + $0x388] ss:$16 sps:$4 sm:$0xff]  }
 0x5f9   : > { %5958 = vmatpush2.bf16.msra.mxu1 %v9100_v14  ;;  %5980 = vmatprep.subr.bf16.mxu0 %v9103_v18  ;;  %v9175_v14 = vld [vmem:[#allocation10 + $0x16c] ss:$16 sps:$4 sm:$0xff]   ;;  %v9173_v18 = vld [vmem:[#allocation10 + $0x168] ss:$16 sps:$4 sm:$0xff]  }
 0x5fa   : > { %6033 = vmatprep.subr.bf16.mxu1 %v9106_v46  ;;  %v9176_v46 = vld [vmem:[#allocation10 + $0x368] ss:$16 sps:$4 sm:$0xff]  }
 0x5fb   : > { %5907 = vmatmul.mubr.bf16.vlgmr.msra.gmra.mxu0 %v10614_v22 }
 0x5fc   : > { %5960 = vmatmul.mubr.bf16.vlgmr.msra.gmra.mxu1 %v10616_v21  ;;  %5981 = vmatpush1.bf16.msra.mxu0 %v9101_v23  ;;  %v9187_v23 = vld [vmem:[#allocation10 + $0x12c] ss:$16 sps:$4 sm:$0xff]  }
 0x5fd   : > { %6034 = vmatpush1.bf16.msra.mxu1 %v9104_v33  ;;  %5982 = vmatprep.subr.bf16.mxu0 %v9109_v24  ;;  %v9190_v33 = vld [vmem:[#allocation10 + $0x32c] ss:$16 sps:$4 sm:$0xff]   ;;  %v9185_v24 = vld [vmem:[#allocation10 + $0x128] ss:$16 sps:$4 sm:$0xff]  }
 0x5fe   : > { %6035 = vmatprep.subr.bf16.mxu1 %v9112_v26  ;;  %5916 = vmatprep.mubr.bf16.mxu0 %v10618_v28  ;;  %v9188_v26 = vld [vmem:[#allocation10 + $0x328] ss:$16 sps:$4 sm:$0xff]  }
 0x5ff   : > { %5969 = vmatprep.mubr.bf16.mxu1 %v10620_v17 }
 0x600   : > { %5983 = vmatpush1.bf16.msra.mxu0 %v9107_v29  ;;  %v9194_v29 = vld [vmem:[#allocation10 + $0x308] ss:$16 sps:$4 sm:$0xff]  }
 0x601   : > { %6036 = vmatpush1.bf16.msra.mxu1 %v9110_v30  ;;  %5984 = vmatprep.subr.bf16.mxu0 %v9115_v34  ;;  %v9199_v30 = vld [vmem:[#allocation11 + $0xac] ss:$12 sps:$4 sm:$0xff]   ;;  %v9202_v34 = vld [vmem:[#allocation11 + $0x94] ss:$12 sps:$4 sm:$0xff]  }
 0x602   : > { %6037 = vmatprep.subr.bf16.mxu1 %v9118_v35  ;;  %v9200_v35 = vld [vmem:[#allocation11 + $0x90] ss:$12 sps:$4 sm:$0xff]  }
 0x603   : > { %5917 = vmatmul.mubr.bf16.gmra.mxu0 %v10630_v25 }
 0x604   : > { %5970 = vmatmul.mubr.bf16.gmra.mxu1 %v10632_v32  ;;  %5985 = vmatpush1.bf16.msra.mxu0 %v9113_v47  ;;  %v9205_v47 = vld [vmem:[#allocation11 + $0x7c] ss:$12 sps:$4 sm:$0xff]  }
 0x605   : > { %6038 = vmatpush1.bf16.msra.mxu1 %v9116_v36  ;;  %5986 = vmatprep.subr.bf16.mxu0 %v9121_v38  ;;  %v9203_v36 = vld [vmem:[#allocation11 + $0x78] ss:$12 sps:$4 sm:$0xff]  }
 0x606   : > { %6039 = vmatprep.subr.bf16.mxu1 %v9124_v0  ;;  %6012 = vmatprep.mubr.bf16.mxu0 %v10600_v49  ;;  %v9140_v49 = vld [vmem:[#allocation10 + $0x228] ss:$16 sps:$4 sm:$0xff]   ;;  %v9208_v38 = vld [vmem:[#allocation11 + $0x64] ss:$12 sps:$4 sm:$0xff]  }
 0x607   : > { %6065 = vmatprep.mubr.bf16.mxu1 %v10602_v40  ;;  %v9145_v40 = vld [vmem:[#allocation10 + $0xc] ss:$16 sps:$4 sm:$0xff]  }
 0x608   : > { %5987 = vmatpush1.bf16.msra.mxu0 %v9119_v39  ;;  %v9247_v0 = vld [vmem:[#allocation11 + $0x22c] ss:$12 sps:$4 sm:$0xff]   ;;  %v9245_v39 = vld [vmem:[#allocation11 + $0x228] ss:$12 sps:$4 sm:$0xff]  }
 0x609   : > { %6040 = vmatpush1.bf16.msra.mxu1 %v9122_v42  ;;  %5988 = vmatprep.subr.bf16.mxu0 %v9127_v43  ;;  %v9252_v42 = vld [vmem:[#allocation11 + $0x214] ss:$12 sps:$4 sm:$0xff]   ;;  %v9250_v43 = vld [vmem:[#allocation11 + $0x210] ss:$12 sps:$4 sm:$0xff]  }
 0x60a   : > { %6041 = vmatprep.subr.bf16.mxu1 %v9130_v45  ;;  %v9212_v45 = vld [vmem:[#allocation11 + $0x30] ss:$12 sps:$4 sm:$0xff]  }
 0x60c   : > { %5989 = vmatpush1.bf16.msra.mxu0 %v9125_v48  ;;  %v9255_v48 = vld [vmem:[#allocation11 + $0x1f8] ss:$12 sps:$4 sm:$0xff]  }
 0x60d   : > { %6042 = vmatpush1.bf16.msra.mxu1 %v9128_v16  ;;  %5990 = vmatprep.subr.bf16.mxu0 %v9133_v41  ;;  %v9215_v16 = vld [vmem:[#allocation11 + $0x18] ss:$12 sps:$4 sm:$0xff]  }
 0x60e   : > { %6043 = vmatprep.subr.bf16.mxu1 %v9136_v54  ;;  %v9220_v41 = vld [vmem:[#allocation11 + $0x4] ss:$12 sps:$4 sm:$0xff]   ;;  %v9260_v54 = vld [vmem:[#allocation11 + $0x1e0] ss:$12 sps:$4 sm:$0xff]  }
 0x610   : > { %5991 = vmatpush1.bf16.msra.mxu0 %v9131_v51  ;;  %v9262_v51 = vld [vmem:[#allocation11 + $0x1e4] ss:$12 sps:$4 sm:$0xff]  }
 0x611   : > { %6044 = vmatpush1.bf16.msra.mxu1 %v9134_v62  ;;  %5992 = vmatprep.subr.bf16.mxu0 %v9139_v63  ;;  %v9218_v62 = vld [vmem:[#allocation11] ss:$12 sps:$4 sm:$0xff]  }
 0x612   : > { %6045 = vmatprep.subr.bf16.mxu1 %v9142_v2  ;;  %v9223_v63 = vld [vmem:[#allocation11 + $0x16c] ss:$12 sps:$4 sm:$0xff]   ;;  %v9265_v2 = vld [vmem:[#allocation11 + $0x1c8] ss:$12 sps:$4 sm:$0xff]  }
 0x614   : > { %5993 = vmatpush1.bf16.msra.mxu0 %v9137_v7  ;;  %v9267_v7 = vld [vmem:[#allocation11 + $0x1cc] ss:$12 sps:$4 sm:$0xff]  }
 0x615   : > { %6046 = vmatpush1.bf16.msra.mxu1 %v9140_v49  ;;  %5994 = vmatprep.subr.bf16.mxu0 %v9145_v40  ;;  %v9221_v49 = vld [vmem:[#allocation11 + $0x168] ss:$12 sps:$4 sm:$0xff]  }
 0x616   : > { %6047 = vmatprep.subr.bf16.mxu1 %v9148_v53  ;;  %v9226_v40 = vld [vmem:[#allocation11 + $0x154] ss:$12 sps:$4 sm:$0xff]   ;;  %v9270_v53 = vld [vmem:[#allocation11 + $0x1b0] ss:$12 sps:$4 sm:$0xff]  }
 0x618   : > { %5995 = vmatpush1.bf16.msra.mxu0 %v9143_v60  ;;  %v9272_v60 = vld [vmem:[#allocation11 + $0x1b4] ss:$12 sps:$4 sm:$0xff]  }
 0x619   : > { %6048 = vmatpush1.bf16.msra.mxu1 %v9146_v59  ;;  %5996 = vmatprep.subr.bf16.mxu0 %v9151_v61  ;;  %v9224_v59 = vld [vmem:[#allocation11 + $0x150] ss:$12 sps:$4 sm:$0xff]  }
 0x61a   : > { %6049 = vmatprep.subr.bf16.mxu1 %v9154_v9  ;;  %v9229_v61 = vld [vmem:[#allocation11 + $0x13c] ss:$12 sps:$4 sm:$0xff]   ;;  %v9275_v9 = vld [vmem:[#allocation11 + $0x198] ss:$12 sps:$4 sm:$0xff]  }
 0x61c   : > { %5997 = vmatpush2.bf16.msra.mxu0 %v9149_v5  ;;  %v9277_v5 = vld [vmem:[#allocation11 + $0x19c] ss:$12 sps:$4 sm:$0xff]  }
 0x61d   : > { %6050 = vmatpush2.bf16.msra.mxu1 %v9152_v6  ;;  %5998 = vmatprep.subr.bf16.mxu0 %v9157_v27  ;;  %v9227_v6 = vld [vmem:[#allocation11 + $0x138] ss:$12 sps:$4 sm:$0xff]  }
 0x61e   : > { %6051 = vmatprep.subr.bf16.mxu1 %v9160_v4  ;;  %v9232_v27 = vld [vmem:[#allocation11 + $0x124] ss:$12 sps:$4 sm:$0xff]   ;;  %v9280_v4 = vld [vmem:[#allocation11 + $0x180] ss:$12 sps:$4 sm:$0xff]  }
 0x620   : > { %5999 = vmatpush2.bf16.msra.mxu0 %v9155_v13  ;;  %v9282_v13 = vld [vmem:[#allocation11 + $0x184] ss:$12 sps:$4 sm:$0xff]  }
 0x621   : > { %6052 = vmatpush2.bf16.msra.mxu1 %v9158_v1  ;;  %6000 = vmatprep.subr.bf16.mxu0 %v9163_v8  ;;  %v9230_v1 = vld [vmem:[#allocation11 + $0x120] ss:$12 sps:$4 sm:$0xff]  }
 0x622   : > { %6053 = vmatprep.subr.bf16.mxu1 %v9166_v10  ;;  %v9235_v8 = vld [vmem:[#allocation11 + $0x10c] ss:$12 sps:$4 sm:$0xff]   ;;  %v9285_v10 = vld [vmem:[#allocation11 + $0x2e8] ss:$12 sps:$4 sm:$0xff]  }
 0x624   : > { %6001 = vmatpush2.bf16.msra.mxu0 %v9161_v44  ;;  %v9287_v44 = vld [vmem:[#allocation11 + $0x2ec] ss:$12 sps:$4 sm:$0xff]  }
 0x625   : > { %6054 = vmatpush2.bf16.msra.mxu1 %v9164_v52  ;;  %6002 = vmatprep.subr.bf16.mxu0 %v9169_v12  ;;  %v9233_v52 = vld [vmem:[#allocation11 + $0x108] ss:$12 sps:$4 sm:$0xff]  }
 0x626   : > { %6055 = vmatprep.subr.bf16.mxu1 %v9172_v57  ;;  %v9290_v12 = vld [vmem:[#allocation11 + $0x2d4] ss:$12 sps:$4 sm:$0xff]  }
 0x627   : > { %v9238_v57 = vld [vmem:[#allocation11 + $0xf4] ss:$12 sps:$4 sm:$0xff]  }
 0x628   : > { %6003 = vmatpush2.bf16.msra.mxu0 %v9167_v37  ;;  %v9288_v37 = vld [vmem:[#allocation11 + $0x2d0] ss:$12 sps:$4 sm:$0xff]  }
 0x629   : > { %6056 = vmatpush2.bf16.msra.mxu1 %v9170_v50  ;;  %6004 = vmatprep.subr.bf16.mxu0 %v9175_v14  ;;  %v9293_v50 = vld [vmem:[#allocation11 + $0x2bc] ss:$12 sps:$4 sm:$0xff]  }
 0x62a   : > { %6057 = vmatprep.subr.bf16.mxu1 %v9178_v15  ;;  %v9236_v14 = vld [vmem:[#allocation11 + $0xf0] ss:$12 sps:$4 sm:$0xff]  }
 0x62b   : > { %v9241_v15 = vld [vmem:[#allocation11 + $0xdc] ss:$12 sps:$4 sm:$0xff]  }
 0x62c   : > { %6005 = vmatpush2.bf16.msra.mxu0 %v9173_v18  ;;  %v9291_v18 = vld [vmem:[#allocation11 + $0x2b8] ss:$12 sps:$4 sm:$0xff]  }
 0x62d   : > { %6058 = vmatpush2.bf16.msra.mxu1 %v9176_v46  ;;  %6006 = vmatprep.subr.bf16.mxu0 %v9181_v19  ;;  %v9296_v46 = vld [vmem:[#allocation11 + $0x2a4] ss:$12 sps:$4 sm:$0xff]  }
 0x62e   : > { %6059 = vmatprep.subr.bf16.mxu1 %v9184_v20  ;;  %v9239_v19 = vld [vmem:[#allocation11 + $0xd8] ss:$12 sps:$4 sm:$0xff]  }
 0x62f   : > { %v9244_v20 = vld [vmem:[#allocation11 + $0xc4] ss:$12 sps:$4 sm:$0xff]  }
 0x630   : > { %6007 = vmatpush2.bf16.msra.mxu0 %v9179_v58  ;;  %v9294_v58 = vld [vmem:[#allocation11 + $0x2a0] ss:$12 sps:$4 sm:$0xff]  }
 0x631   : > { %6060 = vmatpush2.bf16.msra.mxu1 %v9182_v56  ;;  %6008 = vmatprep.subr.bf16.mxu0 %v9187_v23  ;;  %v9299_v56 = vld [vmem:[#allocation11 + $0x28c] ss:$12 sps:$4 sm:$0xff]  }
 0x632   : > { %6061 = vmatprep.subr.bf16.mxu1 %v9190_v33  ;;  %v9242_v23 = vld [vmem:[#allocation11 + $0xc0] ss:$12 sps:$4 sm:$0xff]   ;;  %v9248_v33 = vld [vmem:[#allocation11 + $0x170] ss:$12 sps:$4 sm:$0xff]  }
 0x634   : > { %6009 = vmatpush2.bf16.msra.mxu0 %v9185_v24  ;;  %v9297_v24 = vld [vmem:[#allocation11 + $0x288] ss:$12 sps:$4 sm:$0xff]  }
 0x635   : > { %6062 = vmatpush2.bf16.msra.mxu1 %v9188_v26  ;;  %6010 = vmatprep.subr.bf16.mxu0 %v9193_v11  ;;  %v9302_v26 = vld [vmem:[#allocation11 + $0x274] ss:$12 sps:$4 sm:$0xff]   ;;  %v9300_v11 = vld [vmem:[#allocation11 + $0x270] ss:$12 sps:$4 sm:$0xff]  }
 0x636   : > { %6063 = vmatprep.subr.bf16.mxu1 %v9196_v55  ;;  %v9305_v55 = vld [vmem:[#allocation11 + $0x25c] ss:$12 sps:$4 sm:$0xff]  }
 0x638   : > { %6011 = vmatpush2.bf16.msra.mxu0 %v9191_v3  ;;  %v9303_v3 = vld [vmem:[#allocation11 + $0x258] ss:$12 sps:$4 sm:$0xff]  }
 0x639   : > { %6064 = vmatpush2.bf16.msra.mxu1 %v9194_v29  ;;  %6750 = vmatprep.subr.bf16.mxu0 %v9199_v30  ;;  %v9308_v29 = vld [vmem:[#allocation11 + $0x244] ss:$12 sps:$4 sm:$0xff]   ;;  %v9306_v30 = vld [vmem:[#allocation11 + $0x240] ss:$12 sps:$4 sm:$0xff]  }
 0x63a   : > { %6803 = vmatprep.subr.bf16.mxu1 %v9247_v0 }
 0x63b   : > { %6013 = vmatmul.mubr.bf16.vlgmr.msra.gmra.mxu0 %v10614_v22  ;;  %v9206_v22 = vld [vmem:[#allocation11 + $0x60] ss:$12 sps:$4 sm:$0xff]  }
 0x63c   : > { %6066 = vmatmul.mubr.bf16.vlgmr.msra.gmra.mxu1 %v10616_v21  ;;  %6022 = vmatprep.mubr.bf16.mxu0 %v10618_v28  ;;  %v9211_v21 = vld [vmem:[#allocation11 + $0x4c] ss:$12 sps:$4 sm:$0xff]   ;;  %v9209_v28 = vld [vmem:[#allocation11 + $0x48] ss:$12 sps:$4 sm:$0xff]  }
 0x63d   : > { %6075 = vmatprep.mubr.bf16.mxu1 %v10620_v17  ;;  %6751 = vmatpush1.bf16.msra.mxu0 %v9197_v31  ;;  %v9214_v17 = vld [vmem:[#allocation11 + $0x34] ss:$12 sps:$4 sm:$0xff]   ;;  %v9309_v31 = vld [vmem:[#allocation11 + $0x2f0] ss:$12 sps:$4 sm:$0xff]  }
 0x63e   : > { %6752 = vmatprep.subr.bf16.mxu0 %v9202_v34  ;;  %6804 = vmatpush1.bf16.msra.mxu1 %v9245_v39 }
 0x63f   : > { %6805 = vmatprep.subr.bf16.mxu1 %v9252_v42 }
 0x641   : > { %6753 = vmatpush1.bf16.msra.mxu0 %v9200_v35 }
 0x642   : > { %6754 = vmatprep.subr.bf16.mxu0 %v9205_v47  ;;  %6806 = vmatpush1.bf16.msra.mxu1 %v9250_v43 }
 0x643   : > { %6023 = vmatmul.mubr.bf16.gmra.mxu0 %v10630_v25  ;;  %v9217_v25 = vld [vmem:[#allocation11 + $0x1c] ss:$12 sps:$4 sm:$0xff]  }
 0x644   : > { %6076 = vmatmul.mubr.bf16.gmra.mxu1 %v10632_v32  ;;  %v9257_v32 = vld [vmem:[#allocation11 + $0x1fc] ss:$12 sps:$4 sm:$0xff]  }
 0x645   : > { %6755 = vmatpush1.bf16.msra.mxu0 %v9203_v36  ;;  %6807 = vmatprep.subr.bf16.mxu1 %v9257_v32 }
 0x646   : > { %6756 = vmatprep.subr.bf16.mxu0 %v9208_v38  ;;  %6808 = vmatpush1.bf16.msra.mxu1 %v9255_v48 }
 0x647   : > { %6809 = vmatprep.subr.bf16.mxu1 %v9262_v51 }
 0x649   : > { %6757 = vmatpush1.bf16.msra.mxu0 %v9206_v22 }
 0x64a   : > { %6758 = vmatprep.subr.bf16.mxu0 %v9211_v21  ;;  %6810 = vmatpush1.bf16.msra.mxu1 %v9260_v54 }
 0x64b   : > { %6811 = vmatprep.subr.bf16.mxu1 %v9267_v7 }
 0x64d   : > { %6759 = vmatpush1.bf16.msra.mxu0 %v9209_v28 }
 0x64e   : > { %6760 = vmatprep.subr.bf16.mxu0 %v9214_v17  ;;  %6812 = vmatpush1.bf16.msra.mxu1 %v9265_v2  ;;  %v9249_v2 = vld [vmem:[#allocation11 + $0xb0] ss:$12 sps:$4 sm:$0xff]  }
 0x64f   : > { %6813 = vmatprep.subr.bf16.mxu1 %v9272_v60 }
 0x651   : > { %6761 = vmatpush1.bf16.msra.mxu0 %v9212_v45 }
 0x652   : > { %6762 = vmatprep.subr.bf16.mxu0 %v9217_v25  ;;  %6814 = vmatpush1.bf16.msra.mxu1 %v9270_v53  ;;  %v9253_v53 = vld [vmem:[#allocation11 + $0x158] ss:$12 sps:$4 sm:$0xff]  }
 0x653   : > { %6815 = vmatprep.subr.bf16.mxu1 %v9277_v5 }
 0x655   : > { %6763 = vmatpush1.bf16.msra.mxu0 %v9215_v16 }
 0x656   : > { %6764 = vmatprep.subr.bf16.mxu0 %v9220_v41  ;;  %6816 = vmatpush1.bf16.msra.mxu1 %v9275_v9 }
 0x657   : > { %6817 = vmatprep.subr.bf16.mxu1 %v9282_v13  ;;  %v9258_v13 = vld [vmem:[#allocation11 + $0x140] ss:$12 sps:$4 sm:$0xff]  }
 0x659   : > { %6765 = vmatpush1.bf16.msra.mxu0 %v9218_v62 }
 0x65a   : > { %6766 = vmatprep.subr.bf16.mxu0 %v9223_v63  ;;  %6818 = vmatpush1.bf16.msra.mxu1 %v9280_v4  ;;  %v9254_v4 = vld [vmem:[#allocation11 + $0x98] ss:$12 sps:$4 sm:$0xff]  }
 0x65b   : > { %6819 = vmatprep.subr.bf16.mxu1 %v9287_v44  ;;  %v9259_v44 = vld [vmem:[#allocation11 + $0x80] ss:$12 sps:$4 sm:$0xff]  }
 0x65d   : > { %6767 = vmatpush2.bf16.msra.mxu0 %v9221_v49 }
 0x65e   : > { %6768 = vmatprep.subr.bf16.mxu0 %v9226_v40  ;;  %6820 = vmatpush2.bf16.msra.mxu1 %v9285_v10 }
 0x65f   : > { %6821 = vmatprep.subr.bf16.mxu1 %v9290_v12  ;;  %v9264_v12 = vld [vmem:[#allocation11 + $0x68] ss:$12 sps:$4 sm:$0xff]  }
 0x661   : > { %6769 = vmatpush2.bf16.msra.mxu0 %v9224_v59 }
 0x662   : > { %6770 = vmatprep.subr.bf16.mxu0 %v9229_v61  ;;  %6822 = vmatpush2.bf16.msra.mxu1 %v9288_v37  ;;  %v9269_v37 = vld [vmem:[#allocation11 + $0x50] ss:$12 sps:$4 sm:$0xff]  }
 0x663   : > { %6823 = vmatprep.subr.bf16.mxu1 %v9293_v50  ;;  %v9273_v50 = vld [vmem:[#allocation11 + $0xf8] ss:$12 sps:$4 sm:$0xff]  }
 0x665   : > { %6771 = vmatpush2.bf16.msra.mxu0 %v9227_v6 }
 0x666   : > { %6772 = vmatprep.subr.bf16.mxu0 %v9232_v27  ;;  %6824 = vmatpush2.bf16.msra.mxu1 %v9291_v18  ;;  %v9279_v18 = vld [vmem:[#allocation11 + $0x20] ss:$12 sps:$4 sm:$0xff]  }
 0x667   : > { %6825 = vmatprep.subr.bf16.mxu1 %v9296_v46  ;;  %v9283_v46 = vld [vmem:[#allocation11 + $0xc8] ss:$12 sps:$4 sm:$0xff]  }
 0x669   : > { %6773 = vmatpush2.bf16.msra.mxu0 %v9230_v1 }
 0x66a   : > { %6774 = vmatprep.subr.bf16.mxu0 %v9235_v8  ;;  %6826 = vmatpush2.bf16.msra.mxu1 %v9294_v58 }
 0x66b   : > { %6827 = vmatprep.subr.bf16.mxu1 %v9299_v56 }
 0x66d   : > { %6775 = vmatpush2.bf16.msra.mxu0 %v9233_v52  ;;  %v9263_v52 = vld [vmem:[#allocation11 + $0x128] ss:$12 sps:$4 sm:$0xff]  }
 0x66e   : > { %6776 = vmatprep.subr.bf16.mxu0 %v9238_v57  ;;  %6828 = vmatpush2.bf16.msra.mxu1 %v9297_v24  ;;  %v9268_v57 = vld [vmem:[#allocation11 + $0x110] ss:$12 sps:$4 sm:$0xff]  }
 0x66f   : > { %6829 = vmatprep.subr.bf16.mxu1 %v9302_v26 }
 0x671   : > { %6777 = vmatpush2.bf16.msra.mxu0 %v9236_v14  ;;  %v9274_v14 = vld [vmem:[#allocation11 + $0x38] ss:$12 sps:$4 sm:$0xff]  }
 0x672   : > { %6778 = vmatprep.subr.bf16.mxu0 %v9241_v15  ;;  %6830 = vmatpush2.bf16.msra.mxu1 %v9300_v11  ;;  %v9278_v15 = vld [vmem:[#allocation11 + $0xe0] ss:$12 sps:$4 sm:$0xff]  }
 0x673   : > { %6831 = vmatprep.subr.bf16.mxu1 %v9305_v55 }
 0x675   : > { %6779 = vmatpush2.bf16.msra.mxu0 %v9239_v19  ;;  %v9284_v19 = vld [vmem:[#allocation11 + $0x8] ss:$12 sps:$4 sm:$0xff]  }
 0x676   : > { %6780 = vmatprep.subr.bf16.mxu0 %v9244_v20  ;;  %6832 = vmatpush2.bf16.msra.mxu1 %v9303_v3 }
 0x677   : > { %6833 = vmatprep.subr.bf16.mxu1 %v9308_v29 }
 0x679   : > { %6781 = vmatpush2.bf16.msra.mxu0 %v9242_v23 }
 0x67a   : > { %7978 = vmatprep.subr.bf16.mxu0 %v9248_v33  ;;  %6834 = vmatpush2.bf16.msra.mxu1 %v9306_v30 }
 0x67b   : > { %8006 = vmatprep.subr.bf16.mxu1 %v9309_v31 }
 0x6bb   : > { %v5908_v34 = vpop.f32.mrf.mxu0 }
 0x6bc   : > { %v5961_v35 = vpop.f32.mrf.mxu1 }
 0x6bd   : > { %v5910_v47 = vpop.f32.mrf.mxu0  ;;  %v5962_v39 = vadd.f32 %v5961_v35, %v5908_v34 }
 0x6be   : > { %v5963_v36 = vpop.f32.mrf.mxu1 }
 0x6bf   : > { %v5912_v38 = vpop.f32.mrf.mxu0  ;;  %v5964_v21 = vadd.f32 %v5963_v36, %v5910_v47  ;;  %v6086_v16 = vmax.f32 %v5962_v39, 0.0 }
 0x6c0   : > { %v5965_v22 = vpop.f32.mrf.mxu1 }
 0x6c1   : > { %v5966_v0 = vadd.f32 %v5965_v22, %v5912_v38  ;;  %v5914_v28 = vpop.f32.mrf.mxu0  ;;  %v6087_v32 = vmax.f32 %v5964_v21, 0.0 }
 0x6c2   : > { %v5967_v17 = vpop.f32.mrf.mxu1 }
 0x6c3   : > { %v5968_v42 = vadd.f32 %v5967_v17, %v5914_v28  ;;  %v6090_v43 = vmax.f32 %v5966_v0, 0.0  ;;  %v5918_v45 = vpop.f32.mrf.mxu0  ;;  %v9310_v17 = vld [vmem:[#allocation11 + $0x230] ss:$12 sps:$4 sm:$0xff]  }
 0x6c4   : > { %v5971_v25 = vpop.f32.mrf.mxu1 }
 0x6c5   : > { %v6091_v48 = vmax.f32 %v5968_v42, 0.0  ;;  %v5972_v41 = vadd.f32 %v5971_v25, %v5918_v45  ;;  %v5920_v54 = vpop.f32.mrf.mxu0  ;;  %v6102_v7 = vpack.c.bf16 %v6090_v43, %v6086_v16  ;;  %v9311_v25 = vld [vmem:[#allocation11 + $0x2d8] ss:$12 sps:$4 sm:$0xff]  }
 0x6c6   : > { %v5973_v51 = vpop.f32.mrf.mxu1 }
 0x6c7   : > { %v6103_v62 = vpack.c.bf16 %v6091_v48, %v6087_v32  ;;  %v5974_v63 = vadd.f32 %v5973_v51, %v5920_v54  ;;  %v5922_v49 = vpop.f32.mrf.mxu0  ;;  %v6094_v59 = vmax.f32 %v5972_v41, 0.0 }
 0x6c8   : > { %v5975_v40 = vpop.f32.mrf.mxu1 }
 0x6c9   : > { %v5976_v60 = vadd.f32 %v5975_v40, %v5922_v49  ;;  %6782 = vmatprep.mubr.bf16.mxu0 %v6103_v62  ;;  %v5924_v61 = vpop.f32.mrf.mxu0  ;;  %v6095_v5 = vmax.f32 %v5974_v63, 0.0  ;;  %v9312_v63 = vld [vmem:[#allocation11 + $0x218] ss:$12 sps:$4 sm:$0xff]  }
 0x6ca   : > { %v5977_v9 = vpop.f32.mrf.mxu1  ;;  %6783 = vmatmul.mubr.bf16.vlgmr.msra.gmra.mxu0 %v6102_v7 }
 0x6cb   : > { %v6098_v6 = vmax.f32 %v5976_v60, 0.0  ;;  %v5978_v27 = vadd.f32 %v5977_v9, %v5924_v61  ;;  %7979 = vmatpush3.bf16.msra.mxu0 %v9249_v2  ;;  %v9313_v2 = vld [vmem:[#allocation11 + $0x2c0] ss:$12 sps:$4 sm:$0xff]   ;;  %v9315_v60 = vld [vmem:[#allocation11 + $0x2a8] ss:$12 sps:$4 sm:$0xff]  }
 0x6cc   : > { %7980 = vmatprep.subr.bf16.mxu0 %v9253_v53  ;;  %v9314_v53 = vld [vmem:[#allocation11 + $0x200] ss:$12 sps:$4 sm:$0xff]   ;;  %v9317_v61 = vld [vmem:[#allocation11 + $0x290] ss:$12 sps:$4 sm:$0xff]  }
 0x6cd   : > { %v6099_v1 = vmax.f32 %v5978_v27, 0.0  ;;  %v6106_v8 = vpack.c.bf16 %v6098_v6, %v6094_v59  ;;  %v9316_v59 = vld [vmem:[#allocation11 + $0x1e8] ss:$12 sps:$4 sm:$0xff]   ;;  %v9318_v9 = vld [vmem:[#allocation11 + $0x1d0] ss:$12 sps:$4 sm:$0xff]  }
 0x6ce   : > { %v9320_v6 = vld [vmem:[#allocation11 + $0x1b8] ss:$12 sps:$4 sm:$0xff]   ;;  %v9321_v27 = vld [vmem:[#allocation11 + $0x260] ss:$12 sps:$4 sm:$0xff]  }
 0x6cf   : > { %v6107_v10 = vpack.c.bf16 %v6099_v1, %v6095_v5  ;;  %7981 = vmatpush3.bf16.msra.mxu0 %v9254_v4  ;;  %v9319_v5 = vld [vmem:[#allocation11 + $0x278] ss:$12 sps:$4 sm:$0xff]   ;;  %v9322_v4 = vld [vmem:[#allocation11 + $0x1a0] ss:$12 sps:$4 sm:$0xff]   ;;  %v9324_v1 = vld [vmem:[#allocation11 + $0x188] ss:$12 sps:$4 sm:$0xff]  }
 0x6d0   : > { %7982 = vmatprep.subr.bf16.mxu0 %v9258_v13  ;;  %v9323_v13 = vld [vmem:[#allocation11 + $0x248] ss:$12 sps:$4 sm:$0xff]  }
 0x6d1   : > { %6792 = vmatprep.mubr.bf16.mxu0 %v6107_v10 }
 0x6d2   : > { %6793 = vmatmul.mubr.bf16.gmra.mxu0 %v6106_v8 }
 0x6d3   : > { %7983 = vmatpush3.bf16.msra.mxu0 %v9259_v44  ;;  %6888 = vmatprep.mubr.bf16.mxu0 %v6103_v62 }
 0x6d4   : > { %7984 = vmatprep.subr.bf16.mxu0 %v9263_v52 }
 0x6d7   : > { %7985 = vmatpush3.bf16.msra.mxu0 %v9264_v12 }
 0x6d8   : > { %7986 = vmatprep.subr.bf16.mxu0 %v9268_v57 }
 0x6db   : > { %7987 = vmatpush3.bf16.msra.mxu0 %v9269_v37 }
 0x6dc   : > { %7988 = vmatprep.subr.bf16.mxu0 %v9273_v50 }
 0x6df   : > { %7989 = vmatpush3.bf16.msra.mxu0 %v9274_v14 }
 0x6e0   : > { %7990 = vmatprep.subr.bf16.mxu0 %v9278_v15 }
 0x6e3   : > { %7991 = vmatpush3.bf16.msra.mxu0 %v9279_v18 }
 0x6e4   : > { %7992 = vmatprep.subr.bf16.mxu0 %v9283_v46 }
 0x6e7   : > { %7993 = vmatpush3.bf16.msra.mxu0 %v9284_v19 }
 0x6ea   : > { %6889 = vmatmul.mubr.bf16.vlgmr.msra.gmra.mxu0 %v6102_v7 }
 0x6eb   : > { %6896 = vmatprep.mubr.bf16.mxu0 %v6107_v10 }
 0x6f2   : > { %6897 = vmatmul.mubr.bf16.gmra.mxu0 %v6106_v8 }
 0x6fb   : > { %v6014_v20 = vpop.f32.mrf.mxu0 }
 0x6fc   : > { %v6067_v58 = vpop.f32.mrf.mxu1 }
 0x6fd   : > { %v6016_v56 = vpop.f32.mrf.mxu0  ;;  %v6068_v55 = vadd.f32 %v6067_v58, %v6014_v20 }
 0x6fe   : > { %v6069_v23 = vpop.f32.mrf.mxu1 }
 0x6ff   : > { %v6018_v33 = vpop.f32.mrf.mxu0  ;;  %v6070_v26 = vadd.f32 %v6069_v23, %v6016_v56  ;;  %v6088_v38 = vmax.f32 %v6068_v55, 0.0 }
 0x700   : > { %v6071_v24 = vpop.f32.mrf.mxu1 }
 0x701   : > { %v6072_v11 = vadd.f32 %v6071_v24, %v6018_v33  ;;  %v6020_v3 = vpop.f32.mrf.mxu0  ;;  %v6089_v47 = vmax.f32 %v6070_v26, 0.0 }
 0x702   : > { %v6073_v29 = vpop.f32.mrf.mxu1 }
 0x703   : > { %v6074_v30 = vadd.f32 %v6073_v29, %v6020_v3  ;;  %v6092_v31 = vmax.f32 %v6072_v11, 0.0  ;;  %v6024_v34 = vpop.f32.mrf.mxu0 }
 0x704   : > { %v6077_v35 = vpop.f32.mrf.mxu1 }
 0x705   : > { %v6093_v36 = vmax.f32 %v6074_v30, 0.0  ;;  %v6078_v22 = vadd.f32 %v6077_v35, %v6024_v34  ;;  %v6026_v21 = vpop.f32.mrf.mxu0  ;;  %v6104_v42 = vpack.c.bf16 %v6092_v31, %v6088_v38 }
 0x706   : > { %v6079_v0 = vpop.f32.mrf.mxu1 }
 0x707   : > { %v6105_v39 = vpack.c.bf16 %v6093_v36, %v6089_v47  ;;  %v6080_v28 = vadd.f32 %v6079_v0, %v6026_v21  ;;  %v6028_v43 = vpop.f32.mrf.mxu0  ;;  %v6096_v48 = vmax.f32 %v6078_v22, 0.0 }
 0x708   : > { %v6081_v45 = vpop.f32.mrf.mxu1 }
 0x709   : > { %v6082_v32 = vadd.f32 %v6081_v45, %v6028_v43  ;;  %6835 = vmatprep.mubr.bf16.mxu1 %v6105_v39  ;;  %v6030_v16 = vpop.f32.mrf.mxu0  ;;  %v6097_v54 = vmax.f32 %v6080_v28, 0.0 }
 0x70a   : > { %v6083_v41 = vpop.f32.mrf.mxu1  ;;  %6836 = vmatmul.mubr.bf16.vlgmr.msra.gmra.mxu1 %v6104_v42 }
 0x70b   : > { %v6100_v51 = vmax.f32 %v6082_v32, 0.0  ;;  %v6084_v62 = vadd.f32 %v6083_v41, %v6030_v16  ;;  %8007 = vmatpush3.bf16.msra.mxu1 %v9310_v17 }
 0x70c   : > { %8008 = vmatprep.subr.bf16.mxu1 %v9311_v25 }
 0x70d   : > { %v6101_v7 = vmax.f32 %v6084_v62, 0.0  ;;  %v6108_v49 = vpack.c.bf16 %v6100_v51, %v6096_v48 }
 0x70f   : > { %v6109_v40 = vpack.c.bf16 %v6101_v7, %v6097_v54  ;;  %8009 = vmatpush3.bf16.msra.mxu1 %v9312_v63 }
 0x710   : > { %8010 = vmatprep.subr.bf16.mxu1 %v9313_v2 }
 0x711   : > { %6845 = vmatprep.mubr.bf16.mxu1 %v6109_v40 }
 0x712   : > { %6846 = vmatmul.mubr.bf16.gmra.mxu1 %v6108_v49 }
 0x713   : > { %8011 = vmatpush3.bf16.msra.mxu1 %v9314_v53  ;;  %6937 = vmatprep.mubr.bf16.mxu1 %v6105_v39 }
 0x714   : > { %8012 = vmatprep.subr.bf16.mxu1 %v9315_v60 }
 0x717   : > { %8013 = vmatpush3.bf16.msra.mxu1 %v9316_v59 }
 0x718   : > { %8014 = vmatprep.subr.bf16.mxu1 %v9317_v61 }
 0x71b   : > { %8015 = vmatpush3.bf16.msra.mxu1 %v9318_v9 }
 0x71c   : > { %8016 = vmatprep.subr.bf16.mxu1 %v9319_v5 }
 0x71f   : > { %8017 = vmatpush3.bf16.msra.mxu1 %v9320_v6 }
 0x720   : > { %8018 = vmatprep.subr.bf16.mxu1 %v9321_v27 }
 0x723   : > { %8019 = vmatpush3.bf16.msra.mxu1 %v9322_v4 }
 0x724   : > { %8020 = vmatprep.subr.bf16.mxu1 %v9323_v13 }
 0x727   : > { %8021 = vmatpush3.bf16.msra.mxu1 %v9324_v1 }
 0x72a   : > { %6938 = vmatmul.mubr.bf16.vlgmr.msra.gmra.mxu1 %v6104_v42 }
 0x72b   : > { %6945 = vmatprep.mubr.bf16.mxu1 %v6109_v40 }
 0x732   : > { %6946 = vmatmul.mubr.bf16.gmra.mxu1 %v6108_v49 }
 0x78a   : > { %v6784_v8 = vpop.f32.mrf.mxu0 }
 0x78c   : > { %v6786_v10 = vpop.f32.mrf.mxu0 }
 0x78e   : > { %v6788_v44 = vpop.f32.mrf.mxu0 }
 0x790   : > { %v6790_v52 = vpop.f32.mrf.mxu0 }
 0x792   : > { %v6794_v37 = vpop.f32.mrf.mxu0 }
 0x794   : > { %v6796_v46 = vpop.f32.mrf.mxu0 }
 0x796   : > { %v6798_v23 = vpop.f32.mrf.mxu0 }
 0x798   : > { %v6800_v55 = vpop.f32.mrf.mxu0 }
 0x7aa   : > { %v7994_v30 = vpop.f32.mrf.mxu0 }
 0x7ac   : > { %v7995_v31 = vpop.f32.mrf.mxu0 }
 0x7ad   : > { %v7996_v22 = vadd.f32 %v7995_v31, %v7994_v30 }
 0x7ae   : > { %v7997_v34 = vpop.f32.mrf.mxu0 }
 0x7b0   : > { %v7998_v35 = vpop.f32.mrf.mxu0 }
 0x7b1   : > { %v7999_v42 = vadd.f32 %v7998_v35, %v7997_v34 }
 0x7b2   : > { %v8000_v47 = vpop.f32.mrf.mxu0 }
 0x7b4   : > { %v8001_v0 = vpop.f32.mrf.mxu0 }
 0x7b5   : > { %v8002_v16 = vadd.f32 %v8001_v0, %v8000_v47 }
 0x7b6   : > { %v8003_v45 = vpop.f32.mrf.mxu0 }
 0x7b8   : > { %v8004_v54 = vpop.f32.mrf.mxu0 }
 0x7b9   : > { %v8005_v2 = vadd.f32 %v8004_v54, %v8003_v45 }
 0x7ca   : > { %v6837_v12 = vpop.f32.mrf.mxu1 }
 0x7cb   : > { %v6838_v57 = vadd.f32 %v6837_v12, %v6784_v8 }
 0x7cc   : > { %v6839_v50 = vpop.f32.mrf.mxu1 }
 0x7cd   : > { %6954 = vst [vmem:[%s10700_s7] sm:$0xff] %v6838_v57  ;;  %v6840_v14 = vadd.f32 %v6839_v50, %v6786_v10 }
 0x7ce   : > { %v6841_v15 = vpop.f32.mrf.mxu1 }
 0x7cf   : > { %6955 = vst [vmem:[%s10700_s7 + $0x8] sm:$0xff] %v6840_v14  ;;  %v6842_v18 = vadd.f32 %v6841_v15, %v6788_v44 }
 0x7d0   : > { %v6843_v19 = vpop.f32.mrf.mxu1 }
 0x7d1   : > { %6957 = vst [vmem:[%s10700_s7 + $0x18] sm:$0xff] %v6842_v18  ;;  %v6844_v20 = vadd.f32 %v6843_v19, %v6790_v52 }
 0x7d2   : > { %v6847_v58 = vpop.f32.mrf.mxu1 }
 0x7d3   : > { %6958 = vst [vmem:[%s10700_s7 + $0x20] sm:$0xff] %v6844_v20  ;;  %v6848_v56 = vadd.f32 %v6847_v58, %v6794_v37 }
 0x7d4   : > { %v6849_v33 = vpop.f32.mrf.mxu1 }
 0x7d5   : > { %6960 = vst [vmem:[%s10700_s7 + $0x30] sm:$0xff] %v6848_v56  ;;  %v6850_v24 = vadd.f32 %v6849_v33, %v6796_v46 }
 0x7d6   : > { %v6851_v26 = vpop.f32.mrf.mxu1 }
 0x7d7   : > { %6961 = vst [vmem:[%s10700_s7 + $0x38] sm:$0xff] %v6850_v24  ;;  %v6852_v11 = vadd.f32 %v6851_v26, %v6798_v23 }
 0x7d8   : > { %v6853_v3 = vpop.f32.mrf.mxu1 }
 0x7d9   : > { %6963 = vst [vmem:[%s10700_s7 + $0x48] sm:$0xff] %v6852_v11  ;;  %v6854_v29 = vadd.f32 %v6853_v3, %v6800_v55 }
 0x7db   : > { %6964 = vst [vmem:[%s10700_s7 + $0x50] sm:$0xff] %v6854_v29 }
 0x7ea   : > { %v8022_v36 = vpop.f32.mrf.mxu1 }
 0x7ec   : > { %v8023_v38 = vpop.f32.mrf.mxu1 }
 0x7ed   : > { %v8024_v21 = vadd.f32 %v8023_v38, %v8022_v36 }
 0x7ee   : > { %v8025_v39 = vpop.f32.mrf.mxu1 }
 0x7ef   : > { %v6940_v28 = vadd.f32 %v8024_v21, %v7996_v22 }
 0x7f0   : > { %v8026_v17 = vpop.f32.mrf.mxu1 }
 0x7f1   : > { %6956 = vst [vmem:[%s10700_s7 + $0x10] sm:$0xff] %v6940_v28  ;;  %v8027_v43 = vadd.f32 %v8026_v17, %v8025_v39 }
 0x7f2   : > { %v8028_v25 = vpop.f32.mrf.mxu1 }
 0x7f3   : > { %v6943_v32 = vadd.f32 %v8027_v43, %v7999_v42 }
 0x7f4   : > { %v8029_v48 = vpop.f32.mrf.mxu1 }
 0x7f5   : > { %6959 = vst [vmem:[%s10700_s7 + $0x28] sm:$0xff] %v6943_v32  ;;  %v8030_v41 = vadd.f32 %v8029_v48, %v8028_v25 }
 0x7f6   : > { %v8031_v51 = vpop.f32.mrf.mxu1 }
 0x7f7   : > { %v6948_v62 = vadd.f32 %v8030_v41, %v8002_v16 }
 0x7f8   : > { %v8032_v63 = vpop.f32.mrf.mxu1 }
 0x7f9   : > { %6962 = vst [vmem:[%s10700_s7 + $0x40] sm:$0xff] %v6948_v62  ;;  %v8033_v7 = vadd.f32 %v8032_v63, %v8031_v51 }
 0x7fb   : > { %v6951_v49 = vadd.f32 %v8033_v7, %v8005_v2 }
 0x7fd   : > { %6965 = vst [vmem:[%s10700_s7 + $0x58] sm:$0xff] %v6951_v49 }
 0x7fe PF: > { %s10750_s27 = sld [smem:[#allocation19_spill]]  ;;  %s10753_s24 = smov %s9529_s25 }
 0x7ff   : > { %s10751_s28 = sld [smem:[#allocation18_spill]] }
 0x800   : > { %s10752_s26 = sld [smem:[#allocation20_spill]] }
 0x804   : > { %p22_p10 = scmp.ge.s32.totalorder %s10750_s27, 4  }
 0x805   : > { %s10754_s25 = smov %s10751_s28 }
 0x806   :  { %24 = sbr.rel (!%p22_p10) target bundleno = 11 (0xb), region = 129 }
 0x80b   :  { %6977 = vsyncpa [#allocation4], 1 }
 0x80c   :  { %6979 = vsyncpa [#allocation4 + $0x1], 1 }
 0x80d   :  { %6980 = vsyncpa [#allocation6], 1 }
 0x80e   :  { %6982 = vsyncpa [#allocation6 + $0x1], 1 }
 0x80f   :  { %6983 = vsyncpa [#allocation9], 1 }
 0x810   :  { %6985 = vsyncpa [#allocation9 + $0x1], 1 }
 0x811   :  { %6986 = vsyncpa [#allocation12], 1 }

</bundles_post_ra>
